<compile_context>
chip_gen: v6e
topology: v6e:2x2x1
jax: 0.10.0
libtpu: 0.0.40
codegen_flags: <defaults>
</compile_context>

<pallas_src>
import numpy as np
import jax
import jax.numpy as jnp
from jax.experimental import pallas as pl
from jax.experimental.pallas import tpu as pltpu

H = 6        # hidden size (nn.LSTM(hidden_size=6))
G = 4 * H    # gate width, PyTorch gate order (i, f, g, o)


def _mac(acc, h, w):
    """acc + h @ w  computed as H VPU broadcast-multiply-adds (no MXU).

    h: (B, H_in), w: (H_in, 4H), acc: (B, 4H).
    """
    for k in range(w.shape[0]):
        acc = acc + h[:, k:k + 1] * w[k:k + 1, :]
    return acc


def _lstm2_kernel(x_ref, wih0_ref, whh0_ref, b0_ref,
                  wih1_ref, whh1_ref, b1_ref, out_ref):
    # x_ref: (B, T, 1) ; out_ref: (B, T, H)
    B, T, _ = x_ref.shape

    # Loop-invariant weight/bias loads, hoisted out of the recurrence.
    wih0 = wih0_ref[...]                          # (1, 4H)  i/f/o cols pre-scaled by 0.5
    whh0 = whh0_ref[...]                          # (H, 4H)
    b0 = b0_ref[...]                              # (1, 4H)
    wih1 = wih1_ref[...]                          # (H, 4H)
    whh1 = whh1_ref[...]                          # (H, 4H)
    b1 = jnp.broadcast_to(b1_ref[...], (B, G))    # pre-broadcast once, (B, 4H)

    # Time-parallel layer-0 input term (+ bias): no dependence on h/c, so it
    # is pulled off the serial chain and vectorized over time.
    x = x_ref[...]                                # (B, T, 1)
    xg0_all = x * wih0 + b0                       # (B, T, 4H)

    def cell(pre, c_prev):
        # `pre` holds z/2 for the i/f/o lanes (scale folded into the weights)
        # and z for the g lanes, so one tanh yields all four activations:
        #   sigmoid(z) = 0.5 * (1 + tanh(z/2)),  tanh(z) for g.
        a = jnp.tanh(pre)                         # single EUP op over (B, 4H)
        i = 0.5 * (a[:, 0:H] + 1.0)
        f = 0.5 * (a[:, H:2 * H] + 1.0)
        g = a[:, 2 * H:3 * H]
        o = 0.5 * (a[:, 3 * H:4 * H] + 1.0)
        c = f * c_prev + i * g
        h = o * jnp.tanh(c)
        return h, c

    zeros = jnp.zeros((B, H), jnp.float32)
    h0, c0, h1, c1 = zeros, zeros, zeros, zeros

    for t in range(T):                            # fully unrolled (T is static)
        # layer 0
        pre0 = _mac(xg0_all[:, t, :], h0, whh0)
        h0, c0 = cell(pre0, c0)
        # layer 1 (input = layer-0 hidden at the same timestep)
        pre1 = _mac(_mac(b1, h0, wih1), h1, whh1)
        h1, c1 = cell(pre1, c1)
        out_ref[:, t, :] = h1                     # VMEM store, off critical path


def prepare_params(w_ih_l0, w_hh_l0, b_ih_l0, b_hh_l0,
                   w_ih_l1, w_hh_l1, b_ih_l1, b_hh_l1):
    """PyTorch-layout LSTM weights -> kernel layout.

    Transposes to right-multiply layout, merges b_ih + b_hh, and folds the
    0.5 sigmoid-as-tanh scale into the i/f/o gate columns and biases.
    """
    scale = jnp.concatenate([
        jnp.full((H,), 0.5, jnp.float32),   # i
        jnp.full((H,), 0.5, jnp.float32),   # f
        jnp.ones((H,), jnp.float32),        # g (stays a plain tanh)
        jnp.full((H,), 0.5, jnp.float32),   # o
    ])
    return dict(
        wih0=(w_ih_l0.T * scale).astype(jnp.float32),                     # (1, 4H)
        whh0=(w_hh_l0.T * scale).astype(jnp.float32),                     # (H, 4H)
        b0=(((b_ih_l0 + b_hh_l0) * scale)[None, :]).astype(jnp.float32),  # (1, 4H)
        wih1=(w_ih_l1.T * scale).astype(jnp.float32),                     # (H, 4H)
        whh1=(w_hh_l1.T * scale).astype(jnp.float32),                     # (H, 4H)
        b1=(((b_ih_l1 + b_hh_l1) * scale)[None, :]).astype(jnp.float32),  # (1, 4H)
    )


def replicator_forward(x, params):
    """x: (B, T, 1) -> all layer-2 hidden states, (B, T, H) float32."""
    x = jnp.asarray(x, jnp.float32)               # mirrors x.astype(np.float32)
    B, T, _ = x.shape
    vmem = pl.BlockSpec(memory_space=pltpu.MemorySpace.VMEM)
    return pl.pallas_call(
        _lstm2_kernel,
        out_shape=jax.ShapeDtypeStruct((B, T, H), jnp.float32),
        in_specs=[vmem] * 7,
        out_specs=vmem,
    )(x, params["wih0"], params["whh0"], params["b0"],
      params["wih1"], params["whh1"], params["b1"])


def lstm_ref(x, raw):
    """Pure-JAX reference with PyTorch nn.LSTM semantics (2 layers)."""
    x = jnp.asarray(x, jnp.float32)
    B, T, _ = x.shape
    h = [jnp.zeros((B, H), jnp.float32) for _ in range(2)]
    c = [jnp.zeros((B, H), jnp.float32) for _ in range(2)]

    def cell(z, c_prev):
        i = jax.nn.sigmoid(z[:, 0:H])
        f = jax.nn.sigmoid(z[:, H:2 * H])
        g = jnp.tanh(z[:, 2 * H:3 * H])
        o = jax.nn.sigmoid(z[:, 3 * H:4 * H])
        c_new = f * c_prev + i * g
        return o * jnp.tanh(c_new), c_new

    outs = []
    for t in range(T):
        inp = x[:, t, :]
        z0 = (inp @ raw["w_ih_l0"].T + h[0] @ raw["w_hh_l0"].T
              + raw["b_ih_l0"] + raw["b_hh_l0"])
        h[0], c[0] = cell(z0, c[0])
        z1 = (h[0] @ raw["w_ih_l1"].T + h[1] @ raw["w_hh_l1"].T
              + raw["b_ih_l1"] + raw["b_hh_l1"])
        h[1], c[1] = cell(z1, c[1])
        outs.append(h[1])
    return jnp.stack(outs, axis=1)                # (B, T, H)


if __name__ == "__main__":
    B, T = 2, 8

    key = jax.random.PRNGKey(0)
    keys = jax.random.split(key, 9)
    bound = 1.0 / float(np.sqrt(H))               # PyTorch LSTM default init

    def u(k, shape):
        return jax.random.uniform(k, shape, jnp.float32, -bound, bound)

    # Raw weights in PyTorch layout.
    raw = dict(
        w_ih_l0=u(keys[0], (G, 1)),
        w_hh_l0=u(keys[1], (G, H)),
        b_ih_l0=u(keys[2], (G,)),
        b_hh_l0=u(keys[3], (G,)),
        w_ih_l1=u(keys[4], (G, H)),
        w_hh_l1=u(keys[5], (G, H)),
        b_ih_l1=u(keys[6], (G,)),
        b_hh_l1=u(keys[7], (G,)),
    )
    params = prepare_params(**raw)

    x = jax.random.normal(keys[8], (B, T, 1), jnp.float32)

    out = replicator_forward(x, params)
    jax.block_until_ready(out)

    ref = lstm_ref(x, raw)
    assert out.shape == (B, T, H)
    np.testing.assert_allclose(np.asarray(out), np.asarray(ref),
                               rtol=1e-4, atol=1e-5)
    print("KERNEL_OK")
</pallas_src>

<mosaic_0001>
module attributes {stable_mosaic.version = 11 : i64} {
  func.func @_lstm2_kernel(%arg0: memref<2x8x1xf32, #tpu.memory_space<vmem>>, %arg1: memref<1x24xf32, #tpu.memory_space<vmem>>, %arg2: memref<6x24xf32, #tpu.memory_space<vmem>>, %arg3: memref<1x24xf32, #tpu.memory_space<vmem>>, %arg4: memref<6x24xf32, #tpu.memory_space<vmem>>, %arg5: memref<6x24xf32, #tpu.memory_space<vmem>>, %arg6: memref<1x24xf32, #tpu.memory_space<vmem>>, %arg7: memref<2x8x6xf32, #tpu.memory_space<vmem>>) attributes {dimension_semantics = [], scalar_prefetch = 0 : i64, scratch_operands = 0 : i64, tpu.core_type = #tpu.core_type<tc>} {
    %c0 = arith.constant 0 : index
    %c0_0 = arith.constant 0 : index
    %0 = vector.load %arg1[%c0, %c0_0] : memref<1x24xf32, #tpu.memory_space<vmem>>, vector<1x24xf32>
    %c0_1 = arith.constant 0 : index
    %c0_2 = arith.constant 0 : index
    %1 = vector.load %arg2[%c0_1, %c0_2] : memref<6x24xf32, #tpu.memory_space<vmem>>, vector<6x24xf32>
    %c0_3 = arith.constant 0 : index
    %c0_4 = arith.constant 0 : index
    %2 = vector.load %arg3[%c0_3, %c0_4] : memref<1x24xf32, #tpu.memory_space<vmem>>, vector<1x24xf32>
    %c0_5 = arith.constant 0 : index
    %c0_6 = arith.constant 0 : index
    %3 = vector.load %arg4[%c0_5, %c0_6] : memref<6x24xf32, #tpu.memory_space<vmem>>, vector<6x24xf32>
    %c0_7 = arith.constant 0 : index
    %c0_8 = arith.constant 0 : index
    %4 = vector.load %arg5[%c0_7, %c0_8] : memref<6x24xf32, #tpu.memory_space<vmem>>, vector<6x24xf32>
    %c0_9 = arith.constant 0 : index
    %c0_10 = arith.constant 0 : index
    %5 = vector.load %arg6[%c0_9, %c0_10] : memref<1x24xf32, #tpu.memory_space<vmem>>, vector<1x24xf32>
    %6 = vector.shape_cast %5 : vector<1x24xf32> to vector<1x24xf32>
    %7 = vector.broadcast %6 : vector<1x24xf32> to vector<2x24xf32>
    %c0_11 = arith.constant 0 : index
    %c0_12 = arith.constant 0 : index
    %c0_13 = arith.constant 0 : index
    %8 = vector.load %arg0[%c0_11, %c0_12, %c0_13] : memref<2x8x1xf32, #tpu.memory_space<vmem>>, vector<2x8x1xf32>
    %9 = vector.shape_cast %0 : vector<1x24xf32> to vector<1x1x24xf32>
    %10 = vector.broadcast %8 : vector<2x8x1xf32> to vector<2x8x24xf32>
    %11 = vector.broadcast %9 : vector<1x1x24xf32> to vector<2x8x24xf32>
    %12 = arith.mulf %10, %11 : vector<2x8x24xf32>
    %13 = vector.shape_cast %2 : vector<1x24xf32> to vector<1x1x24xf32>
    %14 = vector.broadcast %13 : vector<1x1x24xf32> to vector<2x8x24xf32>
    %15 = arith.addf %12, %14 : vector<2x8x24xf32>
    %cst = arith.constant 0.000000e+00 : f32
    %16 = vector.broadcast %cst : f32 to vector<2x6xf32>
    %17 = vector.extract_strided_slice %15 {offsets = [0, 0, 0], sizes = [2, 1, 24], strides = [1, 1, 1]} : vector<2x8x24xf32> to vector<2x1x24xf32>
    %18 = vector.shape_cast %17 : vector<2x1x24xf32> to vector<2x24xf32>
    %19 = vector.extract_strided_slice %16 {offsets = [0, 0], sizes = [2, 1], strides = [1, 1]} : vector<2x6xf32> to vector<2x1xf32>
    %20 = vector.extract_strided_slice %1 {offsets = [0, 0], sizes = [1, 24], strides = [1, 1]} : vector<6x24xf32> to vector<1x24xf32>
    %21 = vector.broadcast %19 : vector<2x1xf32> to vector<2x24xf32>
    %22 = vector.broadcast %20 : vector<1x24xf32> to vector<2x24xf32>
    %23 = arith.mulf %21, %22 : vector<2x24xf32>
    %24 = arith.addf %18, %23 : vector<2x24xf32>
    %25 = vector.extract_strided_slice %16 {offsets = [0, 1], sizes = [2, 1], strides = [1, 1]} : vector<2x6xf32> to vector<2x1xf32>
    %26 = vector.extract_strided_slice %1 {offsets = [1, 0], sizes = [1, 24], strides = [1, 1]} : vector<6x24xf32> to vector<1x24xf32>
    %27 = vector.broadcast %25 : vector<2x1xf32> to vector<2x24xf32>
    %28 = vector.broadcast %26 : vector<1x24xf32> to vector<2x24xf32>
    %29 = arith.mulf %27, %28 : vector<2x24xf32>
    %30 = arith.addf %24, %29 : vector<2x24xf32>
    %31 = vector.extract_strided_slice %16 {offsets = [0, 2], sizes = [2, 1], strides = [1, 1]} : vector<2x6xf32> to vector<2x1xf32>
    %32 = vector.extract_strided_slice %1 {offsets = [2, 0], sizes = [1, 24], strides = [1, 1]} : vector<6x24xf32> to vector<1x24xf32>
    %33 = vector.broadcast %31 : vector<2x1xf32> to vector<2x24xf32>
    %34 = vector.broadcast %32 : vector<1x24xf32> to vector<2x24xf32>
    %35 = arith.mulf %33, %34 : vector<2x24xf32>
    %36 = arith.addf %30, %35 : vector<2x24xf32>
    %37 = vector.extract_strided_slice %16 {offsets = [0, 3], sizes = [2, 1], strides = [1, 1]} : vector<2x6xf32> to vector<2x1xf32>
    %38 = vector.extract_strided_slice %1 {offsets = [3, 0], sizes = [1, 24], strides = [1, 1]} : vector<6x24xf32> to vector<1x24xf32>
    %39 = vector.broadcast %37 : vector<2x1xf32> to vector<2x24xf32>
    %40 = vector.broadcast %38 : vector<1x24xf32> to vector<2x24xf32>
    %41 = arith.mulf %39, %40 : vector<2x24xf32>
    %42 = arith.addf %36, %41 : vector<2x24xf32>
    %43 = vector.extract_strided_slice %16 {offsets = [0, 4], sizes = [2, 1], strides = [1, 1]} : vector<2x6xf32> to vector<2x1xf32>
    %44 = vector.extract_strided_slice %1 {offsets = [4, 0], sizes = [1, 24], strides = [1, 1]} : vector<6x24xf32> to vector<1x24xf32>
    %45 = vector.broadcast %43 : vector<2x1xf32> to vector<2x24xf32>
    %46 = vector.broadcast %44 : vector<1x24xf32> to vector<2x24xf32>
    %47 = arith.mulf %45, %46 : vector<2x24xf32>
    %48 = arith.addf %42, %47 : vector<2x24xf32>
    %49 = vector.extract_strided_slice %16 {offsets = [0, 5], sizes = [2, 1], strides = [1, 1]} : vector<2x6xf32> to vector<2x1xf32>
    %50 = vector.extract_strided_slice %1 {offsets = [5, 0], sizes = [1, 24], strides = [1, 1]} : vector<6x24xf32> to vector<1x24xf32>
    %51 = vector.broadcast %49 : vector<2x1xf32> to vector<2x24xf32>
    %52 = vector.broadcast %50 : vector<1x24xf32> to vector<2x24xf32>
    %53 = arith.mulf %51, %52 : vector<2x24xf32>
    %54 = arith.addf %48, %53 : vector<2x24xf32>
    %55 = math.tanh %54 : vector<2x24xf32>
    %56 = vector.extract_strided_slice %55 {offsets = [0, 0], sizes = [2, 6], strides = [1, 1]} : vector<2x24xf32> to vector<2x6xf32>
    %cst_14 = arith.constant 1.000000e+00 : f32
    %57 = vector.broadcast %cst_14 : f32 to vector<2x6xf32>
    %58 = arith.addf %56, %57 : vector<2x6xf32>
    %cst_15 = arith.constant 5.000000e-01 : f32
    %59 = vector.broadcast %cst_15 : f32 to vector<2x6xf32>
    %60 = arith.mulf %59, %58 : vector<2x6xf32>
    %61 = vector.extract_strided_slice %55 {offsets = [0, 6], sizes = [2, 6], strides = [1, 1]} : vector<2x24xf32> to vector<2x6xf32>
    %cst_16 = arith.constant 1.000000e+00 : f32
    %62 = vector.broadcast %cst_16 : f32 to vector<2x6xf32>
    %63 = arith.addf %61, %62 : vector<2x6xf32>
    %cst_17 = arith.constant 5.000000e-01 : f32
    %64 = vector.broadcast %cst_17 : f32 to vector<2x6xf32>
    %65 = arith.mulf %64, %63 : vector<2x6xf32>
    %66 = vector.extract_strided_slice %55 {offsets = [0, 12], sizes = [2, 6], strides = [1, 1]} : vector<2x24xf32> to vector<2x6xf32>
    %67 = vector.extract_strided_slice %55 {offsets = [0, 18], sizes = [2, 6], strides = [1, 1]} : vector<2x24xf32> to vector<2x6xf32>
    %cst_18 = arith.constant 1.000000e+00 : f32
    %68 = vector.broadcast %cst_18 : f32 to vector<2x6xf32>
    %69 = arith.addf %67, %68 : vector<2x6xf32>
    %cst_19 = arith.constant 5.000000e-01 : f32
    %70 = vector.broadcast %cst_19 : f32 to vector<2x6xf32>
    %71 = arith.mulf %70, %69 : vector<2x6xf32>
    %72 = arith.mulf %65, %16 : vector<2x6xf32>
    %73 = arith.mulf %60, %66 : vector<2x6xf32>
    %74 = arith.addf %72, %73 : vector<2x6xf32>
    %75 = math.tanh %74 : vector<2x6xf32>
    %76 = arith.mulf %71, %75 : vector<2x6xf32>
    %77 = vector.extract_strided_slice %76 {offsets = [0, 0], sizes = [2, 1], strides = [1, 1]} : vector<2x6xf32> to vector<2x1xf32>
    %78 = vector.extract_strided_slice %3 {offsets = [0, 0], sizes = [1, 24], strides = [1, 1]} : vector<6x24xf32> to vector<1x24xf32>
    %79 = vector.broadcast %77 : vector<2x1xf32> to vector<2x24xf32>
    %80 = vector.broadcast %78 : vector<1x24xf32> to vector<2x24xf32>
    %81 = arith.mulf %79, %80 : vector<2x24xf32>
    %82 = arith.addf %7, %81 : vector<2x24xf32>
    %83 = vector.extract_strided_slice %76 {offsets = [0, 1], sizes = [2, 1], strides = [1, 1]} : vector<2x6xf32> to vector<2x1xf32>
    %84 = vector.extract_strided_slice %3 {offsets = [1, 0], sizes = [1, 24], strides = [1, 1]} : vector<6x24xf32> to vector<1x24xf32>
    %85 = vector.broadcast %83 : vector<2x1xf32> to vector<2x24xf32>
    %86 = vector.broadcast %84 : vector<1x24xf32> to vector<2x24xf32>
    %87 = arith.mulf %85, %86 : vector<2x24xf32>
    %88 = arith.addf %82, %87 : vector<2x24xf32>
    %89 = vector.extract_strided_slice %76 {offsets = [0, 2], sizes = [2, 1], strides = [1, 1]} : vector<2x6xf32> to vector<2x1xf32>
    %90 = vector.extract_strided_slice %3 {offsets = [2, 0], sizes = [1, 24], strides = [1, 1]} : vector<6x24xf32> to vector<1x24xf32>
    %91 = vector.broadcast %89 : vector<2x1xf32> to vector<2x24xf32>
    %92 = vector.broadcast %90 : vector<1x24xf32> to vector<2x24xf32>
    %93 = arith.mulf %91, %92 : vector<2x24xf32>
    %94 = arith.addf %88, %93 : vector<2x24xf32>
    %95 = vector.extract_strided_slice %76 {offsets = [0, 3], sizes = [2, 1], strides = [1, 1]} : vector<2x6xf32> to vector<2x1xf32>
    %96 = vector.extract_strided_slice %3 {offsets = [3, 0], sizes = [1, 24], strides = [1, 1]} : vector<6x24xf32> to vector<1x24xf32>
    %97 = vector.broadcast %95 : vector<2x1xf32> to vector<2x24xf32>
    %98 = vector.broadcast %96 : vector<1x24xf32> to vector<2x24xf32>
    %99 = arith.mulf %97, %98 : vector<2x24xf32>
    %100 = arith.addf %94, %99 : vector<2x24xf32>
    %101 = vector.extract_strided_slice %76 {offsets = [0, 4], sizes = [2, 1], strides = [1, 1]} : vector<2x6xf32> to vector<2x1xf32>
    %102 = vector.extract_strided_slice %3 {offsets = [4, 0], sizes = [1, 24], strides = [1, 1]} : vector<6x24xf32> to vector<1x24xf32>
    %103 = vector.broadcast %101 : vector<2x1xf32> to vector<2x24xf32>
    %104 = vector.broadcast %102 : vector<1x24xf32> to vector<2x24xf32>
    %105 = arith.mulf %103, %104 : vector<2x24xf32>
    %106 = arith.addf %100, %105 : vector<2x24xf32>
    %107 = vector.extract_strided_slice %76 {offsets = [0, 5], sizes = [2, 1], strides = [1, 1]} : vector<2x6xf32> to vector<2x1xf32>
    %108 = vector.extract_strided_slice %3 {offsets = [5, 0], sizes = [1, 24], strides = [1, 1]} : vector<6x24xf32> to vector<1x24xf32>
    %109 = vector.broadcast %107 : vector<2x1xf32> to vector<2x24xf32>
    %110 = vector.broadcast %108 : vector<1x24xf32> to vector<2x24xf32>
    %111 = arith.mulf %109, %110 : vector<2x24xf32>
    %112 = arith.addf %106, %111 : vector<2x24xf32>
    %113 = vector.extract_strided_slice %16 {offsets = [0, 0], sizes = [2, 1], strides = [1, 1]} : vector<2x6xf32> to vector<2x1xf32>
    %114 = vector.extract_strided_slice %4 {offsets = [0, 0], sizes = [1, 24], strides = [1, 1]} : vector<6x24xf32> to vector<1x24xf32>
    %115 = vector.broadcast %113 : vector<2x1xf32> to vector<2x24xf32>
    %116 = vector.broadcast %114 : vector<1x24xf32> to vector<2x24xf32>
    %117 = arith.mulf %115, %116 : vector<2x24xf32>
    %118 = arith.addf %112, %117 : vector<2x24xf32>
    %119 = vector.extract_strided_slice %16 {offsets = [0, 1], sizes = [2, 1], strides = [1, 1]} : vector<2x6xf32> to vector<2x1xf32>
    %120 = vector.extract_strided_slice %4 {offsets = [1, 0], sizes = [1, 24], strides = [1, 1]} : vector<6x24xf32> to vector<1x24xf32>
    %121 = vector.broadcast %119 : vector<2x1xf32> to vector<2x24xf32>
    %122 = vector.broadcast %120 : vector<1x24xf32> to vector<2x24xf32>
    %123 = arith.mulf %121, %122 : vector<2x24xf32>
    %124 = arith.addf %118, %123 : vector<2x24xf32>
    %125 = vector.extract_strided_slice %16 {offsets = [0, 2], sizes = [2, 1], strides = [1, 1]} : vector<2x6xf32> to vector<2x1xf32>
    %126 = vector.extract_strided_slice %4 {offsets = [2, 0], sizes = [1, 24], strides = [1, 1]} : vector<6x24xf32> to vector<1x24xf32>
    %127 = vector.broadcast %125 : vector<2x1xf32> to vector<2x24xf32>
    %128 = vector.broadcast %126 : vector<1x24xf32> to vector<2x24xf32>
    %129 = arith.mulf %127, %128 : vector<2x24xf32>
    %130 = arith.addf %124, %129 : vector<2x24xf32>
    %131 = vector.extract_strided_slice %16 {offsets = [0, 3], sizes = [2, 1], strides = [1, 1]} : vector<2x6xf32> to vector<2x1xf32>
    %132 = vector.extract_strided_slice %4 {offsets = [3, 0], sizes = [1, 24], strides = [1, 1]} : vector<6x24xf32> to vector<1x24xf32>
    %133 = vector.broadcast %131 : vector<2x1xf32> to vector<2x24xf32>
    %134 = vector.broadcast %132 : vector<1x24xf32> to vector<2x24xf32>
    %135 = arith.mulf %133, %134 : vector<2x24xf32>
    %136 = arith.addf %130, %135 : vector<2x24xf32>
    %137 = vector.extract_strided_slice %16 {offsets = [0, 4], sizes = [2, 1], strides = [1, 1]} : vector<2x6xf32> to vector<2x1xf32>
    %138 = vector.extract_strided_slice %4 {offsets = [4, 0], sizes = [1, 24], strides = [1, 1]} : vector<6x24xf32> to vector<1x24xf32>
    %139 = vector.broadcast %137 : vector<2x1xf32> to vector<2x24xf32>
    %140 = vector.broadcast %138 : vector<1x24xf32> to vector<2x24xf32>
    %141 = arith.mulf %139, %140 : vector<2x24xf32>
    %142 = arith.addf %136, %141 : vector<2x24xf32>
    %143 = vector.extract_strided_slice %16 {offsets = [0, 5], sizes = [2, 1], strides = [1, 1]} : vector<2x6xf32> to vector<2x1xf32>
    %144 = vector.extract_strided_slice %4 {offsets = [5, 0], sizes = [1, 24], strides = [1, 1]} : vector<6x24xf32> to vector<1x24xf32>
    %145 = vector.broadcast %143 : vector<2x1xf32> to vector<2x24xf32>
    %146 = vector.broadcast %144 : vector<1x24xf32> to vector<2x24xf32>
    %147 = arith.mulf %145, %146 : vector<2x24xf32>
    %148 = arith.addf %142, %147 : vector<2x24xf32>
    %149 = math.tanh %148 : vector<2x24xf32>
    %150 = vector.extract_strided_slice %149 {offsets = [0, 0], sizes = [2, 6], strides = [1, 1]} : vector<2x24xf32> to vector<2x6xf32>
    %cst_20 = arith.constant 1.000000e+00 : f32
    %151 = vector.broadcast %cst_20 : f32 to vector<2x6xf32>
    %152 = arith.addf %150, %151 : vector<2x6xf32>
    %cst_21 = arith.constant 5.000000e-01 : f32
    %153 = vector.broadcast %cst_21 : f32 to vector<2x6xf32>
    %154 = arith.mulf %153, %152 : vector<2x6xf32>
    %155 = vector.extract_strided_slice %149 {offsets = [0, 6], sizes = [2, 6], strides = [1, 1]} : vector<2x24xf32> to vector<2x6xf32>
    %cst_22 = arith.constant 1.000000e+00 : f32
    %156 = vector.broadcast %cst_22 : f32 to vector<2x6xf32>
    %157 = arith.addf %155, %156 : vector<2x6xf32>
    %cst_23 = arith.constant 5.000000e-01 : f32
    %158 = vector.broadcast %cst_23 : f32 to vector<2x6xf32>
    %159 = arith.mulf %158, %157 : vector<2x6xf32>
    %160 = vector.extract_strided_slice %149 {offsets = [0, 12], sizes = [2, 6], strides = [1, 1]} : vector<2x24xf32> to vector<2x6xf32>
    %161 = vector.extract_strided_slice %149 {offsets = [0, 18], sizes = [2, 6], strides = [1, 1]} : vector<2x24xf32> to vector<2x6xf32>
    %cst_24 = arith.constant 1.000000e+00 : f32
    %162 = vector.broadcast %cst_24 : f32 to vector<2x6xf32>
    %163 = arith.addf %161, %162 : vector<2x6xf32>
    %cst_25 = arith.constant 5.000000e-01 : f32
    %164 = vector.broadcast %cst_25 : f32 to vector<2x6xf32>
    %165 = arith.mulf %164, %163 : vector<2x6xf32>
    %166 = arith.mulf %159, %16 : vector<2x6xf32>
    %167 = arith.mulf %154, %160 : vector<2x6xf32>
    %168 = arith.addf %166, %167 : vector<2x6xf32>
    %169 = math.tanh %168 : vector<2x6xf32>
    %170 = arith.mulf %165, %169 : vector<2x6xf32>
    %c0_26 = arith.constant 0 : index
    %c0_27 = arith.constant 0 : index
    %c0_28 = arith.constant 0 : index
    %171 = vector.load %arg7[%c0_26, %c0_27, %c0_28] : memref<2x8x6xf32, #tpu.memory_space<vmem>>, vector<2x1x6xf32>
    %172 = vector.shape_cast %171 : vector<2x1x6xf32> to vector<2x6xf32>
    %173 = vector.shape_cast %170 : vector<2x6xf32> to vector<2x1x6xf32>
    tpu.vector_store %arg7[%c0_26, %c0_27, %c0_28], %173 {strides = array<i32>} : memref<2x8x6xf32, #tpu.memory_space<vmem>>, vector<2x1x6xf32>,
    %174 = vector.extract_strided_slice %15 {offsets = [0, 1, 0], sizes = [2, 1, 24], strides = [1, 1, 1]} : vector<2x8x24xf32> to vector<2x1x24xf32>
    %175 = vector.shape_cast %174 : vector<2x1x24xf32> to vector<2x24xf32>
    %176 = vector.extract_strided_slice %76 {offsets = [0, 0], sizes = [2, 1], strides = [1, 1]} : vector<2x6xf32> to vector<2x1xf32>
    %177 = vector.extract_strided_slice %1 {offsets = [0, 0], sizes = [1, 24], strides = [1, 1]} : vector<6x24xf32> to vector<1x24xf32>
    %178 = vector.broadcast %176 : vector<2x1xf32> to vector<2x24xf32>
    %179 = vector.broadcast %177 : vector<1x24xf32> to vector<2x24xf32>
    %180 = arith.mulf %178, %179 : vector<2x24xf32>
    %181 = arith.addf %175, %180 : vector<2x24xf32>
    %182 = vector.extract_strided_slice %76 {offsets = [0, 1], sizes = [2, 1], strides = [1, 1]} : vector<2x6xf32> to vector<2x1xf32>
    %183 = vector.extract_strided_slice %1 {offsets = [1, 0], sizes = [1, 24], strides = [1, 1]} : vector<6x24xf32> to vector<1x24xf32>
    %184 = vector.broadcast %182 : vector<2x1xf32> to vector<2x24xf32>
    %185 = vector.broadcast %183 : vector<1x24xf32> to vector<2x24xf32>
    %186 = arith.mulf %184, %185 : vector<2x24xf32>
    %187 = arith.addf %181, %186 : vector<2x24xf32>
    %188 = vector.extract_strided_slice %76 {offsets = [0, 2], sizes = [2, 1], strides = [1, 1]} : vector<2x6xf32> to vector<2x1xf32>
    %189 = vector.extract_strided_slice %1 {offsets = [2, 0], sizes = [1, 24], strides = [1, 1]} : vector<6x24xf32> to vector<1x24xf32>
    %190 = vector.broadcast %188 : vector<2x1xf32> to vector<2x24xf32>
    %191 = vector.broadcast %189 : vector<1x24xf32> to vector<2x24xf32>
    %192 = arith.mulf %190, %191 : vector<2x24xf32>
    %193 = arith.addf %187, %192 : vector<2x24xf32>
    %194 = vector.extract_strided_slice %76 {offsets = [0, 3], sizes = [2, 1], strides = [1, 1]} : vector<2x6xf32> to vector<2x1xf32>
    %195 = vector.extract_strided_slice %1 {offsets = [3, 0], sizes = [1, 24], strides = [1, 1]} : vector<6x24xf32> to vector<1x24xf32>
    %196 = vector.broadcast %194 : vector<2x1xf32> to vector<2x24xf32>
    %197 = vector.broadcast %195 : vector<1x24xf32> to vector<2x24xf32>
    %198 = arith.mulf %196, %197 : vector<2x24xf32>
    %199 = arith.addf %193, %198 : vector<2x24xf32>
    %200 = vector.extract_strided_slice %76 {offsets = [0, 4], sizes = [2, 1], strides = [1, 1]} : vector<2x6xf32> to vector<2x1xf32>
    %201 = vector.extract_strided_slice %1 {offsets = [4, 0], sizes = [1, 24], strides = [1, 1]} : vector<6x24xf32> to vector<1x24xf32>
    %202 = vector.broadcast %200 : vector<2x1xf32> to vector<2x24xf32>
    %203 = vector.broadcast %201 : vector<1x24xf32> to vector<2x24xf32>
    %204 = arith.mulf %202, %203 : vector<2x24xf32>
    %205 = arith.addf %199, %204 : vector<2x24xf32>
    %206 = vector.extract_strided_slice %76 {offsets = [0, 5], sizes = [2, 1], strides = [1, 1]} : vector<2x6xf32> to vector<2x1xf32>
    %207 = vector.extract_strided_slice %1 {offsets = [5, 0], sizes = [1, 24], strides = [1, 1]} : vector<6x24xf32> to vector<1x24xf32>
    %208 = vector.broadcast %206 : vector<2x1xf32> to vector<2x24xf32>
    %209 = vector.broadcast %207 : vector<1x24xf32> to vector<2x24xf32>
    %210 = arith.mulf %208, %209 : vector<2x24xf32>
    %211 = arith.addf %205, %210 : vector<2x24xf32>
    %212 = math.tanh %211 : vector<2x24xf32>
    %213 = vector.extract_strided_slice %212 {offsets = [0, 0], sizes = [2, 6], strides = [1, 1]} : vector<2x24xf32> to vector<2x6xf32>
    %cst_29 = arith.constant 1.000000e+00 : f32
    %214 = vector.broadcast %cst_29 : f32 to vector<2x6xf32>
    %215 = arith.addf %213, %214 : vector<2x6xf32>
    %cst_30 = arith.constant 5.000000e-01 : f32
    %216 = vector.broadcast %cst_30 : f32 to vector<2x6xf32>
    %217 = arith.mulf %216, %215 : vector<2x6xf32>
    %218 = vector.extract_strided_slice %212 {offsets = [0, 6], sizes = [2, 6], strides = [1, 1]} : vector<2x24xf32> to vector<2x6xf32>
    %cst_31 = arith.constant 1.000000e+00 : f32
    %219 = vector.broadcast %cst_31 : f32 to vector<2x6xf32>
    %220 = arith.addf %218, %219 : vector<2x6xf32>
    %cst_32 = arith.constant 5.000000e-01 : f32
    %221 = vector.broadcast %cst_32 : f32 to vector<2x6xf32>
    %222 = arith.mulf %221, %220 : vector<2x6xf32>
    %223 = vector.extract_strided_slice %212 {offsets = [0, 12], sizes = [2, 6], strides = [1, 1]} : vector<2x24xf32> to vector<2x6xf32>
    %224 = vector.extract_strided_slice %212 {offsets = [0, 18], sizes = [2, 6], strides = [1, 1]} : vector<2x24xf32> to vector<2x6xf32>
    %cst_33 = arith.constant 1.000000e+00 : f32
    %225 = vector.broadcast %cst_33 : f32 to vector<2x6xf32>
    %226 = arith.addf %224, %225 : vector<2x6xf32>
    %cst_34 = arith.constant 5.000000e-01 : f32
    %227 = vector.broadcast %cst_34 : f32 to vector<2x6xf32>
    %228 = arith.mulf %227, %226 : vector<2x6xf32>
    %229 = arith.mulf %222, %74 : vector<2x6xf32>
    %230 = arith.mulf %217, %223 : vector<2x6xf32>
    %231 = arith.addf %229, %230 : vector<2x6xf32>
    %232 = math.tanh %231 : vector<2x6xf32>
    %233 = arith.mulf %228, %232 : vector<2x6xf32>
    %234 = vector.extract_strided_slice %233 {offsets = [0, 0], sizes = [2, 1], strides = [1, 1]} : vector<2x6xf32> to vector<2x1xf32>
    %235 = vector.extract_strided_slice %3 {offsets = [0, 0], sizes = [1, 24], strides = [1, 1]} : vector<6x24xf32> to vector<1x24xf32>
    %236 = vector.broadcast %234 : vector<2x1xf32> to vector<2x24xf32>
    %237 = vector.broadcast %235 : vector<1x24xf32> to vector<2x24xf32>
    %238 = arith.mulf %236, %237 : vector<2x24xf32>
    %239 = arith.addf %7, %238 : vector<2x24xf32>
    %240 = vector.extract_strided_slice %233 {offsets = [0, 1], sizes = [2, 1], strides = [1, 1]} : vector<2x6xf32> to vector<2x1xf32>
    %241 = vector.extract_strided_slice %3 {offsets = [1, 0], sizes = [1, 24], strides = [1, 1]} : vector<6x24xf32> to vector<1x24xf32>
    %242 = vector.broadcast %240 : vector<2x1xf32> to vector<2x24xf32>
    %243 = vector.broadcast %241 : vector<1x24xf32> to vector<2x24xf32>
    %244 = arith.mulf %242, %243 : vector<2x24xf32>
    %245 = arith.addf %239, %244 : vector<2x24xf32>
    %246 = vector.extract_strided_slice %233 {offsets = [0, 2], sizes = [2, 1], strides = [1, 1]} : vector<2x6xf32> to vector<2x1xf32>
    %247 = vector.extract_strided_slice %3 {offsets = [2, 0], sizes = [1, 24], strides = [1, 1]} : vector<6x24xf32> to vector<1x24xf32>
    %248 = vector.broadcast %246 : vector<2x1xf32> to vector<2x24xf32>
    %249 = vector.broadcast %247 : vector<1x24xf32> to vector<2x24xf32>
    %250 = arith.mulf %248, %249 : vector<2x24xf32>
    %251 = arith.addf %245, %250 : vector<2x24xf32>
    %252 = vector.extract_strided_slice %233 {offsets = [0, 3], sizes = [2, 1], strides = [1, 1]} : vector<2x6xf32> to vector<2x1xf32>
    %253 = vector.extract_strided_slice %3 {offsets = [3, 0], sizes = [1, 24], strides = [1, 1]} : vector<6x24xf32> to vector<1x24xf32>
    %254 = vector.broadcast %252 : vector<2x1xf32> to vector<2x24xf32>
    %255 = vector.broadcast %253 : vector<1x24xf32> to vector<2x24xf32>
    %256 = arith.mulf %254, %255 : vector<2x24xf32>
    %257 = arith.addf %251, %256 : vector<2x24xf32>
    %258 = vector.extract_strided_slice %233 {offsets = [0, 4], sizes = [2, 1], strides = [1, 1]} : vector<2x6xf32> to vector<2x1xf32>
    %259 = vector.extract_strided_slice %3 {offsets = [4, 0], sizes = [1, 24], strides = [1, 1]} : vector<6x24xf32> to vector<1x24xf32>
    %260 = vector.broadcast %258 : vector<2x1xf32> to vector<2x24xf32>
    %261 = vector.broadcast %259 : vector<1x24xf32> to vector<2x24xf32>
    %262 = arith.mulf %260, %261 : vector<2x24xf32>
    %263 = arith.addf %257, %262 : vector<2x24xf32>
    %264 = vector.extract_strided_slice %233 {offsets = [0, 5], sizes = [2, 1], strides = [1, 1]} : vector<2x6xf32> to vector<2x1xf32>
    %265 = vector.extract_strided_slice %3 {offsets = [5, 0], sizes = [1, 24], strides = [1, 1]} : vector<6x24xf32> to vector<1x24xf32>
    %266 = vector.broadcast %264 : vector<2x1xf32> to vector<2x24xf32>
    %267 = vector.broadcast %265 : vector<1x24xf32> to vector<2x24xf32>
    %268 = arith.mulf %266, %267 : vector<2x24xf32>
    %269 = arith.addf %263, %268 : vector<2x24xf32>
    %270 = vector.extract_strided_slice %170 {offsets = [0, 0], sizes = [2, 1], strides = [1, 1]} : vector<2x6xf32> to vector<2x1xf32>
    %271 = vector.extract_strided_slice %4 {offsets = [0, 0], sizes = [1, 24], strides = [1, 1]} : vector<6x24xf32> to vector<1x24xf32>
    %272 = vector.broadcast %270 : vector<2x1xf32> to vector<2x24xf32>
    %273 = vector.broadcast %271 : vector<1x24xf32> to vector<2x24xf32>
    %274 = arith.mulf %272, %273 : vector<2x24xf32>
    %275 = arith.addf %269, %274 : vector<2x24xf32>
    %276 = vector.extract_strided_slice %170 {offsets = [0, 1], sizes = [2, 1], strides = [1, 1]} : vector<2x6xf32> to vector<2x1xf32>
    %277 = vector.extract_strided_slice %4 {offsets = [1, 0], sizes = [1, 24], strides = [1, 1]} : vector<6x24xf32> to vector<1x24xf32>
    %278 = vector.broadcast %276 : vector<2x1xf32> to vector<2x24xf32>
    %279 = vector.broadcast %277 : vector<1x24xf32> to vector<2x24xf32>
    %280 = arith.mulf %278, %279 : vector<2x24xf32>
    %281 = arith.addf %275, %280 : vector<2x24xf32>
    %282 = vector.extract_strided_slice %170 {offsets = [0, 2], sizes = [2, 1], strides = [1, 1]} : vector<2x6xf32> to vector<2x1xf32>
    %283 = vector.extract_strided_slice %4 {offsets = [2, 0], sizes = [1, 24], strides = [1, 1]} : vector<6x24xf32> to vector<1x24xf32>
    %284 = vector.broadcast %282 : vector<2x1xf32> to vector<2x24xf32>
    %285 = vector.broadcast %283 : vector<1x24xf32> to vector<2x24xf32>
    %286 = arith.mulf %284, %285 : vector<2x24xf32>
    %287 = arith.addf %281, %286 : vector<2x24xf32>
    %288 = vector.extract_strided_slice %170 {offsets = [0, 3], sizes = [2, 1], strides = [1, 1]} : vector<2x6xf32> to vector<2x1xf32>
    %289 = vector.extract_strided_slice %4 {offsets = [3, 0], sizes = [1, 24], strides = [1, 1]} : vector<6x24xf32> to vector<1x24xf32>
    %290 = vector.broadcast %288 : vector<2x1xf32> to vector<2x24xf32>
    %291 = vector.broadcast %289 : vector<1x24xf32> to vector<2x24xf32>
    %292 = arith.mulf %290, %291 : vector<2x24xf32>
    %293 = arith.addf %287, %292 : vector<2x24xf32>
    %294 = vector.extract_strided_slice %170 {offsets = [0, 4], sizes = [2, 1], strides = [1, 1]} : vector<2x6xf32> to vector<2x1xf32>
    %295 = vector.extract_strided_slice %4 {offsets = [4, 0], sizes = [1, 24], strides = [1, 1]} : vector<6x24xf32> to vector<1x24xf32>
    %296 = vector.broadcast %294 : vector<2x1xf32> to vector<2x24xf32>
    %297 = vector.broadcast %295 : vector<1x24xf32> to vector<2x24xf32>
    %298 = arith.mulf %296, %297 : vector<2x24xf32>
    %299 = arith.addf %293, %298 : vector<2x24xf32>
    %300 = vector.extract_strided_slice %170 {offsets = [0, 5], sizes = [2, 1], strides = [1, 1]} : vector<2x6xf32> to vector<2x1xf32>
    %301 = vector.extract_strided_slice %4 {offsets = [5, 0], sizes = [1, 24], strides = [1, 1]} : vector<6x24xf32> to vector<1x24xf32>
    %302 = vector.broadcast %300 : vector<2x1xf32> to vector<2x24xf32>
    %303 = vector.broadcast %301 : vector<1x24xf32> to vector<2x24xf32>
    %304 = arith.mulf %302, %303 : vector<2x24xf32>
    %305 = arith.addf %299, %304 : vector<2x24xf32>
    %306 = math.tanh %305 : vector<2x24xf32>
    %307 = vector.extract_strided_slice %306 {offsets = [0, 0], sizes = [2, 6], strides = [1, 1]} : vector<2x24xf32> to vector<2x6xf32>
    %cst_35 = arith.constant 1.000000e+00 : f32
    %308 = vector.broadcast %cst_35 : f32 to vector<2x6xf32>
    %309 = arith.addf %307, %308 : vector<2x6xf32>
    %cst_36 = arith.constant 5.000000e-01 : f32
    %310 = vector.broadcast %cst_36 : f32 to vector<2x6xf32>
    %311 = arith.mulf %310, %309 : vector<2x6xf32>
    %312 = vector.extract_strided_slice %306 {offsets = [0, 6], sizes = [2, 6], strides = [1, 1]} : vector<2x24xf32> to vector<2x6xf32>
    %cst_37 = arith.constant 1.000000e+00 : f32
    %313 = vector.broadcast %cst_37 : f32 to vector<2x6xf32>
    %314 = arith.addf %312, %313 : vector<2x6xf32>
    %cst_38 = arith.constant 5.000000e-01 : f32
    %315 = vector.broadcast %cst_38 : f32 to vector<2x6xf32>
    %316 = arith.mulf %315, %314 : vector<2x6xf32>
    %317 = vector.extract_strided_slice %306 {offsets = [0, 12], sizes = [2, 6], strides = [1, 1]} : vector<2x24xf32> to vector<2x6xf32>
    %318 = vector.extract_strided_slice %306 {offsets = [0, 18], sizes = [2, 6], strides = [1, 1]} : vector<2x24xf32> to vector<2x6xf32>
    %cst_39 = arith.constant 1.000000e+00 : f32
    %319 = vector.broadcast %cst_39 : f32 to vector<2x6xf32>
    %320 = arith.addf %318, %319 : vector<2x6xf32>
    %cst_40 = arith.constant 5.000000e-01 : f32
    %321 = vector.broadcast %cst_40 : f32 to vector<2x6xf32>
    %322 = arith.mulf %321, %320 : vector<2x6xf32>
    %323 = arith.mulf %316, %168 : vector<2x6xf32>
    %324 = arith.mulf %311, %317 : vector<2x6xf32>
    %325 = arith.addf %323, %324 : vector<2x6xf32>
    %326 = math.tanh %325 : vector<2x6xf32>
    %327 = arith.mulf %322, %326 : vector<2x6xf32>
    %c0_41 = arith.constant 0 : index
    %c1 = arith.constant 1 : index
    %c0_42 = arith.constant 0 : index
    %328 = vector.load %arg7[%c0_41, %c1, %c0_42] : memref<2x8x6xf32, #tpu.memory_space<vmem>>, vector<2x1x6xf32>
    %329 = vector.shape_cast %328 : vector<2x1x6xf32> to vector<2x6xf32>
    %330 = vector.shape_cast %327 : vector<2x6xf32> to vector<2x1x6xf32>
    tpu.vector_store %arg7[%c0_41, %c1, %c0_42], %330 {strides = array<i32>} : memref<2x8x6xf32, #tpu.memory_space<vmem>>, vector<2x1x6xf32>,
    %331 = vector.extract_strided_slice %15 {offsets = [0, 2, 0], sizes = [2, 1, 24], strides = [1, 1, 1]} : vector<2x8x24xf32> to vector<2x1x24xf32>
    %332 = vector.shape_cast %331 : vector<2x1x24xf32> to vector<2x24xf32>
    %333 = vector.extract_strided_slice %233 {offsets = [0, 0], sizes = [2, 1], strides = [1, 1]} : vector<2x6xf32> to vector<2x1xf32>
    %334 = vector.extract_strided_slice %1 {offsets = [0, 0], sizes = [1, 24], strides = [1, 1]} : vector<6x24xf32> to vector<1x24xf32>
    %335 = vector.broadcast %333 : vector<2x1xf32> to vector<2x24xf32>
    %336 = vector.broadcast %334 : vector<1x24xf32> to vector<2x24xf32>
    %337 = arith.mulf %335, %336 : vector<2x24xf32>
    %338 = arith.addf %332, %337 : vector<2x24xf32>
    %339 = vector.extract_strided_slice %233 {offsets = [0, 1], sizes = [2, 1], strides = [1, 1]} : vector<2x6xf32> to vector<2x1xf32>
    %340 = vector.extract_strided_slice %1 {offsets = [1, 0], sizes = [1, 24], strides = [1, 1]} : vector<6x24xf32> to vector<1x24xf32>
    %341 = vector.broadcast %339 : vector<2x1xf32> to vector<2x24xf32>
    %342 = vector.broadcast %340 : vector<1x24xf32> to vector<2x24xf32>
    %343 = arith.mulf %341, %342 : vector<2x24xf32>
    %344 = arith.addf %338, %343 : vector<2x24xf32>
    %345 = vector.extract_strided_slice %233 {offsets = [0, 2], sizes = [2, 1], strides = [1, 1]} : vector<2x6xf32> to vector<2x1xf32>
    %346 = vector.extract_strided_slice %1 {offsets = [2, 0], sizes = [1, 24], strides = [1, 1]} : vector<6x24xf32> to vector<1x24xf32>
    %347 = vector.broadcast %345 : vector<2x1xf32> to vector<2x24xf32>
    %348 = vector.broadcast %346 : vector<1x24xf32> to vector<2x24xf32>
    %349 = arith.mulf %347, %348 : vector<2x24xf32>
    %350 = arith.addf %344, %349 : vector<2x24xf32>
    %351 = vector.extract_strided_slice %233 {offsets = [0, 3], sizes = [2, 1], strides = [1, 1]} : vector<2x6xf32> to vector<2x1xf32>
    %352 = vector.extract_strided_slice %1 {offsets = [3, 0], sizes = [1, 24], strides = [1, 1]} : vector<6x24xf32> to vector<1x24xf32>
    %353 = vector.broadcast %351 : vector<2x1xf32> to vector<2x24xf32>
    %354 = vector.broadcast %352 : vector<1x24xf32> to vector<2x24xf32>
    %355 = arith.mulf %353, %354 : vector<2x24xf32>
    %356 = arith.addf %350, %355 : vector<2x24xf32>
    %357 = vector.extract_strided_slice %233 {offsets = [0, 4], sizes = [2, 1], strides = [1, 1]} : vector<2x6xf32> to vector<2x1xf32>
    %358 = vector.extract_strided_slice %1 {offsets = [4, 0], sizes = [1, 24], strides = [1, 1]} : vector<6x24xf32> to vector<1x24xf32>
    %359 = vector.broadcast %357 : vector<2x1xf32> to vector<2x24xf32>
    %360 = vector.broadcast %358 : vector<1x24xf32> to vector<2x24xf32>
    %361 = arith.mulf %359, %360 : vector<2x24xf32>
    %362 = arith.addf %356, %361 : vector<2x24xf32>
    %363 = vector.extract_strided_slice %233 {offsets = [0, 5], sizes = [2, 1], strides = [1, 1]} : vector<2x6xf32> to vector<2x1xf32>
    %364 = vector.extract_strided_slice %1 {offsets = [5, 0], sizes = [1, 24], strides = [1, 1]} : vector<6x24xf32> to vector<1x24xf32>
    %365 = vector.broadcast %363 : vector<2x1xf32> to vector<2x24xf32>
    %366 = vector.broadcast %364 : vector<1x24xf32> to vector<2x24xf32>
    %367 = arith.mulf %365, %366 : vector<2x24xf32>
    %368 = arith.addf %362, %367 : vector<2x24xf32>
    %369 = math.tanh %368 : vector<2x24xf32>
    %370 = vector.extract_strided_slice %369 {offsets = [0, 0], sizes = [2, 6], strides = [1, 1]} : vector<2x24xf32> to vector<2x6xf32>
    %cst_43 = arith.constant 1.000000e+00 : f32
    %371 = vector.broadcast %cst_43 : f32 to vector<2x6xf32>
    %372 = arith.addf %370, %371 : vector<2x6xf32>
    %cst_44 = arith.constant 5.000000e-01 : f32
    %373 = vector.broadcast %cst_44 : f32 to vector<2x6xf32>
    %374 = arith.mulf %373, %372 : vector<2x6xf32>
    %375 = vector.extract_strided_slice %369 {offsets = [0, 6], sizes = [2, 6], strides = [1, 1]} : vector<2x24xf32> to vector<2x6xf32>
    %cst_45 = arith.constant 1.000000e+00 : f32
    %376 = vector.broadcast %cst_45 : f32 to vector<2x6xf32>
    %377 = arith.addf %375, %376 : vector<2x6xf32>
    %cst_46 = arith.constant 5.000000e-01 : f32
    %378 = vector.broadcast %cst_46 : f32 to vector<2x6xf32>
    %379 = arith.mulf %378, %377 : vector<2x6xf32>
    %380 = vector.extract_strided_slice %369 {offsets = [0, 12], sizes = [2, 6], strides = [1, 1]} : vector<2x24xf32> to vector<2x6xf32>
    %381 = vector.extract_strided_slice %369 {offsets = [0, 18], sizes = [2, 6], strides = [1, 1]} : vector<2x24xf32> to vector<2x6xf32>
    %cst_47 = arith.constant 1.000000e+00 : f32
    %382 = vector.broadcast %cst_47 : f32 to vector<2x6xf32>
    %383 = arith.addf %381, %382 : vector<2x6xf32>
    %cst_48 = arith.constant 5.000000e-01 : f32
    %384 = vector.broadcast %cst_48 : f32 to vector<2x6xf32>
    %385 = arith.mulf %384, %383 : vector<2x6xf32>
    %386 = arith.mulf %379, %231 : vector<2x6xf32>
    %387 = arith.mulf %374, %380 : vector<2x6xf32>
    %388 = arith.addf %386, %387 : vector<2x6xf32>
    %389 = math.tanh %388 : vector<2x6xf32>
    %390 = arith.mulf %385, %389 : vector<2x6xf32>
    %391 = vector.extract_strided_slice %390 {offsets = [0, 0], sizes = [2, 1], strides = [1, 1]} : vector<2x6xf32> to vector<2x1xf32>
    %392 = vector.extract_strided_slice %3 {offsets = [0, 0], sizes = [1, 24], strides = [1, 1]} : vector<6x24xf32> to vector<1x24xf32>
    %393 = vector.broadcast %391 : vector<2x1xf32> to vector<2x24xf32>
    %394 = vector.broadcast %392 : vector<1x24xf32> to vector<2x24xf32>
    %395 = arith.mulf %393, %394 : vector<2x24xf32>
    %396 = arith.addf %7, %395 : vector<2x24xf32>
    %397 = vector.extract_strided_slice %390 {offsets = [0, 1], sizes = [2, 1], strides = [1, 1]} : vector<2x6xf32> to vector<2x1xf32>
    %398 = vector.extract_strided_slice %3 {offsets = [1, 0], sizes = [1, 24], strides = [1, 1]} : vector<6x24xf32> to vector<1x24xf32>
    %399 = vector.broadcast %397 : vector<2x1xf32> to vector<2x24xf32>
    %400 = vector.broadcast %398 : vector<1x24xf32> to vector<2x24xf32>
    %401 = arith.mulf %399, %400 : vector<2x24xf32>
    %402 = arith.addf %396, %401 : vector<2x24xf32>
    %403 = vector.extract_strided_slice %390 {offsets = [0, 2], sizes = [2, 1], strides = [1, 1]} : vector<2x6xf32> to vector<2x1xf32>
    %404 = vector.extract_strided_slice %3 {offsets = [2, 0], sizes = [1, 24], strides = [1, 1]} : vector<6x24xf32> to vector<1x24xf32>
    %405 = vector.broadcast %403 : vector<2x1xf32> to vector<2x24xf32>
    %406 = vector.broadcast %404 : vector<1x24xf32> to vector<2x24xf32>
    %407 = arith.mulf %405, %406 : vector<2x24xf32>
    %408 = arith.addf %402, %407 : vector<2x24xf32>
    %409 = vector.extract_strided_slice %390 {offsets = [0, 3], sizes = [2, 1], strides = [1, 1]} : vector<2x6xf32> to vector<2x1xf32>
    %410 = vector.extract_strided_slice %3 {offsets = [3, 0], sizes = [1, 24], strides = [1, 1]} : vector<6x24xf32> to vector<1x24xf32>
    %411 = vector.broadcast %409 : vector<2x1xf32> to vector<2x24xf32>
    %412 = vector.broadcast %410 : vector<1x24xf32> to vector<2x24xf32>
    %413 = arith.mulf %411, %412 : vector<2x24xf32>
    %414 = arith.addf %408, %413 : vector<2x24xf32>
    %415 = vector.extract_strided_slice %390 {offsets = [0, 4], sizes = [2, 1], strides = [1, 1]} : vector<2x6xf32> to vector<2x1xf32>
    %416 = vector.extract_strided_slice %3 {offsets = [4, 0], sizes = [1, 24], strides = [1, 1]} : vector<6x24xf32> to vector<1x24xf32>
    %417 = vector.broadcast %415 : vector<2x1xf32> to vector<2x24xf32>
    %418 = vector.broadcast %416 : vector<1x24xf32> to vector<2x24xf32>
    %419 = arith.mulf %417, %418 : vector<2x24xf32>
    %420 = arith.addf %414, %419 : vector<2x24xf32>
    %421 = vector.extract_strided_slice %390 {offsets = [0, 5], sizes = [2, 1], strides = [1, 1]} : vector<2x6xf32> to vector<2x1xf32>
    %422 = vector.extract_strided_slice %3 {offsets = [5, 0], sizes = [1, 24], strides = [1, 1]} : vector<6x24xf32> to vector<1x24xf32>
    %423 = vector.broadcast %421 : vector<2x1xf32> to vector<2x24xf32>
    %424 = vector.broadcast %422 : vector<1x24xf32> to vector<2x24xf32>
    %425 = arith.mulf %423, %424 : vector<2x24xf32>
    %426 = arith.addf %420, %425 : vector<2x24xf32>
    %427 = vector.extract_strided_slice %327 {offsets = [0, 0], sizes = [2, 1], strides = [1, 1]} : vector<2x6xf32> to vector<2x1xf32>
    %428 = vector.extract_strided_slice %4 {offsets = [0, 0], sizes = [1, 24], strides = [1, 1]} : vector<6x24xf32> to vector<1x24xf32>
    %429 = vector.broadcast %427 : vector<2x1xf32> to vector<2x24xf32>
    %430 = vector.broadcast %428 : vector<1x24xf32> to vector<2x24xf32>
    %431 = arith.mulf %429, %430 : vector<2x24xf32>
    %432 = arith.addf %426, %431 : vector<2x24xf32>
    %433 = vector.extract_strided_slice %327 {offsets = [0, 1], sizes = [2, 1], strides = [1, 1]} : vector<2x6xf32> to vector<2x1xf32>
    %434 = vector.extract_strided_slice %4 {offsets = [1, 0], sizes = [1, 24], strides = [1, 1]} : vector<6x24xf32> to vector<1x24xf32>
    %435 = vector.broadcast %433 : vector<2x1xf32> to vector<2x24xf32>
    %436 = vector.broadcast %434 : vector<1x24xf32> to vector<2x24xf32>
    %437 = arith.mulf %435, %436 : vector<2x24xf32>
    %438 = arith.addf %432, %437 : vector<2x24xf32>
    %439 = vector.extract_strided_slice %327 {offsets = [0, 2], sizes = [2, 1], strides = [1, 1]} : vector<2x6xf32> to vector<2x1xf32>
    %440 = vector.extract_strided_slice %4 {offsets = [2, 0], sizes = [1, 24], strides = [1, 1]} : vector<6x24xf32> to vector<1x24xf32>
    %441 = vector.broadcast %439 : vector<2x1xf32> to vector<2x24xf32>
    %442 = vector.broadcast %440 : vector<1x24xf32> to vector<2x24xf32>
    %443 = arith.mulf %441, %442 : vector<2x24xf32>
    %444 = arith.addf %438, %443 : vector<2x24xf32>
    %445 = vector.extract_strided_slice %327 {offsets = [0, 3], sizes = [2, 1], strides = [1, 1]} : vector<2x6xf32> to vector<2x1xf32>
    %446 = vector.extract_strided_slice %4 {offsets = [3, 0], sizes = [1, 24], strides = [1, 1]} : vector<6x24xf32> to vector<1x24xf32>
    %447 = vector.broadcast %445 : vector<2x1xf32> to vector<2x24xf32>
    %448 = vector.broadcast %446 : vector<1x24xf32> to vector<2x24xf32>
    %449 = arith.mulf %447, %448 : vector<2x24xf32>
    %450 = arith.addf %444, %449 : vector<2x24xf32>
    %451 = vector.extract_strided_slice %327 {offsets = [0, 4], sizes = [2, 1], strides = [1, 1]} : vector<2x6xf32> to vector<2x1xf32>
    %452 = vector.extract_strided_slice %4 {offsets = [4, 0], sizes = [1, 24], strides = [1, 1]} : vector<6x24xf32> to vector<1x24xf32>
    %453 = vector.broadcast %451 : vector<2x1xf32> to vector<2x24xf32>
    %454 = vector.broadcast %452 : vector<1x24xf32> to vector<2x24xf32>
    %455 = arith.mulf %453, %454 : vector<2x24xf32>
    %456 = arith.addf %450, %455 : vector<2x24xf32>
    %457 = vector.extract_strided_slice %327 {offsets = [0, 5], sizes = [2, 1], strides = [1, 1]} : vector<2x6xf32> to vector<2x1xf32>
    %458 = vector.extract_strided_slice %4 {offsets = [5, 0], sizes = [1, 24], strides = [1, 1]} : vector<6x24xf32> to vector<1x24xf32>
    %459 = vector.broadcast %457 : vector<2x1xf32> to vector<2x24xf32>
    %460 = vector.broadcast %458 : vector<1x24xf32> to vector<2x24xf32>
    %461 = arith.mulf %459, %460 : vector<2x24xf32>
    %462 = arith.addf %456, %461 : vector<2x24xf32>
    %463 = math.tanh %462 : vector<2x24xf32>
    %464 = vector.extract_strided_slice %463 {offsets = [0, 0], sizes = [2, 6], strides = [1, 1]} : vector<2x24xf32> to vector<2x6xf32>
    %cst_49 = arith.constant 1.000000e+00 : f32
    %465 = vector.broadcast %cst_49 : f32 to vector<2x6xf32>
    %466 = arith.addf %464, %465 : vector<2x6xf32>
    %cst_50 = arith.constant 5.000000e-01 : f32
    %467 = vector.broadcast %cst_50 : f32 to vector<2x6xf32>
    %468 = arith.mulf %467, %466 : vector<2x6xf32>
    %469 = vector.extract_strided_slice %463 {offsets = [0, 6], sizes = [2, 6], strides = [1, 1]} : vector<2x24xf32> to vector<2x6xf32>
    %cst_51 = arith.constant 1.000000e+00 : f32
    %470 = vector.broadcast %cst_51 : f32 to vector<2x6xf32>
    %471 = arith.addf %469, %470 : vector<2x6xf32>
    %cst_52 = arith.constant 5.000000e-01 : f32
    %472 = vector.broadcast %cst_52 : f32 to vector<2x6xf32>
    %473 = arith.mulf %472, %471 : vector<2x6xf32>
    %474 = vector.extract_strided_slice %463 {offsets = [0, 12], sizes = [2, 6], strides = [1, 1]} : vector<2x24xf32> to vector<2x6xf32>
    %475 = vector.extract_strided_slice %463 {offsets = [0, 18], sizes = [2, 6], strides = [1, 1]} : vector<2x24xf32> to vector<2x6xf32>
    %cst_53 = arith.constant 1.000000e+00 : f32
    %476 = vector.broadcast %cst_53 : f32 to vector<2x6xf32>
    %477 = arith.addf %475, %476 : vector<2x6xf32>
    %cst_54 = arith.constant 5.000000e-01 : f32
    %478 = vector.broadcast %cst_54 : f32 to vector<2x6xf32>
    %479 = arith.mulf %478, %477 : vector<2x6xf32>
    %480 = arith.mulf %473, %325 : vector<2x6xf32>
    %481 = arith.mulf %468, %474 : vector<2x6xf32>
    %482 = arith.addf %480, %481 : vector<2x6xf32>
    %483 = math.tanh %482 : vector<2x6xf32>
    %484 = arith.mulf %479, %483 : vector<2x6xf32>
    %c0_55 = arith.constant 0 : index
    %c2 = arith.constant 2 : index
    %c0_56 = arith.constant 0 : index
    %485 = vector.load %arg7[%c0_55, %c2, %c0_56] : memref<2x8x6xf32, #tpu.memory_space<vmem>>, vector<2x1x6xf32>
    %486 = vector.shape_cast %485 : vector<2x1x6xf32> to vector<2x6xf32>
    %487 = vector.shape_cast %484 : vector<2x6xf32> to vector<2x1x6xf32>
    tpu.vector_store %arg7[%c0_55, %c2, %c0_56], %487 {strides = array<i32>} : memref<2x8x6xf32, #tpu.memory_space<vmem>>, vector<2x1x6xf32>,
    %488 = vector.extract_strided_slice %15 {offsets = [0, 3, 0], sizes = [2, 1, 24], strides = [1, 1, 1]} : vector<2x8x24xf32> to vector<2x1x24xf32>
    %489 = vector.shape_cast %488 : vector<2x1x24xf32> to vector<2x24xf32>
    %490 = vector.extract_strided_slice %390 {offsets = [0, 0], sizes = [2, 1], strides = [1, 1]} : vector<2x6xf32> to vector<2x1xf32>
    %491 = vector.extract_strided_slice %1 {offsets = [0, 0], sizes = [1, 24], strides = [1, 1]} : vector<6x24xf32> to vector<1x24xf32>
    %492 = vector.broadcast %490 : vector<2x1xf32> to vector<2x24xf32>
    %493 = vector.broadcast %491 : vector<1x24xf32> to vector<2x24xf32>
    %494 = arith.mulf %492, %493 : vector<2x24xf32>
    %495 = arith.addf %489, %494 : vector<2x24xf32>
    %496 = vector.extract_strided_slice %390 {offsets = [0, 1], sizes = [2, 1], strides = [1, 1]} : vector<2x6xf32> to vector<2x1xf32>
    %497 = vector.extract_strided_slice %1 {offsets = [1, 0], sizes = [1, 24], strides = [1, 1]} : vector<6x24xf32> to vector<1x24xf32>
    %498 = vector.broadcast %496 : vector<2x1xf32> to vector<2x24xf32>
    %499 = vector.broadcast %497 : vector<1x24xf32> to vector<2x24xf32>
    %500 = arith.mulf %498, %499 : vector<2x24xf32>
    %501 = arith.addf %495, %500 : vector<2x24xf32>
    %502 = vector.extract_strided_slice %390 {offsets = [0, 2], sizes = [2, 1], strides = [1, 1]} : vector<2x6xf32> to vector<2x1xf32>
    %503 = vector.extract_strided_slice %1 {offsets = [2, 0], sizes = [1, 24], strides = [1, 1]} : vector<6x24xf32> to vector<1x24xf32>
    %504 = vector.broadcast %502 : vector<2x1xf32> to vector<2x24xf32>
    %505 = vector.broadcast %503 : vector<1x24xf32> to vector<2x24xf32>
    %506 = arith.mulf %504, %505 : vector<2x24xf32>
    %507 = arith.addf %501, %506 : vector<2x24xf32>
    %508 = vector.extract_strided_slice %390 {offsets = [0, 3], sizes = [2, 1], strides = [1, 1]} : vector<2x6xf32> to vector<2x1xf32>
    %509 = vector.extract_strided_slice %1 {offsets = [3, 0], sizes = [1, 24], strides = [1, 1]} : vector<6x24xf32> to vector<1x24xf32>
    %510 = vector.broadcast %508 : vector<2x1xf32> to vector<2x24xf32>
    %511 = vector.broadcast %509 : vector<1x24xf32> to vector<2x24xf32>
    %512 = arith.mulf %510, %511 : vector<2x24xf32>
    %513 = arith.addf %507, %512 : vector<2x24xf32>
    %514 = vector.extract_strided_slice %390 {offsets = [0, 4], sizes = [2, 1], strides = [1, 1]} : vector<2x6xf32> to vector<2x1xf32>
    %515 = vector.extract_strided_slice %1 {offsets = [4, 0], sizes = [1, 24], strides = [1, 1]} : vector<6x24xf32> to vector<1x24xf32>
    %516 = vector.broadcast %514 : vector<2x1xf32> to vector<2x24xf32>
    %517 = vector.broadcast %515 : vector<1x24xf32> to vector<2x24xf32>
    %518 = arith.mulf %516, %517 : vector<2x24xf32>
    %519 = arith.addf %513, %518 : vector<2x24xf32>
    %520 = vector.extract_strided_slice %390 {offsets = [0, 5], sizes = [2, 1], strides = [1, 1]} : vector<2x6xf32> to vector<2x1xf32>
    %521 = vector.extract_strided_slice %1 {offsets = [5, 0], sizes = [1, 24], strides = [1, 1]} : vector<6x24xf32> to vector<1x24xf32>
    %522 = vector.broadcast %520 : vector<2x1xf32> to vector<2x24xf32>
    %523 = vector.broadcast %521 : vector<1x24xf32> to vector<2x24xf32>
    %524 = arith.mulf %522, %523 : vector<2x24xf32>
    %525 = arith.addf %519, %524 : vector<2x24xf32>
    %526 = math.tanh %525 : vector<2x24xf32>
    %527 = vector.extract_strided_slice %526 {offsets = [0, 0], sizes = [2, 6], strides = [1, 1]} : vector<2x24xf32> to vector<2x6xf32>
    %cst_57 = arith.constant 1.000000e+00 : f32
    %528 = vector.broadcast %cst_57 : f32 to vector<2x6xf32>
    %529 = arith.addf %527, %528 : vector<2x6xf32>
    %cst_58 = arith.constant 5.000000e-01 : f32
    %530 = vector.broadcast %cst_58 : f32 to vector<2x6xf32>
    %531 = arith.mulf %530, %529 : vector<2x6xf32>
    %532 = vector.extract_strided_slice %526 {offsets = [0, 6], sizes = [2, 6], strides = [1, 1]} : vector<2x24xf32> to vector<2x6xf32>
    %cst_59 = arith.constant 1.000000e+00 : f32
    %533 = vector.broadcast %cst_59 : f32 to vector<2x6xf32>
    %534 = arith.addf %532, %533 : vector<2x6xf32>
    %cst_60 = arith.constant 5.000000e-01 : f32
    %535 = vector.broadcast %cst_60 : f32 to vector<2x6xf32>
    %536 = arith.mulf %535, %534 : vector<2x6xf32>
    %537 = vector.extract_strided_slice %526 {offsets = [0, 12], sizes = [2, 6], strides = [1, 1]} : vector<2x24xf32> to vector<2x6xf32>
    %538 = vector.extract_strided_slice %526 {offsets = [0, 18], sizes = [2, 6], strides = [1, 1]} : vector<2x24xf32> to vector<2x6xf32>
    %cst_61 = arith.constant 1.000000e+00 : f32
    %539 = vector.broadcast %cst_61 : f32 to vector<2x6xf32>
    %540 = arith.addf %538, %539 : vector<2x6xf32>
    %cst_62 = arith.constant 5.000000e-01 : f32
    %541 = vector.broadcast %cst_62 : f32 to vector<2x6xf32>
    %542 = arith.mulf %541, %540 : vector<2x6xf32>
    %543 = arith.mulf %536, %388 : vector<2x6xf32>
    %544 = arith.mulf %531, %537 : vector<2x6xf32>
    %545 = arith.addf %543, %544 : vector<2x6xf32>
    %546 = math.tanh %545 : vector<2x6xf32>
    %547 = arith.mulf %542, %546 : vector<2x6xf32>
    %548 = vector.extract_strided_slice %547 {offsets = [0, 0], sizes = [2, 1], strides = [1, 1]} : vector<2x6xf32> to vector<2x1xf32>
    %549 = vector.extract_strided_slice %3 {offsets = [0, 0], sizes = [1, 24], strides = [1, 1]} : vector<6x24xf32> to vector<1x24xf32>
    %550 = vector.broadcast %548 : vector<2x1xf32> to vector<2x24xf32>
    %551 = vector.broadcast %549 : vector<1x24xf32> to vector<2x24xf32>
    %552 = arith.mulf %550, %551 : vector<2x24xf32>
    %553 = arith.addf %7, %552 : vector<2x24xf32>
    %554 = vector.extract_strided_slice %547 {offsets = [0, 1], sizes = [2, 1], strides = [1, 1]} : vector<2x6xf32> to vector<2x1xf32>
    %555 = vector.extract_strided_slice %3 {offsets = [1, 0], sizes = [1, 24], strides = [1, 1]} : vector<6x24xf32> to vector<1x24xf32>
    %556 = vector.broadcast %554 : vector<2x1xf32> to vector<2x24xf32>
    %557 = vector.broadcast %555 : vector<1x24xf32> to vector<2x24xf32>
    %558 = arith.mulf %556, %557 : vector<2x24xf32>
    %559 = arith.addf %553, %558 : vector<2x24xf32>
    %560 = vector.extract_strided_slice %547 {offsets = [0, 2], sizes = [2, 1], strides = [1, 1]} : vector<2x6xf32> to vector<2x1xf32>
    %561 = vector.extract_strided_slice %3 {offsets = [2, 0], sizes = [1, 24], strides = [1, 1]} : vector<6x24xf32> to vector<1x24xf32>
    %562 = vector.broadcast %560 : vector<2x1xf32> to vector<2x24xf32>
    %563 = vector.broadcast %561 : vector<1x24xf32> to vector<2x24xf32>
    %564 = arith.mulf %562, %563 : vector<2x24xf32>
    %565 = arith.addf %559, %564 : vector<2x24xf32>
    %566 = vector.extract_strided_slice %547 {offsets = [0, 3], sizes = [2, 1], strides = [1, 1]} : vector<2x6xf32> to vector<2x1xf32>
    %567 = vector.extract_strided_slice %3 {offsets = [3, 0], sizes = [1, 24], strides = [1, 1]} : vector<6x24xf32> to vector<1x24xf32>
    %568 = vector.broadcast %566 : vector<2x1xf32> to vector<2x24xf32>
    %569 = vector.broadcast %567 : vector<1x24xf32> to vector<2x24xf32>
    %570 = arith.mulf %568, %569 : vector<2x24xf32>
    %571 = arith.addf %565, %570 : vector<2x24xf32>
    %572 = vector.extract_strided_slice %547 {offsets = [0, 4], sizes = [2, 1], strides = [1, 1]} : vector<2x6xf32> to vector<2x1xf32>
    %573 = vector.extract_strided_slice %3 {offsets = [4, 0], sizes = [1, 24], strides = [1, 1]} : vector<6x24xf32> to vector<1x24xf32>
    %574 = vector.broadcast %572 : vector<2x1xf32> to vector<2x24xf32>
    %575 = vector.broadcast %573 : vector<1x24xf32> to vector<2x24xf32>
    %576 = arith.mulf %574, %575 : vector<2x24xf32>
    %577 = arith.addf %571, %576 : vector<2x24xf32>
    %578 = vector.extract_strided_slice %547 {offsets = [0, 5], sizes = [2, 1], strides = [1, 1]} : vector<2x6xf32> to vector<2x1xf32>
    %579 = vector.extract_strided_slice %3 {offsets = [5, 0], sizes = [1, 24], strides = [1, 1]} : vector<6x24xf32> to vector<1x24xf32>
    %580 = vector.broadcast %578 : vector<2x1xf32> to vector<2x24xf32>
    %581 = vector.broadcast %579 : vector<1x24xf32> to vector<2x24xf32>
    %582 = arith.mulf %580, %581 : vector<2x24xf32>
    %583 = arith.addf %577, %582 : vector<2x24xf32>
    %584 = vector.extract_strided_slice %484 {offsets = [0, 0], sizes = [2, 1], strides = [1, 1]} : vector<2x6xf32> to vector<2x1xf32>
    %585 = vector.extract_strided_slice %4 {offsets = [0, 0], sizes = [1, 24], strides = [1, 1]} : vector<6x24xf32> to vector<1x24xf32>
    %586 = vector.broadcast %584 : vector<2x1xf32> to vector<2x24xf32>
    %587 = vector.broadcast %585 : vector<1x24xf32> to vector<2x24xf32>
    %588 = arith.mulf %586, %587 : vector<2x24xf32>
    %589 = arith.addf %583, %588 : vector<2x24xf32>
    %590 = vector.extract_strided_slice %484 {offsets = [0, 1], sizes = [2, 1], strides = [1, 1]} : vector<2x6xf32> to vector<2x1xf32>
    %591 = vector.extract_strided_slice %4 {offsets = [1, 0], sizes = [1, 24], strides = [1, 1]} : vector<6x24xf32> to vector<1x24xf32>
    %592 = vector.broadcast %590 : vector<2x1xf32> to vector<2x24xf32>
    %593 = vector.broadcast %591 : vector<1x24xf32> to vector<2x24xf32>
    %594 = arith.mulf %592, %593 : vector<2x24xf32>
    %595 = arith.addf %589, %594 : vector<2x24xf32>
    %596 = vector.extract_strided_slice %484 {offsets = [0, 2], sizes = [2, 1], strides = [1, 1]} : vector<2x6xf32> to vector<2x1xf32>
    %597 = vector.extract_strided_slice %4 {offsets = [2, 0], sizes = [1, 24], strides = [1, 1]} : vector<6x24xf32> to vector<1x24xf32>
    %598 = vector.broadcast %596 : vector<2x1xf32> to vector<2x24xf32>
    %599 = vector.broadcast %597 : vector<1x24xf32> to vector<2x24xf32>
    %600 = arith.mulf %598, %599 : vector<2x24xf32>
    %601 = arith.addf %595, %600 : vector<2x24xf32>
    %602 = vector.extract_strided_slice %484 {offsets = [0, 3], sizes = [2, 1], strides = [1, 1]} : vector<2x6xf32> to vector<2x1xf32>
    %603 = vector.extract_strided_slice %4 {offsets = [3, 0], sizes = [1, 24], strides = [1, 1]} : vector<6x24xf32> to vector<1x24xf32>
    %604 = vector.broadcast %602 : vector<2x1xf32> to vector<2x24xf32>
    %605 = vector.broadcast %603 : vector<1x24xf32> to vector<2x24xf32>
    %606 = arith.mulf %604, %605 : vector<2x24xf32>
    %607 = arith.addf %601, %606 : vector<2x24xf32>
    %608 = vector.extract_strided_slice %484 {offsets = [0, 4], sizes = [2, 1], strides = [1, 1]} : vector<2x6xf32> to vector<2x1xf32>
    %609 = vector.extract_strided_slice %4 {offsets = [4, 0], sizes = [1, 24], strides = [1, 1]} : vector<6x24xf32> to vector<1x24xf32>
    %610 = vector.broadcast %608 : vector<2x1xf32> to vector<2x24xf32>
    %611 = vector.broadcast %609 : vector<1x24xf32> to vector<2x24xf32>
    %612 = arith.mulf %610, %611 : vector<2x24xf32>
    %613 = arith.addf %607, %612 : vector<2x24xf32>
    %614 = vector.extract_strided_slice %484 {offsets = [0, 5], sizes = [2, 1], strides = [1, 1]} : vector<2x6xf32> to vector<2x1xf32>
    %615 = vector.extract_strided_slice %4 {offsets = [5, 0], sizes = [1, 24], strides = [1, 1]} : vector<6x24xf32> to vector<1x24xf32>
    %616 = vector.broadcast %614 : vector<2x1xf32> to vector<2x24xf32>
    %617 = vector.broadcast %615 : vector<1x24xf32> to vector<2x24xf32>
    %618 = arith.mulf %616, %617 : vector<2x24xf32>
    %619 = arith.addf %613, %618 : vector<2x24xf32>
    %620 = math.tanh %619 : vector<2x24xf32>
    %621 = vector.extract_strided_slice %620 {offsets = [0, 0], sizes = [2, 6], strides = [1, 1]} : vector<2x24xf32> to vector<2x6xf32>
    %cst_63 = arith.constant 1.000000e+00 : f32
    %622 = vector.broadcast %cst_63 : f32 to vector<2x6xf32>
    %623 = arith.addf %621, %622 : vector<2x6xf32>
    %cst_64 = arith.constant 5.000000e-01 : f32
    %624 = vector.broadcast %cst_64 : f32 to vector<2x6xf32>
    %625 = arith.mulf %624, %623 : vector<2x6xf32>
    %626 = vector.extract_strided_slice %620 {offsets = [0, 6], sizes = [2, 6], strides = [1, 1]} : vector<2x24xf32> to vector<2x6xf32>
    %cst_65 = arith.constant 1.000000e+00 : f32
    %627 = vector.broadcast %cst_65 : f32 to vector<2x6xf32>
    %628 = arith.addf %626, %627 : vector<2x6xf32>
    %cst_66 = arith.constant 5.000000e-01 : f32
    %629 = vector.broadcast %cst_66 : f32 to vector<2x6xf32>
    %630 = arith.mulf %629, %628 : vector<2x6xf32>
    %631 = vector.extract_strided_slice %620 {offsets = [0, 12], sizes = [2, 6], strides = [1, 1]} : vector<2x24xf32> to vector<2x6xf32>
    %632 = vector.extract_strided_slice %620 {offsets = [0, 18], sizes = [2, 6], strides = [1, 1]} : vector<2x24xf32> to vector<2x6xf32>
    %cst_67 = arith.constant 1.000000e+00 : f32
    %633 = vector.broadcast %cst_67 : f32 to vector<2x6xf32>
    %634 = arith.addf %632, %633 : vector<2x6xf32>
    %cst_68 = arith.constant 5.000000e-01 : f32
    %635 = vector.broadcast %cst_68 : f32 to vector<2x6xf32>
    %636 = arith.mulf %635, %634 : vector<2x6xf32>
    %637 = arith.mulf %630, %482 : vector<2x6xf32>
    %638 = arith.mulf %625, %631 : vector<2x6xf32>
    %639 = arith.addf %637, %638 : vector<2x6xf32>
    %640 = math.tanh %639 : vector<2x6xf32>
    %641 = arith.mulf %636, %640 : vector<2x6xf32>
    %c0_69 = arith.constant 0 : index
    %c3 = arith.constant 3 : index
    %c0_70 = arith.constant 0 : index
    %642 = vector.load %arg7[%c0_69, %c3, %c0_70] : memref<2x8x6xf32, #tpu.memory_space<vmem>>, vector<2x1x6xf32>
    %643 = vector.shape_cast %642 : vector<2x1x6xf32> to vector<2x6xf32>
    %644 = vector.shape_cast %641 : vector<2x6xf32> to vector<2x1x6xf32>
    tpu.vector_store %arg7[%c0_69, %c3, %c0_70], %644 {strides = array<i32>} : memref<2x8x6xf32, #tpu.memory_space<vmem>>, vector<2x1x6xf32>,
    %645 = vector.extract_strided_slice %15 {offsets = [0, 4, 0], sizes = [2, 1, 24], strides = [1, 1, 1]} : vector<2x8x24xf32> to vector<2x1x24xf32>
    %646 = vector.shape_cast %645 : vector<2x1x24xf32> to vector<2x24xf32>
    %647 = vector.extract_strided_slice %547 {offsets = [0, 0], sizes = [2, 1], strides = [1, 1]} : vector<2x6xf32> to vector<2x1xf32>
    %648 = vector.extract_strided_slice %1 {offsets = [0, 0], sizes = [1, 24], strides = [1, 1]} : vector<6x24xf32> to vector<1x24xf32>
    %649 = vector.broadcast %647 : vector<2x1xf32> to vector<2x24xf32>
    %650 = vector.broadcast %648 : vector<1x24xf32> to vector<2x24xf32>
    %651 = arith.mulf %649, %650 : vector<2x24xf32>
    %652 = arith.addf %646, %651 : vector<2x24xf32>
    %653 = vector.extract_strided_slice %547 {offsets = [0, 1], sizes = [2, 1], strides = [1, 1]} : vector<2x6xf32> to vector<2x1xf32>
    %654 = vector.extract_strided_slice %1 {offsets = [1, 0], sizes = [1, 24], strides = [1, 1]} : vector<6x24xf32> to vector<1x24xf32>
    %655 = vector.broadcast %653 : vector<2x1xf32> to vector<2x24xf32>
    %656 = vector.broadcast %654 : vector<1x24xf32> to vector<2x24xf32>
    %657 = arith.mulf %655, %656 : vector<2x24xf32>
    %658 = arith.addf %652, %657 : vector<2x24xf32>
    %659 = vector.extract_strided_slice %547 {offsets = [0, 2], sizes = [2, 1], strides = [1, 1]} : vector<2x6xf32> to vector<2x1xf32>
    %660 = vector.extract_strided_slice %1 {offsets = [2, 0], sizes = [1, 24], strides = [1, 1]} : vector<6x24xf32> to vector<1x24xf32>
    %661 = vector.broadcast %659 : vector<2x1xf32> to vector<2x24xf32>
    %662 = vector.broadcast %660 : vector<1x24xf32> to vector<2x24xf32>
    %663 = arith.mulf %661, %662 : vector<2x24xf32>
    %664 = arith.addf %658, %663 : vector<2x24xf32>
    %665 = vector.extract_strided_slice %547 {offsets = [0, 3], sizes = [2, 1], strides = [1, 1]} : vector<2x6xf32> to vector<2x1xf32>
    %666 = vector.extract_strided_slice %1 {offsets = [3, 0], sizes = [1, 24], strides = [1, 1]} : vector<6x24xf32> to vector<1x24xf32>
    %667 = vector.broadcast %665 : vector<2x1xf32> to vector<2x24xf32>
    %668 = vector.broadcast %666 : vector<1x24xf32> to vector<2x24xf32>
    %669 = arith.mulf %667, %668 : vector<2x24xf32>
    %670 = arith.addf %664, %669 : vector<2x24xf32>
    %671 = vector.extract_strided_slice %547 {offsets = [0, 4], sizes = [2, 1], strides = [1, 1]} : vector<2x6xf32> to vector<2x1xf32>
    %672 = vector.extract_strided_slice %1 {offsets = [4, 0], sizes = [1, 24], strides = [1, 1]} : vector<6x24xf32> to vector<1x24xf32>
    %673 = vector.broadcast %671 : vector<2x1xf32> to vector<2x24xf32>
    %674 = vector.broadcast %672 : vector<1x24xf32> to vector<2x24xf32>
    %675 = arith.mulf %673, %674 : vector<2x24xf32>
    %676 = arith.addf %670, %675 : vector<2x24xf32>
    %677 = vector.extract_strided_slice %547 {offsets = [0, 5], sizes = [2, 1], strides = [1, 1]} : vector<2x6xf32> to vector<2x1xf32>
    %678 = vector.extract_strided_slice %1 {offsets = [5, 0], sizes = [1, 24], strides = [1, 1]} : vector<6x24xf32> to vector<1x24xf32>
    %679 = vector.broadcast %677 : vector<2x1xf32> to vector<2x24xf32>
    %680 = vector.broadcast %678 : vector<1x24xf32> to vector<2x24xf32>
    %681 = arith.mulf %679, %680 : vector<2x24xf32>
    %682 = arith.addf %676, %681 : vector<2x24xf32>
    %683 = math.tanh %682 : vector<2x24xf32>
    %684 = vector.extract_strided_slice %683 {offsets = [0, 0], sizes = [2, 6], strides = [1, 1]} : vector<2x24xf32> to vector<2x6xf32>
    %cst_71 = arith.constant 1.000000e+00 : f32
    %685 = vector.broadcast %cst_71 : f32 to vector<2x6xf32>
    %686 = arith.addf %684, %685 : vector<2x6xf32>
    %cst_72 = arith.constant 5.000000e-01 : f32
    %687 = vector.broadcast %cst_72 : f32 to vector<2x6xf32>
    %688 = arith.mulf %687, %686 : vector<2x6xf32>
    %689 = vector.extract_strided_slice %683 {offsets = [0, 6], sizes = [2, 6], strides = [1, 1]} : vector<2x24xf32> to vector<2x6xf32>
    %cst_73 = arith.constant 1.000000e+00 : f32
    %690 = vector.broadcast %cst_73 : f32 to vector<2x6xf32>
    %691 = arith.addf %689, %690 : vector<2x6xf32>
    %cst_74 = arith.constant 5.000000e-01 : f32
    %692 = vector.broadcast %cst_74 : f32 to vector<2x6xf32>
    %693 = arith.mulf %692, %691 : vector<2x6xf32>
    %694 = vector.extract_strided_slice %683 {offsets = [0, 12], sizes = [2, 6], strides = [1, 1]} : vector<2x24xf32> to vector<2x6xf32>
    %695 = vector.extract_strided_slice %683 {offsets = [0, 18], sizes = [2, 6], strides = [1, 1]} : vector<2x24xf32> to vector<2x6xf32>
    %cst_75 = arith.constant 1.000000e+00 : f32
    %696 = vector.broadcast %cst_75 : f32 to vector<2x6xf32>
    %697 = arith.addf %695, %696 : vector<2x6xf32>
    %cst_76 = arith.constant 5.000000e-01 : f32
    %698 = vector.broadcast %cst_76 : f32 to vector<2x6xf32>
    %699 = arith.mulf %698, %697 : vector<2x6xf32>
    %700 = arith.mulf %693, %545 : vector<2x6xf32>
    %701 = arith.mulf %688, %694 : vector<2x6xf32>
    %702 = arith.addf %700, %701 : vector<2x6xf32>
    %703 = math.tanh %702 : vector<2x6xf32>
    %704 = arith.mulf %699, %703 : vector<2x6xf32>
    %705 = vector.extract_strided_slice %704 {offsets = [0, 0], sizes = [2, 1], strides = [1, 1]} : vector<2x6xf32> to vector<2x1xf32>
    %706 = vector.extract_strided_slice %3 {offsets = [0, 0], sizes = [1, 24], strides = [1, 1]} : vector<6x24xf32> to vector<1x24xf32>
    %707 = vector.broadcast %705 : vector<2x1xf32> to vector<2x24xf32>
    %708 = vector.broadcast %706 : vector<1x24xf32> to vector<2x24xf32>
    %709 = arith.mulf %707, %708 : vector<2x24xf32>
    %710 = arith.addf %7, %709 : vector<2x24xf32>
    %711 = vector.extract_strided_slice %704 {offsets = [0, 1], sizes = [2, 1], strides = [1, 1]} : vector<2x6xf32> to vector<2x1xf32>
    %712 = vector.extract_strided_slice %3 {offsets = [1, 0], sizes = [1, 24], strides = [1, 1]} : vector<6x24xf32> to vector<1x24xf32>
    %713 = vector.broadcast %711 : vector<2x1xf32> to vector<2x24xf32>
    %714 = vector.broadcast %712 : vector<1x24xf32> to vector<2x24xf32>
    %715 = arith.mulf %713, %714 : vector<2x24xf32>
    %716 = arith.addf %710, %715 : vector<2x24xf32>
    %717 = vector.extract_strided_slice %704 {offsets = [0, 2], sizes = [2, 1], strides = [1, 1]} : vector<2x6xf32> to vector<2x1xf32>
    %718 = vector.extract_strided_slice %3 {offsets = [2, 0], sizes = [1, 24], strides = [1, 1]} : vector<6x24xf32> to vector<1x24xf32>
    %719 = vector.broadcast %717 : vector<2x1xf32> to vector<2x24xf32>
    %720 = vector.broadcast %718 : vector<1x24xf32> to vector<2x24xf32>
    %721 = arith.mulf %719, %720 : vector<2x24xf32>
    %722 = arith.addf %716, %721 : vector<2x24xf32>
    %723 = vector.extract_strided_slice %704 {offsets = [0, 3], sizes = [2, 1], strides = [1, 1]} : vector<2x6xf32> to vector<2x1xf32>
    %724 = vector.extract_strided_slice %3 {offsets = [3, 0], sizes = [1, 24], strides = [1, 1]} : vector<6x24xf32> to vector<1x24xf32>
    %725 = vector.broadcast %723 : vector<2x1xf32> to vector<2x24xf32>
    %726 = vector.broadcast %724 : vector<1x24xf32> to vector<2x24xf32>
    %727 = arith.mulf %725, %726 : vector<2x24xf32>
    %728 = arith.addf %722, %727 : vector<2x24xf32>
    %729 = vector.extract_strided_slice %704 {offsets = [0, 4], sizes = [2, 1], strides = [1, 1]} : vector<2x6xf32> to vector<2x1xf32>
    %730 = vector.extract_strided_slice %3 {offsets = [4, 0], sizes = [1, 24], strides = [1, 1]} : vector<6x24xf32> to vector<1x24xf32>
    %731 = vector.broadcast %729 : vector<2x1xf32> to vector<2x24xf32>
    %732 = vector.broadcast %730 : vector<1x24xf32> to vector<2x24xf32>
    %733 = arith.mulf %731, %732 : vector<2x24xf32>
    %734 = arith.addf %728, %733 : vector<2x24xf32>
    %735 = vector.extract_strided_slice %704 {offsets = [0, 5], sizes = [2, 1], strides = [1, 1]} : vector<2x6xf32> to vector<2x1xf32>
    %736 = vector.extract_strided_slice %3 {offsets = [5, 0], sizes = [1, 24], strides = [1, 1]} : vector<6x24xf32> to vector<1x24xf32>
    %737 = vector.broadcast %735 : vector<2x1xf32> to vector<2x24xf32>
    %738 = vector.broadcast %736 : vector<1x24xf32> to vector<2x24xf32>
    %739 = arith.mulf %737, %738 : vector<2x24xf32>
    %740 = arith.addf %734, %739 : vector<2x24xf32>
    %741 = vector.extract_strided_slice %641 {offsets = [0, 0], sizes = [2, 1], strides = [1, 1]} : vector<2x6xf32> to vector<2x1xf32>
    %742 = vector.extract_strided_slice %4 {offsets = [0, 0], sizes = [1, 24], strides = [1, 1]} : vector<6x24xf32> to vector<1x24xf32>
    %743 = vector.broadcast %741 : vector<2x1xf32> to vector<2x24xf32>
    %744 = vector.broadcast %742 : vector<1x24xf32> to vector<2x24xf32>
    %745 = arith.mulf %743, %744 : vector<2x24xf32>
    %746 = arith.addf %740, %745 : vector<2x24xf32>
    %747 = vector.extract_strided_slice %641 {offsets = [0, 1], sizes = [2, 1], strides = [1, 1]} : vector<2x6xf32> to vector<2x1xf32>
    %748 = vector.extract_strided_slice %4 {offsets = [1, 0], sizes = [1, 24], strides = [1, 1]} : vector<6x24xf32> to vector<1x24xf32>
    %749 = vector.broadcast %747 : vector<2x1xf32> to vector<2x24xf32>
    %750 = vector.broadcast %748 : vector<1x24xf32> to vector<2x24xf32>
    %751 = arith.mulf %749, %750 : vector<2x24xf32>
    %752 = arith.addf %746, %751 : vector<2x24xf32>
    %753 = vector.extract_strided_slice %641 {offsets = [0, 2], sizes = [2, 1], strides = [1, 1]} : vector<2x6xf32> to vector<2x1xf32>
    %754 = vector.extract_strided_slice %4 {offsets = [2, 0], sizes = [1, 24], strides = [1, 1]} : vector<6x24xf32> to vector<1x24xf32>
    %755 = vector.broadcast %753 : vector<2x1xf32> to vector<2x24xf32>
    %756 = vector.broadcast %754 : vector<1x24xf32> to vector<2x24xf32>
    %757 = arith.mulf %755, %756 : vector<2x24xf32>
    %758 = arith.addf %752, %757 : vector<2x24xf32>
    %759 = vector.extract_strided_slice %641 {offsets = [0, 3], sizes = [2, 1], strides = [1, 1]} : vector<2x6xf32> to vector<2x1xf32>
    %760 = vector.extract_strided_slice %4 {offsets = [3, 0], sizes = [1, 24], strides = [1, 1]} : vector<6x24xf32> to vector<1x24xf32>
    %761 = vector.broadcast %759 : vector<2x1xf32> to vector<2x24xf32>
    %762 = vector.broadcast %760 : vector<1x24xf32> to vector<2x24xf32>
    %763 = arith.mulf %761, %762 : vector<2x24xf32>
    %764 = arith.addf %758, %763 : vector<2x24xf32>
    %765 = vector.extract_strided_slice %641 {offsets = [0, 4], sizes = [2, 1], strides = [1, 1]} : vector<2x6xf32> to vector<2x1xf32>
    %766 = vector.extract_strided_slice %4 {offsets = [4, 0], sizes = [1, 24], strides = [1, 1]} : vector<6x24xf32> to vector<1x24xf32>
    %767 = vector.broadcast %765 : vector<2x1xf32> to vector<2x24xf32>
    %768 = vector.broadcast %766 : vector<1x24xf32> to vector<2x24xf32>
    %769 = arith.mulf %767, %768 : vector<2x24xf32>
    %770 = arith.addf %764, %769 : vector<2x24xf32>
    %771 = vector.extract_strided_slice %641 {offsets = [0, 5], sizes = [2, 1], strides = [1, 1]} : vector<2x6xf32> to vector<2x1xf32>
    %772 = vector.extract_strided_slice %4 {offsets = [5, 0], sizes = [1, 24], strides = [1, 1]} : vector<6x24xf32> to vector<1x24xf32>
    %773 = vector.broadcast %771 : vector<2x1xf32> to vector<2x24xf32>
    %774 = vector.broadcast %772 : vector<1x24xf32> to vector<2x24xf32>
    %775 = arith.mulf %773, %774 : vector<2x24xf32>
    %776 = arith.addf %770, %775 : vector<2x24xf32>
    %777 = math.tanh %776 : vector<2x24xf32>
    %778 = vector.extract_strided_slice %777 {offsets = [0, 0], sizes = [2, 6], strides = [1, 1]} : vector<2x24xf32> to vector<2x6xf32>
    %cst_77 = arith.constant 1.000000e+00 : f32
    %779 = vector.broadcast %cst_77 : f32 to vector<2x6xf32>
    %780 = arith.addf %778, %779 : vector<2x6xf32>
    %cst_78 = arith.constant 5.000000e-01 : f32
    %781 = vector.broadcast %cst_78 : f32 to vector<2x6xf32>
    %782 = arith.mulf %781, %780 : vector<2x6xf32>
    %783 = vector.extract_strided_slice %777 {offsets = [0, 6], sizes = [2, 6], strides = [1, 1]} : vector<2x24xf32> to vector<2x6xf32>
    %cst_79 = arith.constant 1.000000e+00 : f32
    %784 = vector.broadcast %cst_79 : f32 to vector<2x6xf32>
    %785 = arith.addf %783, %784 : vector<2x6xf32>
    %cst_80 = arith.constant 5.000000e-01 : f32
    %786 = vector.broadcast %cst_80 : f32 to vector<2x6xf32>
    %787 = arith.mulf %786, %785 : vector<2x6xf32>
    %788 = vector.extract_strided_slice %777 {offsets = [0, 12], sizes = [2, 6], strides = [1, 1]} : vector<2x24xf32> to vector<2x6xf32>
    %789 = vector.extract_strided_slice %777 {offsets = [0, 18], sizes = [2, 6], strides = [1, 1]} : vector<2x24xf32> to vector<2x6xf32>
    %cst_81 = arith.constant 1.000000e+00 : f32
    %790 = vector.broadcast %cst_81 : f32 to vector<2x6xf32>
    %791 = arith.addf %789, %790 : vector<2x6xf32>
    %cst_82 = arith.constant 5.000000e-01 : f32
    %792 = vector.broadcast %cst_82 : f32 to vector<2x6xf32>
    %793 = arith.mulf %792, %791 : vector<2x6xf32>
    %794 = arith.mulf %787, %639 : vector<2x6xf32>
    %795 = arith.mulf %782, %788 : vector<2x6xf32>
    %796 = arith.addf %794, %795 : vector<2x6xf32>
    %797 = math.tanh %796 : vector<2x6xf32>
    %798 = arith.mulf %793, %797 : vector<2x6xf32>
    %c0_83 = arith.constant 0 : index
    %c4 = arith.constant 4 : index
    %c0_84 = arith.constant 0 : index
    %799 = vector.load %arg7[%c0_83, %c4, %c0_84] : memref<2x8x6xf32, #tpu.memory_space<vmem>>, vector<2x1x6xf32>
    %800 = vector.shape_cast %799 : vector<2x1x6xf32> to vector<2x6xf32>
    %801 = vector.shape_cast %798 : vector<2x6xf32> to vector<2x1x6xf32>
    tpu.vector_store %arg7[%c0_83, %c4, %c0_84], %801 {strides = array<i32>} : memref<2x8x6xf32, #tpu.memory_space<vmem>>, vector<2x1x6xf32>,
    %802 = vector.extract_strided_slice %15 {offsets = [0, 5, 0], sizes = [2, 1, 24], strides = [1, 1, 1]} : vector<2x8x24xf32> to vector<2x1x24xf32>
    %803 = vector.shape_cast %802 : vector<2x1x24xf32> to vector<2x24xf32>
    %804 = vector.extract_strided_slice %704 {offsets = [0, 0], sizes = [2, 1], strides = [1, 1]} : vector<2x6xf32> to vector<2x1xf32>
    %805 = vector.extract_strided_slice %1 {offsets = [0, 0], sizes = [1, 24], strides = [1, 1]} : vector<6x24xf32> to vector<1x24xf32>
    %806 = vector.broadcast %804 : vector<2x1xf32> to vector<2x24xf32>
    %807 = vector.broadcast %805 : vector<1x24xf32> to vector<2x24xf32>
    %808 = arith.mulf %806, %807 : vector<2x24xf32>
    %809 = arith.addf %803, %808 : vector<2x24xf32>
    %810 = vector.extract_strided_slice %704 {offsets = [0, 1], sizes = [2, 1], strides = [1, 1]} : vector<2x6xf32> to vector<2x1xf32>
    %811 = vector.extract_strided_slice %1 {offsets = [1, 0], sizes = [1, 24], strides = [1, 1]} : vector<6x24xf32> to vector<1x24xf32>
    %812 = vector.broadcast %810 : vector<2x1xf32> to vector<2x24xf32>
    %813 = vector.broadcast %811 : vector<1x24xf32> to vector<2x24xf32>
    %814 = arith.mulf %812, %813 : vector<2x24xf32>
    %815 = arith.addf %809, %814 : vector<2x24xf32>
    %816 = vector.extract_strided_slice %704 {offsets = [0, 2], sizes = [2, 1], strides = [1, 1]} : vector<2x6xf32> to vector<2x1xf32>
    %817 = vector.extract_strided_slice %1 {offsets = [2, 0], sizes = [1, 24], strides = [1, 1]} : vector<6x24xf32> to vector<1x24xf32>
    %818 = vector.broadcast %816 : vector<2x1xf32> to vector<2x24xf32>
    %819 = vector.broadcast %817 : vector<1x24xf32> to vector<2x24xf32>
    %820 = arith.mulf %818, %819 : vector<2x24xf32>
    %821 = arith.addf %815, %820 : vector<2x24xf32>
    %822 = vector.extract_strided_slice %704 {offsets = [0, 3], sizes = [2, 1], strides = [1, 1]} : vector<2x6xf32> to vector<2x1xf32>
    %823 = vector.extract_strided_slice %1 {offsets = [3, 0], sizes = [1, 24], strides = [1, 1]} : vector<6x24xf32> to vector<1x24xf32>
    %824 = vector.broadcast %822 : vector<2x1xf32> to vector<2x24xf32>
    %825 = vector.broadcast %823 : vector<1x24xf32> to vector<2x24xf32>
    %826 = arith.mulf %824, %825 : vector<2x24xf32>
    %827 = arith.addf %821, %826 : vector<2x24xf32>
    %828 = vector.extract_strided_slice %704 {offsets = [0, 4], sizes = [2, 1], strides = [1, 1]} : vector<2x6xf32> to vector<2x1xf32>
    %829 = vector.extract_strided_slice %1 {offsets = [4, 0], sizes = [1, 24], strides = [1, 1]} : vector<6x24xf32> to vector<1x24xf32>
    %830 = vector.broadcast %828 : vector<2x1xf32> to vector<2x24xf32>
    %831 = vector.broadcast %829 : vector<1x24xf32> to vector<2x24xf32>
    %832 = arith.mulf %830, %831 : vector<2x24xf32>
    %833 = arith.addf %827, %832 : vector<2x24xf32>
    %834 = vector.extract_strided_slice %704 {offsets = [0, 5], sizes = [2, 1], strides = [1, 1]} : vector<2x6xf32> to vector<2x1xf32>
    %835 = vector.extract_strided_slice %1 {offsets = [5, 0], sizes = [1, 24], strides = [1, 1]} : vector<6x24xf32> to vector<1x24xf32>
    %836 = vector.broadcast %834 : vector<2x1xf32> to vector<2x24xf32>
    %837 = vector.broadcast %835 : vector<1x24xf32> to vector<2x24xf32>
    %838 = arith.mulf %836, %837 : vector<2x24xf32>
    %839 = arith.addf %833, %838 : vector<2x24xf32>
    %840 = math.tanh %839 : vector<2x24xf32>
    %841 = vector.extract_strided_slice %840 {offsets = [0, 0], sizes = [2, 6], strides = [1, 1]} : vector<2x24xf32> to vector<2x6xf32>
    %cst_85 = arith.constant 1.000000e+00 : f32
    %842 = vector.broadcast %cst_85 : f32 to vector<2x6xf32>
    %843 = arith.addf %841, %842 : vector<2x6xf32>
    %cst_86 = arith.constant 5.000000e-01 : f32
    %844 = vector.broadcast %cst_86 : f32 to vector<2x6xf32>
    %845 = arith.mulf %844, %843 : vector<2x6xf32>
    %846 = vector.extract_strided_slice %840 {offsets = [0, 6], sizes = [2, 6], strides = [1, 1]} : vector<2x24xf32> to vector<2x6xf32>
    %cst_87 = arith.constant 1.000000e+00 : f32
    %847 = vector.broadcast %cst_87 : f32 to vector<2x6xf32>
    %848 = arith.addf %846, %847 : vector<2x6xf32>
    %cst_88 = arith.constant 5.000000e-01 : f32
    %849 = vector.broadcast %cst_88 : f32 to vector<2x6xf32>
    %850 = arith.mulf %849, %848 : vector<2x6xf32>
    %851 = vector.extract_strided_slice %840 {offsets = [0, 12], sizes = [2, 6], strides = [1, 1]} : vector<2x24xf32> to vector<2x6xf32>
    %852 = vector.extract_strided_slice %840 {offsets = [0, 18], sizes = [2, 6], strides = [1, 1]} : vector<2x24xf32> to vector<2x6xf32>
    %cst_89 = arith.constant 1.000000e+00 : f32
    %853 = vector.broadcast %cst_89 : f32 to vector<2x6xf32>
    %854 = arith.addf %852, %853 : vector<2x6xf32>
    %cst_90 = arith.constant 5.000000e-01 : f32
    %855 = vector.broadcast %cst_90 : f32 to vector<2x6xf32>
    %856 = arith.mulf %855, %854 : vector<2x6xf32>
    %857 = arith.mulf %850, %702 : vector<2x6xf32>
    %858 = arith.mulf %845, %851 : vector<2x6xf32>
    %859 = arith.addf %857, %858 : vector<2x6xf32>
    %860 = math.tanh %859 : vector<2x6xf32>
    %861 = arith.mulf %856, %860 : vector<2x6xf32>
    %862 = vector.extract_strided_slice %861 {offsets = [0, 0], sizes = [2, 1], strides = [1, 1]} : vector<2x6xf32> to vector<2x1xf32>
    %863 = vector.extract_strided_slice %3 {offsets = [0, 0], sizes = [1, 24], strides = [1, 1]} : vector<6x24xf32> to vector<1x24xf32>
    %864 = vector.broadcast %862 : vector<2x1xf32> to vector<2x24xf32>
    %865 = vector.broadcast %863 : vector<1x24xf32> to vector<2x24xf32>
    %866 = arith.mulf %864, %865 : vector<2x24xf32>
    %867 = arith.addf %7, %866 : vector<2x24xf32>
    %868 = vector.extract_strided_slice %861 {offsets = [0, 1], sizes = [2, 1], strides = [1, 1]} : vector<2x6xf32> to vector<2x1xf32>
    %869 = vector.extract_strided_slice %3 {offsets = [1, 0], sizes = [1, 24], strides = [1, 1]} : vector<6x24xf32> to vector<1x24xf32>
    %870 = vector.broadcast %868 : vector<2x1xf32> to vector<2x24xf32>
    %871 = vector.broadcast %869 : vector<1x24xf32> to vector<2x24xf32>
    %872 = arith.mulf %870, %871 : vector<2x24xf32>
    %873 = arith.addf %867, %872 : vector<2x24xf32>
    %874 = vector.extract_strided_slice %861 {offsets = [0, 2], sizes = [2, 1], strides = [1, 1]} : vector<2x6xf32> to vector<2x1xf32>
    %875 = vector.extract_strided_slice %3 {offsets = [2, 0], sizes = [1, 24], strides = [1, 1]} : vector<6x24xf32> to vector<1x24xf32>
    %876 = vector.broadcast %874 : vector<2x1xf32> to vector<2x24xf32>
    %877 = vector.broadcast %875 : vector<1x24xf32> to vector<2x24xf32>
    %878 = arith.mulf %876, %877 : vector<2x24xf32>
    %879 = arith.addf %873, %878 : vector<2x24xf32>
    %880 = vector.extract_strided_slice %861 {offsets = [0, 3], sizes = [2, 1], strides = [1, 1]} : vector<2x6xf32> to vector<2x1xf32>
    %881 = vector.extract_strided_slice %3 {offsets = [3, 0], sizes = [1, 24], strides = [1, 1]} : vector<6x24xf32> to vector<1x24xf32>
    %882 = vector.broadcast %880 : vector<2x1xf32> to vector<2x24xf32>
    %883 = vector.broadcast %881 : vector<1x24xf32> to vector<2x24xf32>
    %884 = arith.mulf %882, %883 : vector<2x24xf32>
    %885 = arith.addf %879, %884 : vector<2x24xf32>
    %886 = vector.extract_strided_slice %861 {offsets = [0, 4], sizes = [2, 1], strides = [1, 1]} : vector<2x6xf32> to vector<2x1xf32>
    %887 = vector.extract_strided_slice %3 {offsets = [4, 0], sizes = [1, 24], strides = [1, 1]} : vector<6x24xf32> to vector<1x24xf32>
    %888 = vector.broadcast %886 : vector<2x1xf32> to vector<2x24xf32>
    %889 = vector.broadcast %887 : vector<1x24xf32> to vector<2x24xf32>
    %890 = arith.mulf %888, %889 : vector<2x24xf32>
    %891 = arith.addf %885, %890 : vector<2x24xf32>
    %892 = vector.extract_strided_slice %861 {offsets = [0, 5], sizes = [2, 1], strides = [1, 1]} : vector<2x6xf32> to vector<2x1xf32>
    %893 = vector.extract_strided_slice %3 {offsets = [5, 0], sizes = [1, 24], strides = [1, 1]} : vector<6x24xf32> to vector<1x24xf32>
    %894 = vector.broadcast %892 : vector<2x1xf32> to vector<2x24xf32>
    %895 = vector.broadcast %893 : vector<1x24xf32> to vector<2x24xf32>
    %896 = arith.mulf %894, %895 : vector<2x24xf32>
    %897 = arith.addf %891, %896 : vector<2x24xf32>
    %898 = vector.extract_strided_slice %798 {offsets = [0, 0], sizes = [2, 1], strides = [1, 1]} : vector<2x6xf32> to vector<2x1xf32>
    %899 = vector.extract_strided_slice %4 {offsets = [0, 0], sizes = [1, 24], strides = [1, 1]} : vector<6x24xf32> to vector<1x24xf32>
    %900 = vector.broadcast %898 : vector<2x1xf32> to vector<2x24xf32>
    %901 = vector.broadcast %899 : vector<1x24xf32> to vector<2x24xf32>
    %902 = arith.mulf %900, %901 : vector<2x24xf32>
    %903 = arith.addf %897, %902 : vector<2x24xf32>
    %904 = vector.extract_strided_slice %798 {offsets = [0, 1], sizes = [2, 1], strides = [1, 1]} : vector<2x6xf32> to vector<2x1xf32>
    %905 = vector.extract_strided_slice %4 {offsets = [1, 0], sizes = [1, 24], strides = [1, 1]} : vector<6x24xf32> to vector<1x24xf32>
    %906 = vector.broadcast %904 : vector<2x1xf32> to vector<2x24xf32>
    %907 = vector.broadcast %905 : vector<1x24xf32> to vector<2x24xf32>
    %908 = arith.mulf %906, %907 : vector<2x24xf32>
    %909 = arith.addf %903, %908 : vector<2x24xf32>
    %910 = vector.extract_strided_slice %798 {offsets = [0, 2], sizes = [2, 1], strides = [1, 1]} : vector<2x6xf32> to vector<2x1xf32>
    %911 = vector.extract_strided_slice %4 {offsets = [2, 0], sizes = [1, 24], strides = [1, 1]} : vector<6x24xf32> to vector<1x24xf32>
    %912 = vector.broadcast %910 : vector<2x1xf32> to vector<2x24xf32>
    %913 = vector.broadcast %911 : vector<1x24xf32> to vector<2x24xf32>
    %914 = arith.mulf %912, %913 : vector<2x24xf32>
    %915 = arith.addf %909, %914 : vector<2x24xf32>
    %916 = vector.extract_strided_slice %798 {offsets = [0, 3], sizes = [2, 1], strides = [1, 1]} : vector<2x6xf32> to vector<2x1xf32>
    %917 = vector.extract_strided_slice %4 {offsets = [3, 0], sizes = [1, 24], strides = [1, 1]} : vector<6x24xf32> to vector<1x24xf32>
    %918 = vector.broadcast %916 : vector<2x1xf32> to vector<2x24xf32>
    %919 = vector.broadcast %917 : vector<1x24xf32> to vector<2x24xf32>
    %920 = arith.mulf %918, %919 : vector<2x24xf32>
    %921 = arith.addf %915, %920 : vector<2x24xf32>
    %922 = vector.extract_strided_slice %798 {offsets = [0, 4], sizes = [2, 1], strides = [1, 1]} : vector<2x6xf32> to vector<2x1xf32>
    %923 = vector.extract_strided_slice %4 {offsets = [4, 0], sizes = [1, 24], strides = [1, 1]} : vector<6x24xf32> to vector<1x24xf32>
    %924 = vector.broadcast %922 : vector<2x1xf32> to vector<2x24xf32>
    %925 = vector.broadcast %923 : vector<1x24xf32> to vector<2x24xf32>
    %926 = arith.mulf %924, %925 : vector<2x24xf32>
    %927 = arith.addf %921, %926 : vector<2x24xf32>
    %928 = vector.extract_strided_slice %798 {offsets = [0, 5], sizes = [2, 1], strides = [1, 1]} : vector<2x6xf32> to vector<2x1xf32>
    %929 = vector.extract_strided_slice %4 {offsets = [5, 0], sizes = [1, 24], strides = [1, 1]} : vector<6x24xf32> to vector<1x24xf32>
    %930 = vector.broadcast %928 : vector<2x1xf32> to vector<2x24xf32>
    %931 = vector.broadcast %929 : vector<1x24xf32> to vector<2x24xf32>
    %932 = arith.mulf %930, %931 : vector<2x24xf32>
    %933 = arith.addf %927, %932 : vector<2x24xf32>
    %934 = math.tanh %933 : vector<2x24xf32>
    %935 = vector.extract_strided_slice %934 {offsets = [0, 0], sizes = [2, 6], strides = [1, 1]} : vector<2x24xf32> to vector<2x6xf32>
    %cst_91 = arith.constant 1.000000e+00 : f32
    %936 = vector.broadcast %cst_91 : f32 to vector<2x6xf32>
    %937 = arith.addf %935, %936 : vector<2x6xf32>
    %cst_92 = arith.constant 5.000000e-01 : f32
    %938 = vector.broadcast %cst_92 : f32 to vector<2x6xf32>
    %939 = arith.mulf %938, %937 : vector<2x6xf32>
    %940 = vector.extract_strided_slice %934 {offsets = [0, 6], sizes = [2, 6], strides = [1, 1]} : vector<2x24xf32> to vector<2x6xf32>
    %cst_93 = arith.constant 1.000000e+00 : f32
    %941 = vector.broadcast %cst_93 : f32 to vector<2x6xf32>
    %942 = arith.addf %940, %941 : vector<2x6xf32>
    %cst_94 = arith.constant 5.000000e-01 : f32
    %943 = vector.broadcast %cst_94 : f32 to vector<2x6xf32>
    %944 = arith.mulf %943, %942 : vector<2x6xf32>
    %945 = vector.extract_strided_slice %934 {offsets = [0, 12], sizes = [2, 6], strides = [1, 1]} : vector<2x24xf32> to vector<2x6xf32>
    %946 = vector.extract_strided_slice %934 {offsets = [0, 18], sizes = [2, 6], strides = [1, 1]} : vector<2x24xf32> to vector<2x6xf32>
    %cst_95 = arith.constant 1.000000e+00 : f32
    %947 = vector.broadcast %cst_95 : f32 to vector<2x6xf32>
    %948 = arith.addf %946, %947 : vector<2x6xf32>
    %cst_96 = arith.constant 5.000000e-01 : f32
    %949 = vector.broadcast %cst_96 : f32 to vector<2x6xf32>
    %950 = arith.mulf %949, %948 : vector<2x6xf32>
    %951 = arith.mulf %944, %796 : vector<2x6xf32>
    %952 = arith.mulf %939, %945 : vector<2x6xf32>
    %953 = arith.addf %951, %952 : vector<2x6xf32>
    %954 = math.tanh %953 : vector<2x6xf32>
    %955 = arith.mulf %950, %954 : vector<2x6xf32>
    %c0_97 = arith.constant 0 : index
    %c5 = arith.constant 5 : index
    %c0_98 = arith.constant 0 : index
    %956 = vector.load %arg7[%c0_97, %c5, %c0_98] : memref<2x8x6xf32, #tpu.memory_space<vmem>>, vector<2x1x6xf32>
    %957 = vector.shape_cast %956 : vector<2x1x6xf32> to vector<2x6xf32>
    %958 = vector.shape_cast %955 : vector<2x6xf32> to vector<2x1x6xf32>
    tpu.vector_store %arg7[%c0_97, %c5, %c0_98], %958 {strides = array<i32>} : memref<2x8x6xf32, #tpu.memory_space<vmem>>, vector<2x1x6xf32>,
    %959 = vector.extract_strided_slice %15 {offsets = [0, 6, 0], sizes = [2, 1, 24], strides = [1, 1, 1]} : vector<2x8x24xf32> to vector<2x1x24xf32>
    %960 = vector.shape_cast %959 : vector<2x1x24xf32> to vector<2x24xf32>
    %961 = vector.extract_strided_slice %861 {offsets = [0, 0], sizes = [2, 1], strides = [1, 1]} : vector<2x6xf32> to vector<2x1xf32>
    %962 = vector.extract_strided_slice %1 {offsets = [0, 0], sizes = [1, 24], strides = [1, 1]} : vector<6x24xf32> to vector<1x24xf32>
    %963 = vector.broadcast %961 : vector<2x1xf32> to vector<2x24xf32>
    %964 = vector.broadcast %962 : vector<1x24xf32> to vector<2x24xf32>
    %965 = arith.mulf %963, %964 : vector<2x24xf32>
    %966 = arith.addf %960, %965 : vector<2x24xf32>
    %967 = vector.extract_strided_slice %861 {offsets = [0, 1], sizes = [2, 1], strides = [1, 1]} : vector<2x6xf32> to vector<2x1xf32>
    %968 = vector.extract_strided_slice %1 {offsets = [1, 0], sizes = [1, 24], strides = [1, 1]} : vector<6x24xf32> to vector<1x24xf32>
    %969 = vector.broadcast %967 : vector<2x1xf32> to vector<2x24xf32>
    %970 = vector.broadcast %968 : vector<1x24xf32> to vector<2x24xf32>
    %971 = arith.mulf %969, %970 : vector<2x24xf32>
    %972 = arith.addf %966, %971 : vector<2x24xf32>
    %973 = vector.extract_strided_slice %861 {offsets = [0, 2], sizes = [2, 1], strides = [1, 1]} : vector<2x6xf32> to vector<2x1xf32>
    %974 = vector.extract_strided_slice %1 {offsets = [2, 0], sizes = [1, 24], strides = [1, 1]} : vector<6x24xf32> to vector<1x24xf32>
    %975 = vector.broadcast %973 : vector<2x1xf32> to vector<2x24xf32>
    %976 = vector.broadcast %974 : vector<1x24xf32> to vector<2x24xf32>
    %977 = arith.mulf %975, %976 : vector<2x24xf32>
    %978 = arith.addf %972, %977 : vector<2x24xf32>
    %979 = vector.extract_strided_slice %861 {offsets = [0, 3], sizes = [2, 1], strides = [1, 1]} : vector<2x6xf32> to vector<2x1xf32>
    %980 = vector.extract_strided_slice %1 {offsets = [3, 0], sizes = [1, 24], strides = [1, 1]} : vector<6x24xf32> to vector<1x24xf32>
    %981 = vector.broadcast %979 : vector<2x1xf32> to vector<2x24xf32>
    %982 = vector.broadcast %980 : vector<1x24xf32> to vector<2x24xf32>
    %983 = arith.mulf %981, %982 : vector<2x24xf32>
    %984 = arith.addf %978, %983 : vector<2x24xf32>
    %985 = vector.extract_strided_slice %861 {offsets = [0, 4], sizes = [2, 1], strides = [1, 1]} : vector<2x6xf32> to vector<2x1xf32>
    %986 = vector.extract_strided_slice %1 {offsets = [4, 0], sizes = [1, 24], strides = [1, 1]} : vector<6x24xf32> to vector<1x24xf32>
    %987 = vector.broadcast %985 : vector<2x1xf32> to vector<2x24xf32>
    %988 = vector.broadcast %986 : vector<1x24xf32> to vector<2x24xf32>
    %989 = arith.mulf %987, %988 : vector<2x24xf32>
    %990 = arith.addf %984, %989 : vector<2x24xf32>
    %991 = vector.extract_strided_slice %861 {offsets = [0, 5], sizes = [2, 1], strides = [1, 1]} : vector<2x6xf32> to vector<2x1xf32>
    %992 = vector.extract_strided_slice %1 {offsets = [5, 0], sizes = [1, 24], strides = [1, 1]} : vector<6x24xf32> to vector<1x24xf32>
    %993 = vector.broadcast %991 : vector<2x1xf32> to vector<2x24xf32>
    %994 = vector.broadcast %992 : vector<1x24xf32> to vector<2x24xf32>
    %995 = arith.mulf %993, %994 : vector<2x24xf32>
    %996 = arith.addf %990, %995 : vector<2x24xf32>
    %997 = math.tanh %996 : vector<2x24xf32>
    %998 = vector.extract_strided_slice %997 {offsets = [0, 0], sizes = [2, 6], strides = [1, 1]} : vector<2x24xf32> to vector<2x6xf32>
    %cst_99 = arith.constant 1.000000e+00 : f32
    %999 = vector.broadcast %cst_99 : f32 to vector<2x6xf32>
    %1000 = arith.addf %998, %999 : vector<2x6xf32>
    %cst_100 = arith.constant 5.000000e-01 : f32
    %1001 = vector.broadcast %cst_100 : f32 to vector<2x6xf32>
    %1002 = arith.mulf %1001, %1000 : vector<2x6xf32>
    %1003 = vector.extract_strided_slice %997 {offsets = [0, 6], sizes = [2, 6], strides = [1, 1]} : vector<2x24xf32> to vector<2x6xf32>
    %cst_101 = arith.constant 1.000000e+00 : f32
    %1004 = vector.broadcast %cst_101 : f32 to vector<2x6xf32>
    %1005 = arith.addf %1003, %1004 : vector<2x6xf32>
    %cst_102 = arith.constant 5.000000e-01 : f32
    %1006 = vector.broadcast %cst_102 : f32 to vector<2x6xf32>
    %1007 = arith.mulf %1006, %1005 : vector<2x6xf32>
    %1008 = vector.extract_strided_slice %997 {offsets = [0, 12], sizes = [2, 6], strides = [1, 1]} : vector<2x24xf32> to vector<2x6xf32>
    %1009 = vector.extract_strided_slice %997 {offsets = [0, 18], sizes = [2, 6], strides = [1, 1]} : vector<2x24xf32> to vector<2x6xf32>
    %cst_103 = arith.constant 1.000000e+00 : f32
    %1010 = vector.broadcast %cst_103 : f32 to vector<2x6xf32>
    %1011 = arith.addf %1009, %1010 : vector<2x6xf32>
    %cst_104 = arith.constant 5.000000e-01 : f32
    %1012 = vector.broadcast %cst_104 : f32 to vector<2x6xf32>
    %1013 = arith.mulf %1012, %1011 : vector<2x6xf32>
    %1014 = arith.mulf %1007, %859 : vector<2x6xf32>
    %1015 = arith.mulf %1002, %1008 : vector<2x6xf32>
    %1016 = arith.addf %1014, %1015 : vector<2x6xf32>
    %1017 = math.tanh %1016 : vector<2x6xf32>
    %1018 = arith.mulf %1013, %1017 : vector<2x6xf32>
    %1019 = vector.extract_strided_slice %1018 {offsets = [0, 0], sizes = [2, 1], strides = [1, 1]} : vector<2x6xf32> to vector<2x1xf32>
    %1020 = vector.extract_strided_slice %3 {offsets = [0, 0], sizes = [1, 24], strides = [1, 1]} : vector<6x24xf32> to vector<1x24xf32>
    %1021 = vector.broadcast %1019 : vector<2x1xf32> to vector<2x24xf32>
    %1022 = vector.broadcast %1020 : vector<1x24xf32> to vector<2x24xf32>
    %1023 = arith.mulf %1021, %1022 : vector<2x24xf32>
    %1024 = arith.addf %7, %1023 : vector<2x24xf32>
    %1025 = vector.extract_strided_slice %1018 {offsets = [0, 1], sizes = [2, 1], strides = [1, 1]} : vector<2x6xf32> to vector<2x1xf32>
    %1026 = vector.extract_strided_slice %3 {offsets = [1, 0], sizes = [1, 24], strides = [1, 1]} : vector<6x24xf32> to vector<1x24xf32>
    %1027 = vector.broadcast %1025 : vector<2x1xf32> to vector<2x24xf32>
    %1028 = vector.broadcast %1026 : vector<1x24xf32> to vector<2x24xf32>
    %1029 = arith.mulf %1027, %1028 : vector<2x24xf32>
    %1030 = arith.addf %1024, %1029 : vector<2x24xf32>
    %1031 = vector.extract_strided_slice %1018 {offsets = [0, 2], sizes = [2, 1], strides = [1, 1]} : vector<2x6xf32> to vector<2x1xf32>
    %1032 = vector.extract_strided_slice %3 {offsets = [2, 0], sizes = [1, 24], strides = [1, 1]} : vector<6x24xf32> to vector<1x24xf32>
    %1033 = vector.broadcast %1031 : vector<2x1xf32> to vector<2x24xf32>
    %1034 = vector.broadcast %1032 : vector<1x24xf32> to vector<2x24xf32>
    %1035 = arith.mulf %1033, %1034 : vector<2x24xf32>
    %1036 = arith.addf %1030, %1035 : vector<2x24xf32>
    %1037 = vector.extract_strided_slice %1018 {offsets = [0, 3], sizes = [2, 1], strides = [1, 1]} : vector<2x6xf32> to vector<2x1xf32>
    %1038 = vector.extract_strided_slice %3 {offsets = [3, 0], sizes = [1, 24], strides = [1, 1]} : vector<6x24xf32> to vector<1x24xf32>
    %1039 = vector.broadcast %1037 : vector<2x1xf32> to vector<2x24xf32>
    %1040 = vector.broadcast %1038 : vector<1x24xf32> to vector<2x24xf32>
    %1041 = arith.mulf %1039, %1040 : vector<2x24xf32>
    %1042 = arith.addf %1036, %1041 : vector<2x24xf32>
    %1043 = vector.extract_strided_slice %1018 {offsets = [0, 4], sizes = [2, 1], strides = [1, 1]} : vector<2x6xf32> to vector<2x1xf32>
    %1044 = vector.extract_strided_slice %3 {offsets = [4, 0], sizes = [1, 24], strides = [1, 1]} : vector<6x24xf32> to vector<1x24xf32>
    %1045 = vector.broadcast %1043 : vector<2x1xf32> to vector<2x24xf32>
    %1046 = vector.broadcast %1044 : vector<1x24xf32> to vector<2x24xf32>
    %1047 = arith.mulf %1045, %1046 : vector<2x24xf32>
    %1048 = arith.addf %1042, %1047 : vector<2x24xf32>
    %1049 = vector.extract_strided_slice %1018 {offsets = [0, 5], sizes = [2, 1], strides = [1, 1]} : vector<2x6xf32> to vector<2x1xf32>
    %1050 = vector.extract_strided_slice %3 {offsets = [5, 0], sizes = [1, 24], strides = [1, 1]} : vector<6x24xf32> to vector<1x24xf32>
    %1051 = vector.broadcast %1049 : vector<2x1xf32> to vector<2x24xf32>
    %1052 = vector.broadcast %1050 : vector<1x24xf32> to vector<2x24xf32>
    %1053 = arith.mulf %1051, %1052 : vector<2x24xf32>
    %1054 = arith.addf %1048, %1053 : vector<2x24xf32>
    %1055 = vector.extract_strided_slice %955 {offsets = [0, 0], sizes = [2, 1], strides = [1, 1]} : vector<2x6xf32> to vector<2x1xf32>
    %1056 = vector.extract_strided_slice %4 {offsets = [0, 0], sizes = [1, 24], strides = [1, 1]} : vector<6x24xf32> to vector<1x24xf32>
    %1057 = vector.broadcast %1055 : vector<2x1xf32> to vector<2x24xf32>
    %1058 = vector.broadcast %1056 : vector<1x24xf32> to vector<2x24xf32>
    %1059 = arith.mulf %1057, %1058 : vector<2x24xf32>
    %1060 = arith.addf %1054, %1059 : vector<2x24xf32>
    %1061 = vector.extract_strided_slice %955 {offsets = [0, 1], sizes = [2, 1], strides = [1, 1]} : vector<2x6xf32> to vector<2x1xf32>
    %1062 = vector.extract_strided_slice %4 {offsets = [1, 0], sizes = [1, 24], strides = [1, 1]} : vector<6x24xf32> to vector<1x24xf32>
    %1063 = vector.broadcast %1061 : vector<2x1xf32> to vector<2x24xf32>
    %1064 = vector.broadcast %1062 : vector<1x24xf32> to vector<2x24xf32>
    %1065 = arith.mulf %1063, %1064 : vector<2x24xf32>
    %1066 = arith.addf %1060, %1065 : vector<2x24xf32>
    %1067 = vector.extract_strided_slice %955 {offsets = [0, 2], sizes = [2, 1], strides = [1, 1]} : vector<2x6xf32> to vector<2x1xf32>
    %1068 = vector.extract_strided_slice %4 {offsets = [2, 0], sizes = [1, 24], strides = [1, 1]} : vector<6x24xf32> to vector<1x24xf32>
    %1069 = vector.broadcast %1067 : vector<2x1xf32> to vector<2x24xf32>
    %1070 = vector.broadcast %1068 : vector<1x24xf32> to vector<2x24xf32>
    %1071 = arith.mulf %1069, %1070 : vector<2x24xf32>
    %1072 = arith.addf %1066, %1071 : vector<2x24xf32>
    %1073 = vector.extract_strided_slice %955 {offsets = [0, 3], sizes = [2, 1], strides = [1, 1]} : vector<2x6xf32> to vector<2x1xf32>
    %1074 = vector.extract_strided_slice %4 {offsets = [3, 0], sizes = [1, 24], strides = [1, 1]} : vector<6x24xf32> to vector<1x24xf32>
    %1075 = vector.broadcast %1073 : vector<2x1xf32> to vector<2x24xf32>
    %1076 = vector.broadcast %1074 : vector<1x24xf32> to vector<2x24xf32>
    %1077 = arith.mulf %1075, %1076 : vector<2x24xf32>
    %1078 = arith.addf %1072, %1077 : vector<2x24xf32>
    %1079 = vector.extract_strided_slice %955 {offsets = [0, 4], sizes = [2, 1], strides = [1, 1]} : vector<2x6xf32> to vector<2x1xf32>
    %1080 = vector.extract_strided_slice %4 {offsets = [4, 0], sizes = [1, 24], strides = [1, 1]} : vector<6x24xf32> to vector<1x24xf32>
    %1081 = vector.broadcast %1079 : vector<2x1xf32> to vector<2x24xf32>
    %1082 = vector.broadcast %1080 : vector<1x24xf32> to vector<2x24xf32>
    %1083 = arith.mulf %1081, %1082 : vector<2x24xf32>
    %1084 = arith.addf %1078, %1083 : vector<2x24xf32>
    %1085 = vector.extract_strided_slice %955 {offsets = [0, 5], sizes = [2, 1], strides = [1, 1]} : vector<2x6xf32> to vector<2x1xf32>
    %1086 = vector.extract_strided_slice %4 {offsets = [5, 0], sizes = [1, 24], strides = [1, 1]} : vector<6x24xf32> to vector<1x24xf32>
    %1087 = vector.broadcast %1085 : vector<2x1xf32> to vector<2x24xf32>
    %1088 = vector.broadcast %1086 : vector<1x24xf32> to vector<2x24xf32>
    %1089 = arith.mulf %1087, %1088 : vector<2x24xf32>
    %1090 = arith.addf %1084, %1089 : vector<2x24xf32>
    %1091 = math.tanh %1090 : vector<2x24xf32>
    %1092 = vector.extract_strided_slice %1091 {offsets = [0, 0], sizes = [2, 6], strides = [1, 1]} : vector<2x24xf32> to vector<2x6xf32>
    %cst_105 = arith.constant 1.000000e+00 : f32
    %1093 = vector.broadcast %cst_105 : f32 to vector<2x6xf32>
    %1094 = arith.addf %1092, %1093 : vector<2x6xf32>
    %cst_106 = arith.constant 5.000000e-01 : f32
    %1095 = vector.broadcast %cst_106 : f32 to vector<2x6xf32>
    %1096 = arith.mulf %1095, %1094 : vector<2x6xf32>
    %1097 = vector.extract_strided_slice %1091 {offsets = [0, 6], sizes = [2, 6], strides = [1, 1]} : vector<2x24xf32> to vector<2x6xf32>
    %cst_107 = arith.constant 1.000000e+00 : f32
    %1098 = vector.broadcast %cst_107 : f32 to vector<2x6xf32>
    %1099 = arith.addf %1097, %1098 : vector<2x6xf32>
    %cst_108 = arith.constant 5.000000e-01 : f32
    %1100 = vector.broadcast %cst_108 : f32 to vector<2x6xf32>
    %1101 = arith.mulf %1100, %1099 : vector<2x6xf32>
    %1102 = vector.extract_strided_slice %1091 {offsets = [0, 12], sizes = [2, 6], strides = [1, 1]} : vector<2x24xf32> to vector<2x6xf32>
    %1103 = vector.extract_strided_slice %1091 {offsets = [0, 18], sizes = [2, 6], strides = [1, 1]} : vector<2x24xf32> to vector<2x6xf32>
    %cst_109 = arith.constant 1.000000e+00 : f32
    %1104 = vector.broadcast %cst_109 : f32 to vector<2x6xf32>
    %1105 = arith.addf %1103, %1104 : vector<2x6xf32>
    %cst_110 = arith.constant 5.000000e-01 : f32
    %1106 = vector.broadcast %cst_110 : f32 to vector<2x6xf32>
    %1107 = arith.mulf %1106, %1105 : vector<2x6xf32>
    %1108 = arith.mulf %1101, %953 : vector<2x6xf32>
    %1109 = arith.mulf %1096, %1102 : vector<2x6xf32>
    %1110 = arith.addf %1108, %1109 : vector<2x6xf32>
    %1111 = math.tanh %1110 : vector<2x6xf32>
    %1112 = arith.mulf %1107, %1111 : vector<2x6xf32>
    %c0_111 = arith.constant 0 : index
    %c6 = arith.constant 6 : index
    %c0_112 = arith.constant 0 : index
    %1113 = vector.load %arg7[%c0_111, %c6, %c0_112] : memref<2x8x6xf32, #tpu.memory_space<vmem>>, vector<2x1x6xf32>
    %1114 = vector.shape_cast %1113 : vector<2x1x6xf32> to vector<2x6xf32>
    %1115 = vector.shape_cast %1112 : vector<2x6xf32> to vector<2x1x6xf32>
    tpu.vector_store %arg7[%c0_111, %c6, %c0_112], %1115 {strides = array<i32>} : memref<2x8x6xf32, #tpu.memory_space<vmem>>, vector<2x1x6xf32>,
    %1116 = vector.extract_strided_slice %15 {offsets = [0, 7, 0], sizes = [2, 1, 24], strides = [1, 1, 1]} : vector<2x8x24xf32> to vector<2x1x24xf32>
    %1117 = vector.shape_cast %1116 : vector<2x1x24xf32> to vector<2x24xf32>
    %1118 = vector.extract_strided_slice %1018 {offsets = [0, 0], sizes = [2, 1], strides = [1, 1]} : vector<2x6xf32> to vector<2x1xf32>
    %1119 = vector.extract_strided_slice %1 {offsets = [0, 0], sizes = [1, 24], strides = [1, 1]} : vector<6x24xf32> to vector<1x24xf32>
    %1120 = vector.broadcast %1118 : vector<2x1xf32> to vector<2x24xf32>
    %1121 = vector.broadcast %1119 : vector<1x24xf32> to vector<2x24xf32>
    %1122 = arith.mulf %1120, %1121 : vector<2x24xf32>
    %1123 = arith.addf %1117, %1122 : vector<2x24xf32>
    %1124 = vector.extract_strided_slice %1018 {offsets = [0, 1], sizes = [2, 1], strides = [1, 1]} : vector<2x6xf32> to vector<2x1xf32>
    %1125 = vector.extract_strided_slice %1 {offsets = [1, 0], sizes = [1, 24], strides = [1, 1]} : vector<6x24xf32> to vector<1x24xf32>
    %1126 = vector.broadcast %1124 : vector<2x1xf32> to vector<2x24xf32>
    %1127 = vector.broadcast %1125 : vector<1x24xf32> to vector<2x24xf32>
    %1128 = arith.mulf %1126, %1127 : vector<2x24xf32>
    %1129 = arith.addf %1123, %1128 : vector<2x24xf32>
    %1130 = vector.extract_strided_slice %1018 {offsets = [0, 2], sizes = [2, 1], strides = [1, 1]} : vector<2x6xf32> to vector<2x1xf32>
    %1131 = vector.extract_strided_slice %1 {offsets = [2, 0], sizes = [1, 24], strides = [1, 1]} : vector<6x24xf32> to vector<1x24xf32>
    %1132 = vector.broadcast %1130 : vector<2x1xf32> to vector<2x24xf32>
    %1133 = vector.broadcast %1131 : vector<1x24xf32> to vector<2x24xf32>
    %1134 = arith.mulf %1132, %1133 : vector<2x24xf32>
    %1135 = arith.addf %1129, %1134 : vector<2x24xf32>
    %1136 = vector.extract_strided_slice %1018 {offsets = [0, 3], sizes = [2, 1], strides = [1, 1]} : vector<2x6xf32> to vector<2x1xf32>
    %1137 = vector.extract_strided_slice %1 {offsets = [3, 0], sizes = [1, 24], strides = [1, 1]} : vector<6x24xf32> to vector<1x24xf32>
    %1138 = vector.broadcast %1136 : vector<2x1xf32> to vector<2x24xf32>
    %1139 = vector.broadcast %1137 : vector<1x24xf32> to vector<2x24xf32>
    %1140 = arith.mulf %1138, %1139 : vector<2x24xf32>
    %1141 = arith.addf %1135, %1140 : vector<2x24xf32>
    %1142 = vector.extract_strided_slice %1018 {offsets = [0, 4], sizes = [2, 1], strides = [1, 1]} : vector<2x6xf32> to vector<2x1xf32>
    %1143 = vector.extract_strided_slice %1 {offsets = [4, 0], sizes = [1, 24], strides = [1, 1]} : vector<6x24xf32> to vector<1x24xf32>
    %1144 = vector.broadcast %1142 : vector<2x1xf32> to vector<2x24xf32>
    %1145 = vector.broadcast %1143 : vector<1x24xf32> to vector<2x24xf32>
    %1146 = arith.mulf %1144, %1145 : vector<2x24xf32>
    %1147 = arith.addf %1141, %1146 : vector<2x24xf32>
    %1148 = vector.extract_strided_slice %1018 {offsets = [0, 5], sizes = [2, 1], strides = [1, 1]} : vector<2x6xf32> to vector<2x1xf32>
    %1149 = vector.extract_strided_slice %1 {offsets = [5, 0], sizes = [1, 24], strides = [1, 1]} : vector<6x24xf32> to vector<1x24xf32>
    %1150 = vector.broadcast %1148 : vector<2x1xf32> to vector<2x24xf32>
    %1151 = vector.broadcast %1149 : vector<1x24xf32> to vector<2x24xf32>
    %1152 = arith.mulf %1150, %1151 : vector<2x24xf32>
    %1153 = arith.addf %1147, %1152 : vector<2x24xf32>
    %1154 = math.tanh %1153 : vector<2x24xf32>
    %1155 = vector.extract_strided_slice %1154 {offsets = [0, 0], sizes = [2, 6], strides = [1, 1]} : vector<2x24xf32> to vector<2x6xf32>
    %cst_113 = arith.constant 1.000000e+00 : f32
    %1156 = vector.broadcast %cst_113 : f32 to vector<2x6xf32>
    %1157 = arith.addf %1155, %1156 : vector<2x6xf32>
    %cst_114 = arith.constant 5.000000e-01 : f32
    %1158 = vector.broadcast %cst_114 : f32 to vector<2x6xf32>
    %1159 = arith.mulf %1158, %1157 : vector<2x6xf32>
    %1160 = vector.extract_strided_slice %1154 {offsets = [0, 6], sizes = [2, 6], strides = [1, 1]} : vector<2x24xf32> to vector<2x6xf32>
    %cst_115 = arith.constant 1.000000e+00 : f32
    %1161 = vector.broadcast %cst_115 : f32 to vector<2x6xf32>
    %1162 = arith.addf %1160, %1161 : vector<2x6xf32>
    %cst_116 = arith.constant 5.000000e-01 : f32
    %1163 = vector.broadcast %cst_116 : f32 to vector<2x6xf32>
    %1164 = arith.mulf %1163, %1162 : vector<2x6xf32>
    %1165 = vector.extract_strided_slice %1154 {offsets = [0, 12], sizes = [2, 6], strides = [1, 1]} : vector<2x24xf32> to vector<2x6xf32>
    %1166 = vector.extract_strided_slice %1154 {offsets = [0, 18], sizes = [2, 6], strides = [1, 1]} : vector<2x24xf32> to vector<2x6xf32>
    %cst_117 = arith.constant 1.000000e+00 : f32
    %1167 = vector.broadcast %cst_117 : f32 to vector<2x6xf32>
    %1168 = arith.addf %1166, %1167 : vector<2x6xf32>
    %cst_118 = arith.constant 5.000000e-01 : f32
    %1169 = vector.broadcast %cst_118 : f32 to vector<2x6xf32>
    %1170 = arith.mulf %1169, %1168 : vector<2x6xf32>
    %1171 = arith.mulf %1164, %1016 : vector<2x6xf32>
    %1172 = arith.mulf %1159, %1165 : vector<2x6xf32>
    %1173 = arith.addf %1171, %1172 : vector<2x6xf32>
    %1174 = math.tanh %1173 : vector<2x6xf32>
    %1175 = arith.mulf %1170, %1174 : vector<2x6xf32>
    %1176 = vector.extract_strided_slice %1175 {offsets = [0, 0], sizes = [2, 1], strides = [1, 1]} : vector<2x6xf32> to vector<2x1xf32>
    %1177 = vector.extract_strided_slice %3 {offsets = [0, 0], sizes = [1, 24], strides = [1, 1]} : vector<6x24xf32> to vector<1x24xf32>
    %1178 = vector.broadcast %1176 : vector<2x1xf32> to vector<2x24xf32>
    %1179 = vector.broadcast %1177 : vector<1x24xf32> to vector<2x24xf32>
    %1180 = arith.mulf %1178, %1179 : vector<2x24xf32>
    %1181 = arith.addf %7, %1180 : vector<2x24xf32>
    %1182 = vector.extract_strided_slice %1175 {offsets = [0, 1], sizes = [2, 1], strides = [1, 1]} : vector<2x6xf32> to vector<2x1xf32>
    %1183 = vector.extract_strided_slice %3 {offsets = [1, 0], sizes = [1, 24], strides = [1, 1]} : vector<6x24xf32> to vector<1x24xf32>
    %1184 = vector.broadcast %1182 : vector<2x1xf32> to vector<2x24xf32>
    %1185 = vector.broadcast %1183 : vector<1x24xf32> to vector<2x24xf32>
    %1186 = arith.mulf %1184, %1185 : vector<2x24xf32>
    %1187 = arith.addf %1181, %1186 : vector<2x24xf32>
    %1188 = vector.extract_strided_slice %1175 {offsets = [0, 2], sizes = [2, 1], strides = [1, 1]} : vector<2x6xf32> to vector<2x1xf32>
    %1189 = vector.extract_strided_slice %3 {offsets = [2, 0], sizes = [1, 24], strides = [1, 1]} : vector<6x24xf32> to vector<1x24xf32>
    %1190 = vector.broadcast %1188 : vector<2x1xf32> to vector<2x24xf32>
    %1191 = vector.broadcast %1189 : vector<1x24xf32> to vector<2x24xf32>
    %1192 = arith.mulf %1190, %1191 : vector<2x24xf32>
    %1193 = arith.addf %1187, %1192 : vector<2x24xf32>
    %1194 = vector.extract_strided_slice %1175 {offsets = [0, 3], sizes = [2, 1], strides = [1, 1]} : vector<2x6xf32> to vector<2x1xf32>
    %1195 = vector.extract_strided_slice %3 {offsets = [3, 0], sizes = [1, 24], strides = [1, 1]} : vector<6x24xf32> to vector<1x24xf32>
    %1196 = vector.broadcast %1194 : vector<2x1xf32> to vector<2x24xf32>
    %1197 = vector.broadcast %1195 : vector<1x24xf32> to vector<2x24xf32>
    %1198 = arith.mulf %1196, %1197 : vector<2x24xf32>
    %1199 = arith.addf %1193, %1198 : vector<2x24xf32>
    %1200 = vector.extract_strided_slice %1175 {offsets = [0, 4], sizes = [2, 1], strides = [1, 1]} : vector<2x6xf32> to vector<2x1xf32>
    %1201 = vector.extract_strided_slice %3 {offsets = [4, 0], sizes = [1, 24], strides = [1, 1]} : vector<6x24xf32> to vector<1x24xf32>
    %1202 = vector.broadcast %1200 : vector<2x1xf32> to vector<2x24xf32>
    %1203 = vector.broadcast %1201 : vector<1x24xf32> to vector<2x24xf32>
    %1204 = arith.mulf %1202, %1203 : vector<2x24xf32>
    %1205 = arith.addf %1199, %1204 : vector<2x24xf32>
    %1206 = vector.extract_strided_slice %1175 {offsets = [0, 5], sizes = [2, 1], strides = [1, 1]} : vector<2x6xf32> to vector<2x1xf32>
    %1207 = vector.extract_strided_slice %3 {offsets = [5, 0], sizes = [1, 24], strides = [1, 1]} : vector<6x24xf32> to vector<1x24xf32>
    %1208 = vector.broadcast %1206 : vector<2x1xf32> to vector<2x24xf32>
    %1209 = vector.broadcast %1207 : vector<1x24xf32> to vector<2x24xf32>
    %1210 = arith.mulf %1208, %1209 : vector<2x24xf32>
    %1211 = arith.addf %1205, %1210 : vector<2x24xf32>
    %1212 = vector.extract_strided_slice %1112 {offsets = [0, 0], sizes = [2, 1], strides = [1, 1]} : vector<2x6xf32> to vector<2x1xf32>
    %1213 = vector.extract_strided_slice %4 {offsets = [0, 0], sizes = [1, 24], strides = [1, 1]} : vector<6x24xf32> to vector<1x24xf32>
    %1214 = vector.broadcast %1212 : vector<2x1xf32> to vector<2x24xf32>
    %1215 = vector.broadcast %1213 : vector<1x24xf32> to vector<2x24xf32>
    %1216 = arith.mulf %1214, %1215 : vector<2x24xf32>
    %1217 = arith.addf %1211, %1216 : vector<2x24xf32>
    %1218 = vector.extract_strided_slice %1112 {offsets = [0, 1], sizes = [2, 1], strides = [1, 1]} : vector<2x6xf32> to vector<2x1xf32>
    %1219 = vector.extract_strided_slice %4 {offsets = [1, 0], sizes = [1, 24], strides = [1, 1]} : vector<6x24xf32> to vector<1x24xf32>
    %1220 = vector.broadcast %1218 : vector<2x1xf32> to vector<2x24xf32>
    %1221 = vector.broadcast %1219 : vector<1x24xf32> to vector<2x24xf32>
    %1222 = arith.mulf %1220, %1221 : vector<2x24xf32>
    %1223 = arith.addf %1217, %1222 : vector<2x24xf32>
    %1224 = vector.extract_strided_slice %1112 {offsets = [0, 2], sizes = [2, 1], strides = [1, 1]} : vector<2x6xf32> to vector<2x1xf32>
    %1225 = vector.extract_strided_slice %4 {offsets = [2, 0], sizes = [1, 24], strides = [1, 1]} : vector<6x24xf32> to vector<1x24xf32>
    %1226 = vector.broadcast %1224 : vector<2x1xf32> to vector<2x24xf32>
    %1227 = vector.broadcast %1225 : vector<1x24xf32> to vector<2x24xf32>
    %1228 = arith.mulf %1226, %1227 : vector<2x24xf32>
    %1229 = arith.addf %1223, %1228 : vector<2x24xf32>
    %1230 = vector.extract_strided_slice %1112 {offsets = [0, 3], sizes = [2, 1], strides = [1, 1]} : vector<2x6xf32> to vector<2x1xf32>
    %1231 = vector.extract_strided_slice %4 {offsets = [3, 0], sizes = [1, 24], strides = [1, 1]} : vector<6x24xf32> to vector<1x24xf32>
    %1232 = vector.broadcast %1230 : vector<2x1xf32> to vector<2x24xf32>
    %1233 = vector.broadcast %1231 : vector<1x24xf32> to vector<2x24xf32>
    %1234 = arith.mulf %1232, %1233 : vector<2x24xf32>
    %1235 = arith.addf %1229, %1234 : vector<2x24xf32>
    %1236 = vector.extract_strided_slice %1112 {offsets = [0, 4], sizes = [2, 1], strides = [1, 1]} : vector<2x6xf32> to vector<2x1xf32>
    %1237 = vector.extract_strided_slice %4 {offsets = [4, 0], sizes = [1, 24], strides = [1, 1]} : vector<6x24xf32> to vector<1x24xf32>
    %1238 = vector.broadcast %1236 : vector<2x1xf32> to vector<2x24xf32>
    %1239 = vector.broadcast %1237 : vector<1x24xf32> to vector<2x24xf32>
    %1240 = arith.mulf %1238, %1239 : vector<2x24xf32>
    %1241 = arith.addf %1235, %1240 : vector<2x24xf32>
    %1242 = vector.extract_strided_slice %1112 {offsets = [0, 5], sizes = [2, 1], strides = [1, 1]} : vector<2x6xf32> to vector<2x1xf32>
    %1243 = vector.extract_strided_slice %4 {offsets = [5, 0], sizes = [1, 24], strides = [1, 1]} : vector<6x24xf32> to vector<1x24xf32>
    %1244 = vector.broadcast %1242 : vector<2x1xf32> to vector<2x24xf32>
    %1245 = vector.broadcast %1243 : vector<1x24xf32> to vector<2x24xf32>
    %1246 = arith.mulf %1244, %1245 : vector<2x24xf32>
    %1247 = arith.addf %1241, %1246 : vector<2x24xf32>
    %1248 = math.tanh %1247 : vector<2x24xf32>
    %1249 = vector.extract_strided_slice %1248 {offsets = [0, 0], sizes = [2, 6], strides = [1, 1]} : vector<2x24xf32> to vector<2x6xf32>
    %cst_119 = arith.constant 1.000000e+00 : f32
    %1250 = vector.broadcast %cst_119 : f32 to vector<2x6xf32>
    %1251 = arith.addf %1249, %1250 : vector<2x6xf32>
    %cst_120 = arith.constant 5.000000e-01 : f32
    %1252 = vector.broadcast %cst_120 : f32 to vector<2x6xf32>
    %1253 = arith.mulf %1252, %1251 : vector<2x6xf32>
    %1254 = vector.extract_strided_slice %1248 {offsets = [0, 6], sizes = [2, 6], strides = [1, 1]} : vector<2x24xf32> to vector<2x6xf32>
    %cst_121 = arith.constant 1.000000e+00 : f32
    %1255 = vector.broadcast %cst_121 : f32 to vector<2x6xf32>
    %1256 = arith.addf %1254, %1255 : vector<2x6xf32>
    %cst_122 = arith.constant 5.000000e-01 : f32
    %1257 = vector.broadcast %cst_122 : f32 to vector<2x6xf32>
    %1258 = arith.mulf %1257, %1256 : vector<2x6xf32>
    %1259 = vector.extract_strided_slice %1248 {offsets = [0, 12], sizes = [2, 6], strides = [1, 1]} : vector<2x24xf32> to vector<2x6xf32>
    %1260 = vector.extract_strided_slice %1248 {offsets = [0, 18], sizes = [2, 6], strides = [1, 1]} : vector<2x24xf32> to vector<2x6xf32>
    %cst_123 = arith.constant 1.000000e+00 : f32
    %1261 = vector.broadcast %cst_123 : f32 to vector<2x6xf32>
    %1262 = arith.addf %1260, %1261 : vector<2x6xf32>
    %cst_124 = arith.constant 5.000000e-01 : f32
    %1263 = vector.broadcast %cst_124 : f32 to vector<2x6xf32>
    %1264 = arith.mulf %1263, %1262 : vector<2x6xf32>
    %1265 = arith.mulf %1258, %1110 : vector<2x6xf32>
    %1266 = arith.mulf %1253, %1259 : vector<2x6xf32>
    %1267 = arith.addf %1265, %1266 : vector<2x6xf32>
    %1268 = math.tanh %1267 : vector<2x6xf32>
    %1269 = arith.mulf %1264, %1268 : vector<2x6xf32>
    %c0_125 = arith.constant 0 : index
    %c7 = arith.constant 7 : index
    %c0_126 = arith.constant 0 : index
    %1270 = vector.load %arg7[%c0_125, %c7, %c0_126] : memref<2x8x6xf32, #tpu.memory_space<vmem>>, vector<2x1x6xf32>
    %1271 = vector.shape_cast %1270 : vector<2x1x6xf32> to vector<2x6xf32>
    %1272 = vector.shape_cast %1269 : vector<2x6xf32> to vector<2x1x6xf32>
    tpu.vector_store %arg7[%c0_125, %c7, %c0_126], %1272 {strides = array<i32>} : memref<2x8x6xf32, #tpu.memory_space<vmem>>, vector<2x1x6xf32>,
    return
  }
}

</mosaic_0001>

<bundles_post_ra>
// kernel: tpu_custom_call.1
= control target key start
LH: loop header
LB: loop body
LE: loop exit
PB: predicated region body
PF: predicated region fallthrough
CT: control target
= control target key end

     0   :  { %12 = vsyncpa [#allocation3], 0  ;;  %s2773_s24 = smov [#allocation2]   ;;  %s3724_s0 = inlined_call_operand.vmem [shape: f32[2,8,1], index: 0, kind: input, shape index: {}]   ;;  %s3725_s1 = inlined_call_operand.vmem [shape: f32[1,24], index: 1, kind: input, shape index: {}]   ;;  %s3726_s2 = inlined_call_operand.vmem [shape: f32[6,24], index: 2, kind: input, shape index: {}]   ;;  %s3727_s3 = inlined_call_operand.hbm [shape: f32[1,24], index: 3, kind: input, shape index: {}]   ;;  %s3728_s4 = inlined_call_operand.vmem [shape: f32[6,24], index: 4, kind: input, shape index: {}]   ;;  %s3729_s5 = inlined_call_operand.vmem [shape: f32[6,24], index: 5, kind: input, shape index: {}]   ;;  %s3730_s6 = inlined_call_operand.vmem [shape: f32[1,24], index: 6, kind: input, shape index: {}]   ;;  %s3731_s7 = inlined_call_operand.vmem [shape: f32[2,8,6], index: 7, kind: output, shape index: {}]  }
   0x1   :  { %s25_s25 = sshll.u32 %s2773_s24, 4  ;;  %s26_s25 = int_to_ptr.vmem [resolvable:$true] %s25_s25 }
   0x2   :  { %s2759_s26 = scalar_lea.vmem %s26_s25, 16  ;;  %s2763_s27 = scalar_lea.vmem %s26_s25, 32 }
   0x3   :  { %p2760_p0 = scmp.ne.s32.totalorder %s26_s25, %s2759_s26  ;;  %p2764_p1 = scmp.lt.s32.totalorder %s26_s25, %s26_s25 }
   0x4   :  { %p2765_p2 = scmp.lt.s32.totalorder %s2763_s27, %s2759_s26 }
   0x6   :  { %p2766_p3 = por %p2765_p2, %p2764_p1 }
   0x8   :  { %p2767_p4 = pnand %p2766_p3, %p2760_p0 }
   0xa   :  { %2770 = shalt.err (!%p2767_p4)
}
   0xb   :  { %28 = dma.hbm_to_vmem [thread:$0]  %s3727_s3, 16, %s26_s25, [#allocation3]  }
   0xc   :  { %2771 = dma.done.wait [#allocation3], 16  }
   0xd   :  { %2772 = vsyncadd [#allocation3], 4294967280  ;;  %v2774_v0 = vmov 0   ;;  %v50_v1 = vld [vmem:[%s3724_s0] sm:$0xff]  ;;  %v51_v2 = vld [vmem:[%s3724_s0 + $0x8] sm:$0xff]  ;;  %v78_v3 = vlaneseq  ;;  %v3732_v60 = vmov 18  }
   0xe   :  { %2529 = vset.pattern.permute.xlu0 %v2774_v0  ;;  %v39_v6 = vld [vmem:[%s3726_s2] sm:$0x3f]  ;;  %s2776_s2 = smov 6   ;;  %2531 = vset.pattern.permute.xlu1 %v3732_v60  ;;  %s2778_s13 = smov 12   ;;  %vm179_vm0 = vcmask 1041409   ;;  %vm376_vm1 = vcmask 40960  }
   0xf   :  { %54 = vperm.xlu0 %2529, %v50_v1   ;;  %v2835_v4 = vshrl.u32 %v78_v3, 7  ;;  %v2514_v10 = vld [vmem:[%s3725_s1] ss:$0 sm:$0xff]  ;;  %s2775_s1 = smov 116   ;;  %v3742_v3 = vmov 19  }
  0x10   :  { %v2515_v14 = vld [vmem:[#allocation2] ss:$0 sm:$0xff] }
  0x11   :  { %v2838_v5 = vsub.s32 0, %v2835_v4  ;;  %v2844_v7 = vsub.s32 1, %v2835_v4  ;;  %v2850_v9 = vsub.s32 2, %v2835_v4  ;;  %v2859_v12 = vsub.s32 3, %v2835_v4 }
  0x12   :  { %v2866_v18 = vsub.s32 4, %v2835_v4  ;;  %v2875_v22 = vsub.s32 5, %v2835_v4 }
  0x13   :  { %59 = vperm.xlu0 %2529, %v51_v2   ;;  %3750 = vst [vmem:[#allocation5_spill] sm:$0xff] %v2838_v5  ;;  %v2847_v8 = vrot.slane %v39_v6, %v2838_v5  ;;  %v2856_v11 = vrot.slane %v39_v6, %v2844_v7  ;;  %v2863_v17 = vrot.slane %v39_v6, %v2850_v9 }
  0x14   :  { %v2872_v21 = vrot.slane %v39_v6, %v2859_v12  ;;  %v2880_v27 = vrot.slane %v39_v6, %v2866_v18  ;;  %v2886_v31 = vrot.slane %v39_v6, %v2875_v22  ;;  %v3740_v6 = vmov 21  }
  0x15   :  { %v82_v16 = vmul.f32 0.0, %v2847_v8  ;;  %v89_v20 = vmul.f32 0.0, %v2856_v11  ;;  %v96_v26 = vmul.f32 0.0, %v2863_v17 }
  0x16   :  { %v103_v30 = vmul.f32 0.0, %v2872_v21  ;;  %v110_v34 = vmul.f32 0.0, %v2880_v27  ;;  %v117_v37 = vmul.f32 0.0, %v2886_v31 }
  0x17   :  { %2530 = vset.pattern.permute.xlu0 %v3732_v60 }
  0x8a   :  { %v55_v13 = vpop.permute.xlu0 %54 }
  0x8b   :  { %v68_v15 = vmul.f32 %v2514_v10, %v55_v13  ;;  %v3734_v13 = vmov 22  }
  0x8d   :  { %v2868_v19 = vadd.f32 %v2515_v14, %v68_v15 }
  0x8e   :  { %v60_v23 = vpop.permute.xlu0 %59 }
  0x8f   :  { %v69_v24 = vmul.f32 %v2514_v10, %v60_v23  ;;  %v83_v25 = vadd.f32 %v82_v16, %v2868_v19  ;;  %v3738_v10 = vmov 20   ;;  %v2918_v23 = vld [vmem:[%s3728_s4] sm:$0x3f] }
  0x91   :  { %v2882_v28 = vadd.f32 %v2515_v14, %v69_v24  ;;  %v90_v29 = vadd.f32 %v89_v20, %v83_v25  ;;  %v3736_v14 = vmov 23   ;;  %v2922_v25 = vrot.slane %v2918_v23, %v2838_v5 }
  0x93   :  { %v84_v32 = vadd.f32 %v82_v16, %v2882_v28  ;;  %v97_v33 = vadd.f32 %v96_v26, %v90_v29 }
  0x95   :  { %v91_v35 = vadd.f32 %v89_v20, %v84_v32  ;;  %v104_v36 = vadd.f32 %v103_v30, %v97_v33 }
  0x97   :  { %v98_v38 = vadd.f32 %v96_v26, %v91_v35  ;;  %v111_v39 = vadd.f32 %v110_v34, %v104_v36 }
  0x99   :  { %v105_v40 = vadd.f32 %v103_v30, %v98_v38  ;;  %v118_v41 = vadd.f32 %v117_v37, %v111_v39  ;;  %v2934_v38 = vrot.slane %v2918_v23, %v2850_v9 }
  0x9b   :  { %v112_v42 = vadd.f32 %v110_v34, %v105_v40  ;;  %2653 = vtanh.f32 %v118_v41  ;;  %v2929_v34 = vrot.slane %v2918_v23, %v2844_v7 }
  0x9d   :  { %v119_v43 = vadd.f32 %v117_v37, %v112_v42  ;;  %v2940_v42 = vrot.slane %v2918_v23, %v2859_v12 }
  0x9f   :  { %2655 = vtanh.f32 %v119_v43 }
  0xa8   :  { %v2654_v44 = vpop.eup %2653 }
  0xa9   :  { %130 = vrot.lane.b32.xlu1 %v2654_v44, %s2775_s1  ;;  %v122_v46 = vadd.f32 1.0, %v2654_v44 }
  0xab   :  { %v124_v47 = vmul.f32 0.5, %v122_v46 }
  0xac   :  { %v2656_v45 = vpop.eup %2655 }
  0xad   :  { %132 = vrot.lane.b32.xlu1 %v2656_v45, %s2775_s1  ;;  %v123_v48 = vadd.f32 1.0, %v2656_v45  ;;  %v126_v54 = vmul.f32 0.0, %v124_v47 }
  0xaf   :  { %v125_v51 = vmul.f32 0.5, %v123_v48 }
  0xb1   :  { %v127_v57 = vmul.f32 0.0, %v125_v51 }
 0x11b   :  { %v131_v49 = vpop.permute.xlu1 %130 }
 0x11c   :  { %v136_v50 = vmul.f32 %v131_v49, %v124_v47 }
 0x11e   :  { %140 = vrot.lane.b32.xlu0 %v136_v50, %s2776_s2 }
 0x11f   :  { %v133_v52 = vpop.permute.xlu1 %132 }
 0x120   :  { %v137_v53 = vmul.f32 %v133_v52, %v125_v51 }
 0x122   :  { %142 = vrot.lane.b32.xlu1 %v137_v53, %s2776_s2 }
 0x190   :  { %v141_v55 = vpop.permute.xlu0 %140 }
 0x191   :  { %v2895_v56 = vadd.f32 %v141_v55, %v126_v54 }
 0x193   :  { %2657 = vtanh.f32 %v2895_v56 }
 0x194   :  { %v143_v58 = vpop.permute.xlu1 %142 }
 0x195   :  { %v2898_v59 = vadd.f32 %v143_v58, %v127_v57 }
 0x197   :  { %2659 = vtanh.f32 %v2898_v59 }
 0x1a0   :  { %v2658_v61 = vpop.eup %2657 }
 0x1a1   :  { %152 = vrot.lane.b32.xlu0 %v2658_v61, %s2778_s13  ;;  %v2958_v61 = vrot.slane %v2918_v23, %v2866_v18 }
 0x1a4   :  { %v2660_v62 = vpop.eup %2659 }
 0x1a5   :  { %154 = vrot.lane.b32.xlu1 %v2660_v62, %s2778_s13 }
 0x213   :  { %v153_v63 = vpop.permute.xlu0 %152 }
 0x214   :  { %v158_v0 = vmul.f32 %v153_v63, %v124_v47 }
 0x216   :  { %162 = vperm.xlu0 %2530, %v158_v0  }
 0x217   :  { %v155_v1 = vpop.permute.xlu1 %154 }
 0x218   :  { %v159_v2 = vmul.f32 %v155_v1, %v125_v51  ;;  %v2950_v51 = vld [vmem:[%s3730_s6] ss:$0 sm:$0xff] }
 0x21a   :  { %167 = vperm.xlu1 %2531, %v159_v2   ;;  %2533 = vset.pattern.permute.xlu0 %v3742_v3 }
 0x21b   :  { %188 = vperm.xlu0 %2533, %v159_v2  }
 0x21e   :  { %2532 = vset.pattern.permute.xlu1 %v3742_v3 }
 0x21f   :  { %184 = vperm.xlu1 %2532, %v158_v0   ;;  %2535 = vset.pattern.permute.xlu0 %v3740_v6 }
 0x220   :  { %224 = vperm.xlu0 %2535, %v158_v0  }
 0x223   :  { %2534 = vset.pattern.permute.xlu1 %v3738_v10 }
 0x224   :  { %204 = vperm.xlu1 %2534, %v158_v0   ;;  %2538 = vset.pattern.permute.xlu0 %v3734_v13 }
 0x225   :  { %248 = vperm.xlu0 %2538, %v159_v2  }
 0x228   :  { %208 = vperm.xlu1 %2534, %v159_v2  }
 0x229   :  { %2541 = vset.pattern.permute.xlu0 %v3732_v60 }
 0x22c   :  { %2536 = vset.pattern.permute.xlu1 %v3740_v6 }
 0x22d   :  { %228 = vperm.xlu1 %2536, %v159_v2  }
 0x231   :  { %2537 = vset.pattern.permute.xlu1 %v3734_v13 }
 0x232   :  { %244 = vperm.xlu1 %2537, %v158_v0  }
 0x236   :  { %2539 = vset.pattern.permute.xlu1 %v3736_v14 }
 0x237   :  { %264 = vperm.xlu1 %2539, %v158_v0  }
 0x23b   :  { %268 = vperm.xlu1 %2539, %v159_v2  }
 0x23f   :  { %2540 = vset.pattern.permute.xlu1 %v3732_v60 }
 0x291   :  { %v163_v20 = vpop.permute.xlu0 %162 }
 0x292   :  { %v379_v26 = vmul.f32 %v163_v20, %v2847_v8  ;;  %v174_v45 = vmul.f32 %v2922_v25, %v163_v20 }
 0x294   :  { %v383_v36 = vrot.slane %v379_v26, 7 }
 0x295   :  { %v168_v15 = vpop.permute.xlu1 %167 }
 0x296   :  { %v189_v29 = vpop.permute.xlu0 %188  ;;  %v175_v30 = vmul.f32 %v2922_v25, %v168_v15  ;;  %v380_v33 = vmul.f32 %v168_v15, %v2847_v8  ;;  %v387_v49 = vadd.f32 %v383_v36, %v2868_v19 }
 0x297   :  { %v390_v41 = vmul.f32 %v189_v29, %v2856_v11  ;;  %v196_v46 = vmul.f32 %v2929_v34, %v189_v29 }
 0x298   :  { %v178_v37 = vrot.slane %v175_v30, 7  ;;  %v384_v40 = vrot.slane %v380_v33, 7 }
 0x299   :  { %v394_v58 = vrot.slane %v390_v41, 7  ;;  %v199_v63 = vrot.slane %v196_v46, 7 }
 0x29a   :  { %v185_v16 = vpop.permute.xlu1 %184  ;;  %v180_v52 = vsel %vm179_vm0, %v178_v37, %v174_v45  ;;  %v388_v57 = vadd.f32 %v384_v40, %v2882_v28 }
 0x29b   :  { %v389_v35 = vmul.f32 %v185_v16, %v2856_v11  ;;  %v225_v43 = vpop.permute.xlu0 %224  ;;  %v195_v53 = vmul.f32 %v2929_v34, %v185_v16  ;;  %v182_v16 = vadd.f32 %v2950_v51, %v180_v52 }
 0x29c   :  { %v409_v1 = vmul.f32 %v225_v43, %v2872_v21  ;;  %v398_v36 = vadd.f32 %v394_v58, %v388_v57  ;;  %v235_v37 = vmul.f32 %v2940_v42, %v225_v43  ;;  %v42_v43 = vld [vmem:[%s3729_s5] sm:$0x3f] }
 0x29d   :  { %v393_v47 = vrot.slane %v389_v35, 7  ;;  %v200_v30 = vsel %vm179_vm0, %v199_v63, %v195_v53 }
 0x29e   :  { %v413_v40 = vrot.slane %v409_v1, 7  ;;  %v202_v46 = vadd.f32 %v200_v30, %v182_v16  ;;  %v2987_v30 = vrot.slane %v42_v43, %v2844_v7  ;;  %v2997_v7 = vrot.slane %v42_v43, %v2859_v12 }
 0x29f   :  { %v205_v24 = vpop.permute.xlu1 %204  ;;  %v397_v0 = vadd.f32 %v393_v47, %v387_v49 }
 0x2a0   :  { %v399_v39 = vmul.f32 %v205_v24, %v2863_v17  ;;  %v249_v20 = vpop.permute.xlu0 %248 }
 0x2a1   :  { %v256_v41 = vmul.f32 %v2958_v61, %v249_v20  ;;  %v420_v47 = vmul.f32 %v249_v20, %v2880_v27 }
 0x2a2   :  { %v403_v54 = vrot.slane %v399_v39, 7 }
 0x2a3   :  { %v209_v32 = vpop.permute.xlu1 %208  ;;  %v259_v57 = vrot.slane %v256_v41, 7 }
 0x2a4   :  { %v216_v48 = vmul.f32 %v2934_v38, %v209_v32  ;;  %v400_v50 = vmul.f32 %v209_v32, %v2863_v17  ;;  %v215_v32 = vmul.f32 %v2934_v38, %v205_v24  ;;  %v407_v33 = vadd.f32 %v403_v54, %v397_v0 }
 0x2a5   :  { %v424_v0 = vrot.slane %v420_v47, 7  ;;  %v3001_v47 = vrot.slane %v42_v43, %v2866_v18 }
 0x2a6   :  { %v219_v2 = vrot.slane %v216_v48, 7  ;;  %v404_v26 = vrot.slane %v400_v50, 7  ;;  %v417_v52 = vadd.f32 %v413_v40, %v407_v33 }
 0x2a8   :  { %v229_v44 = vpop.permute.xlu1 %228  ;;  %v408_v48 = vadd.f32 %v404_v26, %v398_v36 }
 0x2a9   :  { %v236_v55 = vmul.f32 %v2940_v42, %v229_v44  ;;  %v410_v62 = vmul.f32 %v229_v44, %v2872_v21  ;;  %v220_v44 = vsel %vm179_vm0, %v219_v2, %v215_v32  ;;  %v2981_v2 = vrot.slane %v42_v43, %v2838_v5 }
 0x2aa   :  { %v222_v54 = vadd.f32 %v220_v44, %v202_v46  ;;  %v293_v44 = vmul.f32 0.0, %v2987_v30 }
 0x2ab   :  { %v239_v35 = vrot.slane %v236_v55, 7  ;;  %v414_v39 = vrot.slane %v410_v62, 7  ;;  %v2978_v62 = vrot.slane %v2918_v23, %v2875_v22 }
 0x2ad   :  { %v245_v15 = vpop.permute.xlu1 %244  ;;  %v240_v50 = vsel %vm179_vm0, %v239_v35, %v235_v37  ;;  %v418_v55 = vadd.f32 %v414_v39, %v408_v48  ;;  %v287_v37 = vmul.f32 0.0, %v2981_v2  ;;  %v2992_v39 = vrot.slane %v42_v43, %v2850_v9 }
 0x2ae   :  { %v419_v29 = vmul.f32 %v245_v15, %v2880_v27  ;;  %v255_v24 = vmul.f32 %v2958_v61, %v245_v15  ;;  %v242_v1 = vadd.f32 %v240_v50, %v222_v54  ;;  %v3005_v9 = vrot.slane %v42_v43, %v2875_v22 }
 0x2af   :  { %v428_v32 = vadd.f32 %v424_v0, %v418_v55  ;;  %v299_v46 = vmul.f32 0.0, %v2992_v39 }
 0x2b0   :  { %v423_v45 = vrot.slane %v419_v29, 7  ;;  %v260_v16 = vsel %vm179_vm0, %v259_v57, %v255_v24  ;;  %v311_v24 = vmul.f32 0.0, %v3001_v47  ;;  %v317_v12 = vmul.f32 0.0, %v3005_v9 }
 0x2b1   :  { %v262_v36 = vadd.f32 %v260_v16, %v242_v1 }
 0x2b2   :  { %v265_v49 = vpop.permute.xlu1 %264  ;;  %v427_v58 = vadd.f32 %v423_v45, %v417_v52 }
 0x2b3   :  { %v429_v53 = vmul.f32 %v265_v49, %v2886_v31  ;;  %v275_v23 = vmul.f32 %v2978_v62, %v265_v49  ;;  %v305_v49 = vmul.f32 0.0, %v2997_v7 }
 0x2b5   :  { %v433_v63 = vrot.slane %v429_v53, 7 }
 0x2b6   :  { %v269_v15 = vpop.permute.xlu1 %268 }
 0x2b7   :  { %v437_v20 = vadd.f32 %v433_v63, %v427_v58  ;;  %v276_v26 = vmul.f32 %v2978_v62, %v269_v15  ;;  %v430_v29 = vmul.f32 %v269_v15, %v2886_v31 }
 0x2b9   :  { %2661 = vtanh.f32 %v437_v20  ;;  %v279_v33 = vrot.slane %v276_v26, 7  ;;  %v434_v35 = vrot.slane %v430_v29, 7 }
 0x2bb   :  { %v280_v40 = vsel %vm179_vm0, %v279_v33, %v275_v23  ;;  %v438_v41 = vadd.f32 %v434_v35, %v428_v32  ;;  %v447_v33 = vrot.slane %v2895_v56, 7 }
 0x2bc   :  { %v282_v45 = vadd.f32 %v280_v40, %v262_v36 }
 0x2bd   :  { %2663 = vtanh.f32 %v438_v41 }
 0x2be   :  { %v288_v48 = vadd.f32 %v287_v37, %v282_v45  ;;  %v448_v37 = vrot.slane %v2898_v59, 7 }
 0x2c0   :  { %v294_v50 = vadd.f32 %v293_v44, %v288_v48 }
 0x2c2   :  { %v300_v52 = vadd.f32 %v299_v46, %v294_v50 }
 0x2c4   :  { %v306_v53 = vadd.f32 %v305_v49, %v300_v52 }
 0x2c6   :  { %v2662_v54 = vpop.eup %2661  ;;  %v312_v55 = vadd.f32 %v311_v24, %v306_v53 }
 0x2c7   :  { %455 = vrot.lane.b32.xlu0 %v2662_v54, %s2775_s1  ;;  %v441_v22 = vadd.f32 1.0, %v2662_v54 }
 0x2c8   :  { %v318_v57 = vadd.f32 %v317_v12, %v312_v55 }
 0x2c9   :  { %v443_v43 = vmul.f32 0.5, %v441_v22 }
 0x2ca   :  { %v2664_v18 = vpop.eup %2663  ;;  %2665 = vtanh.f32 %v318_v57 }
 0x2cb   :  { %457 = vrot.lane.b32.xlu1 %v2664_v18, %s2775_s1  ;;  %v442_v63 = vadd.f32 1.0, %v2664_v18  ;;  %v451_v35 = vmul.f32 %v447_v33, %v443_v43 }
 0x2cd   :  { %v444_v15 = vmul.f32 0.5, %v442_v63 }
 0x2cf   :  { %v452_v41 = vmul.f32 %v448_v37, %v444_v15 }
 0x2d7   :  { %v2666_v58 = vpop.eup %2665 }
 0x2d8   :  { %324 = vrot.lane.b32.xlu0 %v2666_v58, %s2775_s1  ;;  %v320_v26 = vadd.f32 1.0, %v2666_v58 }
 0x2da   :  { %v321_v29 = vmul.f32 0.5, %v320_v26 }
 0x2dc   :  { %v322_v48 = vmul.f32 0.0, %v321_v29 }
 0x339   :  { %v456_v0 = vpop.permute.xlu0 %455 }
 0x33a   :  { %v461_v1 = vmul.f32 %v456_v0, %v443_v43 }
 0x33c   :  { %465 = vrot.lane.b32.xlu1 %v461_v1, %s2776_s2 }
 0x33d   :  { %v458_v16 = vpop.permute.xlu1 %457 }
 0x33e   :  { %v462_v20 = vmul.f32 %v458_v16, %v444_v15 }
 0x340   :  { %467 = vrot.lane.b32.xlu0 %v462_v20, %s2776_s2 }
 0x34a   :  { %v325_v32 = vpop.permute.xlu0 %324 }
 0x34b   :  { %v327_v23 = vmul.f32 %v325_v32, %v321_v29 }
 0x34d   :  { %329 = vrot.lane.b32.xlu1 %v327_v23, %s2776_s2 }
 0x3ae   :  { %v466_v36 = vpop.permute.xlu1 %465 }
 0x3af   :  { %v3017_v40 = vadd.f32 %v466_v36, %v451_v35 }
 0x3b1   :  { %2667 = vtanh.f32 %v3017_v40 }
 0x3b2   :  { %v468_v44 = vpop.permute.xlu0 %467 }
 0x3b3   :  { %v3020_v45 = vadd.f32 %v468_v44, %v452_v41 }
 0x3b5   :  { %2669 = vtanh.f32 %v3020_v45 }
 0x3be   :  { %v2668_v46 = vpop.eup %2667 }
 0x3bf   :  { %477 = vrot.lane.b32.xlu0 %v2668_v46, %s2778_s13  ;;  %v330_v49 = vpop.permute.xlu1 %329 }
 0x3c0   :  { %v3024_v56 = vadd.f32 %v330_v49, %v322_v48 }
 0x3c2   :  { %v2670_v50 = vpop.eup %2669  ;;  %2671 = vtanh.f32 %v3024_v56 }
 0x3c3   :  { %479 = vrot.lane.b32.xlu1 %v2670_v50, %s2778_s13 }
 0x3cf   :  { %v2672_v59 = vpop.eup %2671 }
 0x3d0   :  { %335 = vrot.lane.b32.xlu0 %v2672_v59, %s2778_s13 }
 0x431   :  { %v478_v24 = vpop.permute.xlu0 %477 }
 0x432   :  { %v483_v52 = vmul.f32 %v478_v24, %v443_v43 }
 0x434   :  { %487 = vperm.xlu1 %2540, %v483_v52  }
 0x435   :  { %v480_v12 = vpop.permute.xlu1 %479 }
 0x436   :  { %v484_v53 = vmul.f32 %v480_v12, %v444_v15 }
 0x438   :  { %492 = vperm.xlu0 %2541, %v484_v53   ;;  %2542 = vset.pattern.permute.xlu1 %v3742_v3 }
 0x439   :  { %504 = vperm.xlu1 %2542, %v483_v52  }
 0x43c   :  { %2543 = vset.pattern.permute.xlu0 %v3738_v10 }
 0x43d   :  { %520 = vperm.xlu0 %2543, %v483_v52   ;;  %508 = vperm.xlu1 %2542, %v484_v53  }
 0x441   :  { %2546 = vset.pattern.permute.xlu0 %v3740_v6  ;;  %2544 = vset.pattern.permute.xlu1 %v3738_v10 }
 0x442   :  { %540 = vperm.xlu0 %2546, %v484_v53   ;;  %524 = vperm.xlu1 %2544, %v484_v53   ;;  %v336_v54 = vpop.permute.xlu0 %335 }
 0x443   :  { %v3035_v55 = vmul.f32 %v336_v54, %v321_v29 }
 0x445   :  { %3751 = vst [vmem:[#allocation6_spill] sm:$0xff] %v3035_v55 }
 0x446   :  { %2548 = vset.pattern.permute.xlu0 %v3736_v14  ;;  %2545 = vset.pattern.permute.xlu1 %v3740_v6 }
 0x447   :  { %568 = vperm.xlu0 %2548, %v483_v52   ;;  %536 = vperm.xlu1 %2545, %v483_v52  }
 0x44b   :  { %2551 = vset.pattern.permute.xlu0 %v3742_v3  ;;  %2547 = vset.pattern.permute.xlu1 %v3734_v13 }
 0x44c   :  { %552 = vperm.xlu1 %2547, %v483_v52   ;;  %590 = vperm.xlu0 %2551, %v3035_v55  }
 0x450   :  { %556 = vperm.xlu1 %2547, %v484_v53   ;;  %2554 = vset.pattern.permute.xlu0 %v3734_v13 }
 0x451   :  { %608 = vperm.xlu0 %2554, %v3035_v55  }
 0x454   :  { %2549 = vset.pattern.permute.xlu1 %v3736_v14 }
 0x455   :  { %572 = vperm.xlu1 %2549, %v484_v53   ;;  %2556 = vset.pattern.permute.xlu0 %v3732_v60 }
 0x459   :  { %2550 = vset.pattern.permute.xlu1 %v3732_v60 }
 0x45a   :  { %584 = vperm.xlu1 %2550, %v3035_v55  }
 0x45e   :  { %2552 = vset.pattern.permute.xlu1 %v3738_v10 }
 0x45f   :  { %596 = vperm.xlu1 %2552, %v3035_v55  }
 0x463   :  { %2553 = vset.pattern.permute.xlu1 %v3740_v6 }
 0x464   :  { %602 = vperm.xlu1 %2553, %v3035_v55  }
 0x468   :  { %2555 = vset.pattern.permute.xlu1 %v3736_v14 }
 0x469   :  { %614 = vperm.xlu1 %2555, %v3035_v55  }
 0x46d   :  { %2557 = vset.pattern.permute.xlu1 %v3732_v60 }
 0x4af   :  { %v488_v57 = vpop.permute.xlu1 %487 }
 0x4b0   :  { %v678_v63 = vmul.f32 %v488_v57, %v2847_v8  ;;  %v495_v20 = vmul.f32 %v488_v57, %v2922_v25 }
 0x4b2   :  { %v682_v26 = vrot.slane %v678_v63, 7  ;;  %v499_v41 = vrot.slane %v495_v20, 1 }
 0x4b3   :  { %v493_v18 = vpop.permute.xlu0 %492 }
 0x4b4   :  { %v505_v58 = vpop.permute.xlu1 %504  ;;  %v679_v15 = vmul.f32 %v493_v18, %v2847_v8  ;;  %v496_v32 = vmul.f32 %v493_v18, %v2922_v25  ;;  %v686_v44 = vadd.f32 %v682_v26, %v2868_v19 }
 0x4b5   :  { %v688_v1 = vmul.f32 %v505_v58, %v2856_v11  ;;  %v511_v49 = vmul.f32 %v505_v58, %v2929_v34 }
 0x4b6   :  { %v683_v36 = vrot.slane %v679_v15, 7  ;;  %v500_v59 = vsel %vm179_vm0, %v496_v32, %v499_v41 }
 0x4b7   :  { %v692_v23 = vrot.slane %v688_v1, 7  ;;  %v502_v26 = vadd.f32 %v2950_v51, %v500_v59 }
 0x4b8   :  { %v509_v22 = vpop.permute.xlu1 %508  ;;  %v521_v43 = vpop.permute.xlu0 %520  ;;  %v687_v53 = vadd.f32 %v683_v36, %v2882_v28 }
 0x4b9   :  { %v698_v29 = vmul.f32 %v521_v43, %v2863_v17  ;;  %v689_v33 = vmul.f32 %v509_v22, %v2856_v11  ;;  %v696_v24 = vadd.f32 %v692_v23, %v686_v44  ;;  %v512_v54 = vmul.f32 %v509_v22, %v2929_v34 }
 0x4ba   :  { %v527_v57 = vmul.f32 %v521_v43, %v2934_v38 }
 0x4bb   :  { %v702_v46 = vrot.slane %v698_v29, 7  ;;  %v693_v52 = vrot.slane %v689_v33, 7  ;;  %v515_v29 = vrot.slane %v511_v49, 1 }
 0x4bd   :  { %v525_v0 = vpop.permute.xlu1 %524  ;;  %v541_v16 = vpop.permute.xlu0 %540  ;;  %v706_v1 = vadd.f32 %v702_v46, %v696_v24  ;;  %v697_v23 = vadd.f32 %v693_v52, %v687_v53  ;;  %v516_v43 = vsel %vm179_vm0, %v512_v54, %v515_v29 }
 0x4be   :  { %v699_v48 = vmul.f32 %v525_v0, %v2863_v17  ;;  %v528_v32 = vmul.f32 %v525_v0, %v2934_v38  ;;  %v709_v33 = vmul.f32 %v541_v16, %v2872_v21  ;;  %v544_v0 = vmul.f32 %v541_v16, %v2940_v42 }
 0x4bf   :  { %v518_v53 = vadd.f32 %v516_v43, %v502_v26 }
 0x4c0   :  { %v703_v15 = vrot.slane %v699_v48, 7  ;;  %v713_v54 = vrot.slane %v709_v33, 7 }
 0x4c2   :  { %v537_v35 = vpop.permute.xlu1 %536  ;;  %v569_v50 = vpop.permute.xlu0 %568  ;;  %v707_v46 = vadd.f32 %v703_v15, %v697_v23 }
 0x4c3   :  { %v708_v37 = vmul.f32 %v537_v35, %v2872_v21  ;;  %v543_v18 = vmul.f32 %v537_v35, %v2940_v42  ;;  %v728_v20 = vmul.f32 %v569_v50, %v2886_v31  ;;  %v531_v35 = vrot.slane %v527_v57, 1 }
 0x4c4   :  { %v575_v52 = vmul.f32 %v569_v50, %v2978_v62 }
 0x4c5   :  { %v712_v12 = vrot.slane %v708_v37, 7  ;;  %v547_v37 = vrot.slane %v543_v18, 1  ;;  %v732_v48 = vrot.slane %v728_v20, 7  ;;  %v532_v49 = vsel %vm179_vm0, %v528_v32, %v531_v35 }
 0x4c6   :  { %v534_v15 = vadd.f32 %v532_v49, %v518_v53  ;;  %v717_v20 = vadd.f32 %v713_v54, %v707_v46  ;;  %v579_v29 = vrot.slane %v575_v52, 1 }
 0x4c7   :  { %v553_v63 = vpop.permute.xlu1 %552  ;;  %v716_v22 = vadd.f32 %v712_v12, %v706_v1  ;;  %v548_v18 = vsel %vm179_vm0, %v544_v0, %v547_v37 }
 0x4c8   :  { %v718_v58 = vmul.f32 %v553_v63, %v2880_v27  ;;  %v559_v41 = vmul.f32 %v553_v63, %v2958_v61  ;;  %v550_v23 = vadd.f32 %v548_v18, %v534_v15 }
 0x4ca   :  { %v722_v36 = vrot.slane %v718_v58, 7  ;;  %v563_v63 = vrot.slane %v559_v41, 1 }
 0x4cb   :  { %v557_v44 = vpop.permute.xlu1 %556 }
 0x4cc   :  { %v726_v24 = vadd.f32 %v722_v36, %v716_v22  ;;  %v719_v59 = vmul.f32 %v557_v44, %v2880_v27  ;;  %v560_v12 = vmul.f32 %v557_v44, %v2958_v61  ;;  %v591_v44 = vpop.permute.xlu0 %590 }
 0x4ce   :  { %v736_v57 = vadd.f32 %v732_v48, %v726_v24  ;;  %v723_v1 = vrot.slane %v719_v59, 7  ;;  %v564_v32 = vsel %vm179_vm0, %v560_v12, %v563_v63  ;;  %v593_v48 = vmul.f32 %v591_v44, %v2987_v30 }
 0x4cf   :  { %v566_v36 = vadd.f32 %v564_v32, %v550_v23  ;;  %v746_v44 = vrot.slane %v3017_v40, 7 }
 0x4d0   :  { %2673 = vtanh.f32 %v736_v57  ;;  %v573_v58 = vpop.permute.xlu1 %572  ;;  %v727_v22 = vadd.f32 %v723_v1, %v717_v20  ;;  %v609_v52 = vpop.permute.xlu0 %608 }
 0x4d1   :  { %v576_v16 = vmul.f32 %v573_v58, %v2978_v62  ;;  %v729_v50 = vmul.f32 %v573_v58, %v2886_v31  ;;  %v611_v57 = vmul.f32 %v609_v52, %v3001_v47 }
 0x4d3   :  { %v733_v26 = vrot.slane %v729_v50, 7  ;;  %v580_v33 = vsel %vm179_vm0, %v576_v16, %v579_v29 }
 0x4d4   :  { %v582_v37 = vadd.f32 %v580_v33, %v566_v36 }
 0x4d5   :  { %v737_v43 = vadd.f32 %v733_v26, %v727_v22  ;;  %v585_v35 = vpop.permute.xlu1 %584 }
 0x4d6   :  { %v587_v41 = vmul.f32 %v585_v35, %v2981_v2 }
 0x4d7   :  { %2675 = vtanh.f32 %v737_v43 }
 0x4d8   :  { %v588_v46 = vadd.f32 %v587_v41, %v582_v37 }
 0x4da   :  { %v597_v24 = vpop.permute.xlu1 %596  ;;  %v594_v59 = vadd.f32 %v593_v48, %v588_v46 }
 0x4db   :  { %v599_v49 = vmul.f32 %v597_v24, %v2992_v39 }
 0x4dd   :  { %v2674_v0 = vpop.eup %2673  ;;  %v600_v53 = vadd.f32 %v599_v49, %v594_v59  ;;  %v747_v59 = vrot.slane %v3020_v45, 7 }
 0x4de   :  { %754 = vrot.lane.b32.xlu1 %v2674_v0, %s2775_s1  ;;  %v740_v32 = vadd.f32 1.0, %v2674_v0 }
 0x4df   :  { %v603_v12 = vpop.permute.xlu1 %602 }
 0x4e0   :  { %v605_v54 = vmul.f32 %v603_v12, %v2997_v7  ;;  %v742_v16 = vmul.f32 0.5, %v740_v32 }
 0x4e2   :  { %v606_v18 = vadd.f32 %v605_v54, %v600_v53  ;;  %v750_v46 = vmul.f32 %v746_v44, %v742_v16 }
 0x4e4   :  { %v2676_v63 = vpop.eup %2675  ;;  %v615_v1 = vpop.permute.xlu1 %614  ;;  %v612_v15 = vadd.f32 %v611_v57, %v606_v18 }
 0x4e5   :  { %v617_v20 = vmul.f32 %v615_v1, %v3005_v9  ;;  %756 = vrot.lane.b32.xlu0 %v2676_v63, %s2775_s1  ;;  %v741_v22 = vadd.f32 1.0, %v2676_v63 }
 0x4e7   :  { %v618_v58 = vadd.f32 %v617_v20, %v612_v15  ;;  %v743_v26 = vmul.f32 0.5, %v741_v22 }
 0x4e9   :  { %2677 = vtanh.f32 %v618_v58  ;;  %v751_v49 = vmul.f32 %v747_v59, %v743_v26 }
 0x4f6   :  { %v2678_v29 = vpop.eup %2677 }
 0x4f7   :  { %624 = vrot.lane.b32.xlu1 %v2678_v29, %s2775_s1  ;;  %v620_v43 = vadd.f32 1.0, %v2678_v29 }
 0x4f9   :  { %v621_v35 = vmul.f32 0.5, %v620_v43 }
 0x4fb   :  { %v622_v40 = vmul.f32 %v621_v35, %v3024_v56 }
 0x550   :  { %v755_v50 = vpop.permute.xlu1 %754 }
 0x551   :  { %v760_v23 = vmul.f32 %v755_v50, %v742_v16 }
 0x553   :  { %764 = vrot.lane.b32.xlu0 %v760_v23, %s2776_s2 }
 0x557   :  { %v757_v33 = vpop.permute.xlu0 %756 }
 0x558   :  { %v761_v36 = vmul.f32 %v757_v33, %v743_v26 }
 0x55a   :  { %766 = vrot.lane.b32.xlu1 %v761_v36, %s2776_s2 }
 0x569   :  { %v625_v37 = vpop.permute.xlu1 %624 }
 0x56a   :  { %v627_v41 = vmul.f32 %v625_v37, %v621_v35 }
 0x56c   :  { %629 = vrot.lane.b32.xlu0 %v627_v41, %s2776_s2 }
 0x5c5   :  { %v765_v48 = vpop.permute.xlu0 %764 }
 0x5c6   :  { %v3099_v24 = vadd.f32 %v765_v48, %v750_v46 }
 0x5c8   :  { %2679 = vtanh.f32 %v3099_v24 }
 0x5cc   :  { %v767_v0 = vpop.permute.xlu1 %766 }
 0x5cd   :  { %v3103_v52 = vadd.f32 %v767_v0, %v751_v49 }
 0x5cf   :  { %2681 = vtanh.f32 %v3103_v52 }
 0x5d5   :  { %v2680_v12 = vpop.eup %2679 }
 0x5d6   :  { %776 = vrot.lane.b32.xlu1 %v2680_v12, %s2778_s13 }
 0x5dc   :  { %v2682_v53 = vpop.eup %2681 }
 0x5dd   :  { %778 = vrot.lane.b32.xlu0 %v2682_v53, %s2778_s13 }
 0x5de   :  { %v630_v54 = vpop.permute.xlu0 %629 }
 0x5df   :  { %v3109_v57 = vadd.f32 %v630_v54, %v622_v40 }
 0x5e1   :  { %2683 = vtanh.f32 %v3109_v57 }
 0x5ee   :  { %v2684_v45 = vpop.eup %2683 }
 0x5ef   :  { %635 = vrot.lane.b32.xlu1 %v2684_v45, %s2778_s13 }
 0x648   :  { %v777_v18 = vpop.permute.xlu1 %776 }
 0x649   :  { %v782_v63 = vmul.f32 %v777_v18, %v742_v16 }
 0x64b   :  { %786 = vperm.xlu0 %2556, %v782_v63  }
 0x64f   :  { %v779_v1 = vpop.permute.xlu0 %778  ;;  %2559 = vset.pattern.permute.xlu0 %v3742_v3 }
 0x650   :  { %v783_v15 = vmul.f32 %v779_v1, %v743_v26 }
 0x652   :  { %808 = vperm.xlu0 %2559, %v783_v15   ;;  %791 = vperm.xlu1 %2557, %v783_v15  }
 0x656   :  { %2561 = vset.pattern.permute.xlu0 %v3740_v6  ;;  %2558 = vset.pattern.permute.xlu1 %v3742_v3 }
 0x657   :  { %838 = vperm.xlu0 %2561, %v782_v63   ;;  %804 = vperm.xlu1 %2558, %v782_v63  }
 0x65b   :  { %2564 = vset.pattern.permute.xlu0 %v3734_v13  ;;  %2560 = vset.pattern.permute.xlu1 %v3738_v10 }
 0x65c   :  { %859 = vperm.xlu0 %2564, %v783_v15   ;;  %821 = vperm.xlu1 %2560, %v782_v63  }
 0x660   :  { %825 = vperm.xlu1 %2560, %v783_v15   ;;  %2566 = vset.pattern.permute.xlu0 %v3732_v60 }
 0x661   :  { %v636_v56 = vpop.permute.xlu1 %635 }
 0x662   :  { %v3119_v20 = vmul.f32 %v636_v56, %v621_v35 }
 0x664   :  { %3752 = vst [vmem:[#allocation7_spill] sm:$0xff] %v3119_v20  ;;  %889 = vperm.xlu0 %2566, %v3119_v20   ;;  %2562 = vset.pattern.permute.xlu1 %v3740_v6 }
 0x665   :  { %842 = vperm.xlu1 %2562, %v783_v15  }
 0x668   :  { %2569 = vset.pattern.permute.xlu0 %v3740_v6 }
 0x669   :  { %907 = vperm.xlu0 %2569, %v3119_v20   ;;  %2563 = vset.pattern.permute.xlu1 %v3734_v13 }
 0x66a   :  { %855 = vperm.xlu1 %2563, %v782_v63  }
 0x66d   :  { %2573 = vset.pattern.permute.xlu0 %v3732_v60 }
 0x66e   :  { %2565 = vset.pattern.permute.xlu1 %v3736_v14 }
 0x66f   :  { %872 = vperm.xlu1 %2565, %v782_v63  }
 0x673   :  { %876 = vperm.xlu1 %2565, %v783_v15  }
 0x677   :  { %2567 = vset.pattern.permute.xlu1 %v3742_v3 }
 0x678   :  { %895 = vperm.xlu1 %2567, %v3119_v20  }
 0x67c   :  { %2568 = vset.pattern.permute.xlu1 %v3738_v10 }
 0x67d   :  { %901 = vperm.xlu1 %2568, %v3119_v20  }
 0x681   :  { %2570 = vset.pattern.permute.xlu1 %v3734_v13 }
 0x682   :  { %913 = vperm.xlu1 %2570, %v3119_v20  }
 0x686   :  { %2571 = vset.pattern.permute.xlu1 %v3736_v14 }
 0x687   :  { %919 = vperm.xlu1 %2571, %v3119_v20  }
 0x68b   :  { %2572 = vset.pattern.permute.xlu1 %v3732_v60 }
 0x6c6   :  { %v787_v32 = vpop.permute.xlu0 %786 }
 0x6c7   :  { %v983_v23 = vmul.f32 %v787_v32, %v2847_v8  ;;  %v794_v36 = vmul.f32 %v787_v32, %v2922_v25 }
 0x6c9   :  { %v987_v43 = vrot.slane %v983_v23, 7  ;;  %v798_v0 = vrot.slane %v794_v36, 2 }
 0x6cb   :  { %v991_v40 = vadd.f32 %v987_v43, %v2868_v19 }
 0x6cd   :  { %v792_v58 = vpop.permute.xlu1 %791  ;;  %v809_v50 = vpop.permute.xlu0 %808 }
 0x6ce   :  { %v984_v26 = vmul.f32 %v792_v58, %v2847_v8  ;;  %v795_v35 = vmul.f32 %v792_v58, %v2922_v25  ;;  %v812_v46 = vmul.f32 %v809_v50, %v2929_v34  ;;  %v994_v12 = vmul.f32 %v809_v50, %v2856_v11 }
 0x6d0   :  { %v988_v44 = vrot.slane %v984_v26, 7  ;;  %v799_v54 = vrot.slane %v795_v35, 1  ;;  %v816_v1 = vrot.slane %v812_v46, 1 }
 0x6d2   :  { %v805_v29 = vpop.permute.xlu1 %804  ;;  %v839_v37 = vpop.permute.xlu0 %838  ;;  %v992_v63 = vadd.f32 %v988_v44, %v2882_v28  ;;  %v800_v35 = vsel %vm179_vm0, %v799_v54, %v798_v0 }
 0x6d3   :  { %v993_v33 = vmul.f32 %v805_v29, %v2856_v11  ;;  %v811_v59 = vmul.f32 %v805_v29, %v2929_v34  ;;  %v1013_v15 = vmul.f32 %v839_v37, %v2872_v21  ;;  %v845_v36 = vmul.f32 %v839_v37, %v2940_v42 }
 0x6d4   :  { %v802_v37 = vadd.f32 %v2950_v51, %v800_v35 }
 0x6d5   :  { %v997_v49 = vrot.slane %v993_v33, 7  ;;  %v815_v58 = vrot.slane %v811_v59, 2  ;;  %v998_v33 = vrot.slane %v994_v12, 7 }
 0x6d7   :  { %v822_v16 = vpop.permute.xlu1 %821  ;;  %v1001_v29 = vadd.f32 %v997_v49, %v991_v40  ;;  %v860_v50 = vpop.permute.xlu0 %859  ;;  %v1002_v59 = vadd.f32 %v998_v33, %v992_v63  ;;  %v1017_v49 = vrot.slane %v1013_v15, 7 }
 0x6d8   :  { %v1003_v41 = vmul.f32 %v822_v16, %v2863_v17  ;;  %v828_v32 = vmul.f32 %v822_v16, %v2934_v38  ;;  %v863_v16 = vmul.f32 %v860_v50, %v2958_v61  ;;  %v1024_v14 = vmul.f32 %v860_v50, %v2880_v27 }
 0x6da   :  { %v1007_v45 = vrot.slane %v1003_v41, 7  ;;  %v832_v60 = vrot.slane %v828_v32, 2 }
 0x6db   :  { %v826_v22 = vpop.permute.xlu1 %825 }
 0x6dc   :  { %v1004_v53 = vmul.f32 %v826_v22, %v2863_v17  ;;  %v829_v18 = vmul.f32 %v826_v22, %v2934_v38  ;;  %v1011_v41 = vadd.f32 %v1007_v45, %v1001_v29 }
 0x6de   :  { %v1008_v43 = vrot.slane %v1004_v53, 7  ;;  %v833_v44 = vrot.slane %v829_v18, 1  ;;  %v849_v53 = vrot.slane %v845_v36, 2  ;;  %v1021_v63 = vadd.f32 %v1017_v49, %v1011_v41 }
 0x6e0   :  { %v843_v48 = vpop.permute.xlu1 %842  ;;  %v1012_v0 = vadd.f32 %v1008_v43, %v1002_v59  ;;  %v834_v45 = vsel %vm179_vm0, %v833_v44, %v832_v60  ;;  %v890_v44 = vpop.permute.xlu0 %889 }
 0x6e1   :  { %v1014_v56 = vmul.f32 %v843_v48, %v2872_v21  ;;  %v846_v23 = vmul.f32 %v843_v48, %v2940_v42  ;;  %v817_v48 = vsel %vm179_vm0, %v816_v1, %v815_v58 }
 0x6e2   :  { %v819_v29 = vadd.f32 %v817_v48, %v802_v37  ;;  %v892_v48 = vmul.f32 %v890_v44, %v2981_v2 }
 0x6e3   :  { %v1018_v40 = vrot.slane %v1014_v56, 7  ;;  %v850_v12 = vrot.slane %v846_v23, 1  ;;  %v867_v56 = vrot.slane %v863_v16, 1  ;;  %v1028_v23 = vrot.slane %v1024_v14, 7 }
 0x6e4   :  { %v836_v33 = vadd.f32 %v834_v45, %v819_v29 }
 0x6e5   :  { %v856_v26 = vpop.permute.xlu1 %855  ;;  %v851_v1 = vsel %vm179_vm0, %v850_v12, %v849_v53 }
 0x6e6   :  { %v1023_v22 = vmul.f32 %v856_v26, %v2880_v27  ;;  %v862_v46 = vmul.f32 %v856_v26, %v2958_v61  ;;  %v1022_v26 = vadd.f32 %v1018_v40, %v1012_v0  ;;  %v853_v35 = vadd.f32 %v851_v1, %v836_v33 }
 0x6e8   :  { %v1027_v13 = vrot.slane %v1023_v22, 7  ;;  %v866_v18 = vrot.slane %v862_v46, 2  ;;  %v1032_v41 = vadd.f32 %v1028_v23, %v1022_v26 }
 0x6ea   :  { %v873_v54 = vpop.permute.xlu1 %872  ;;  %v1031_v58 = vadd.f32 %v1027_v13, %v1021_v63  ;;  %v868_v36 = vsel %vm179_vm0, %v867_v56, %v866_v18  ;;  %v908_v18 = vpop.permute.xlu0 %907 }
 0x6eb   :  { %v1033_v15 = vmul.f32 %v873_v54, %v2886_v31  ;;  %v879_v32 = vmul.f32 %v873_v54, %v2978_v62  ;;  %v870_v49 = vadd.f32 %v868_v36, %v853_v35 }
 0x6ed   :  { %v1037_v51 = vrot.slane %v1033_v15, 7  ;;  %v883_v46 = vrot.slane %v879_v32, 2  ;;  %v910_v15 = vmul.f32 %v908_v18, %v2997_v7 }
 0x6ee   :  { %v877_v50 = vpop.permute.xlu1 %876 }
 0x6ef   :  { %v1041_v43 = vadd.f32 %v1037_v51, %v1031_v58  ;;  %v880_v60 = vmul.f32 %v877_v50, %v2978_v62  ;;  %v1034_v22 = vmul.f32 %v877_v50, %v2886_v31 }
 0x6f1   :  { %2685 = vtanh.f32 %v1041_v43  ;;  %v884_v59 = vrot.slane %v880_v60, 1  ;;  %v1038_v13 = vrot.slane %v1034_v22, 7 }
 0x6f3   :  { %v885_v16 = vsel %vm179_vm0, %v884_v59, %v883_v46  ;;  %v1042_v14 = vadd.f32 %v1038_v13, %v1032_v41  ;;  %v896_v40 = vpop.permute.xlu1 %895 }
 0x6f4   :  { %v887_v12 = vadd.f32 %v885_v16, %v870_v49  ;;  %v898_v53 = vmul.f32 %v896_v40, %v2987_v30 }
 0x6f5   :  { %2687 = vtanh.f32 %v1042_v14  ;;  %v1051_v14 = vrot.slane %v3099_v24, 7 }
 0x6f6   :  { %v893_v37 = vadd.f32 %v892_v48, %v887_v12  ;;  %v1052_v12 = vrot.slane %v3103_v52, 7 }
 0x6f8   :  { %v899_v0 = vadd.f32 %v898_v53, %v893_v37  ;;  %v902_v54 = vpop.permute.xlu1 %901 }
 0x6f9   :  { %v904_v45 = vmul.f32 %v902_v54, %v2992_v39 }
 0x6fb   :  { %v905_v63 = vadd.f32 %v904_v45, %v899_v0 }
 0x6fd   :  { %v914_v29 = vpop.permute.xlu1 %913  ;;  %v911_v26 = vadd.f32 %v910_v15, %v905_v63 }
 0x6fe   :  { %v2686_v56 = vpop.eup %2685  ;;  %v916_v1 = vmul.f32 %v914_v29, %v3001_v47 }
 0x6ff   :  { %1059 = vrot.lane.b32.xlu0 %v2686_v56, %s2775_s1  ;;  %v1045_v36 = vadd.f32 1.0, %v2686_v56 }
 0x700   :  { %v917_v51 = vadd.f32 %v916_v1, %v911_v26 }
 0x701   :  { %v1047_v43 = vmul.f32 0.5, %v1045_v36 }
 0x702   :  { %v2688_v58 = vpop.eup %2687  ;;  %v920_v32 = vpop.permute.xlu1 %919 }
 0x703   :  { %v922_v23 = vmul.f32 %v920_v32, %v3005_v9  ;;  %1061 = vrot.lane.b32.xlu1 %v2688_v58, %s2775_s1  ;;  %v1046_v60 = vadd.f32 1.0, %v2688_v58  ;;  %v1055_v40 = vmul.f32 %v1051_v14, %v1047_v43 }
 0x705   :  { %v923_v33 = vadd.f32 %v922_v23, %v917_v51  ;;  %v1048_v41 = vmul.f32 0.5, %v1046_v60  ;;  %v3755_v51 = vmov 22   ;;  %v3756_v23 = vmov 18  }
 0x707   :  { %2689 = vtanh.f32 %v923_v33  ;;  %v1056_v53 = vmul.f32 %v1052_v12, %v1048_v41 }
 0x714   :  { %v2690_v50 = vpop.eup %2689 }
 0x715   :  { %929 = vrot.lane.b32.xlu0 %v2690_v50, %s2775_s1  ;;  %v925_v59 = vadd.f32 1.0, %v2690_v50 }
 0x717   :  { %v926_v13 = vmul.f32 0.5, %v925_v59 }
 0x719   :  { %v927_v24 = vmul.f32 %v926_v13, %v3109_v57  ;;  %v3753_v57 = vmov 23  }
 0x771   :  { %v1060_v22 = vpop.permute.xlu0 %1059 }
 0x772   :  { %v1065_v35 = vmul.f32 %v1060_v22, %v1047_v43 }
 0x774   :  { %1069 = vrot.lane.b32.xlu1 %v1065_v35, %s2776_s2 }
 0x775   :  { %v1062_v44 = vpop.permute.xlu1 %1061 }
 0x776   :  { %v1066_v46 = vmul.f32 %v1062_v44, %v1048_v41 }
 0x778   :  { %1071 = vrot.lane.b32.xlu0 %v1066_v46, %s2776_s2 }
 0x787   :  { %v930_v49 = vpop.permute.xlu0 %929 }
 0x788   :  { %v932_v16 = vmul.f32 %v930_v49, %v926_v13 }
 0x78a   :  { %934 = vrot.lane.b32.xlu1 %v932_v16, %s2776_s2 }
 0x7e6   :  { %v1070_v48 = vpop.permute.xlu1 %1069 }
 0x7e7   :  { %v3184_v37 = vadd.f32 %v1070_v48, %v1055_v40 }
 0x7e9   :  { %2691 = vtanh.f32 %v3184_v37 }
 0x7ea   :  { %v1072_v0 = vpop.permute.xlu0 %1071 }
 0x7eb   :  { %v3187_v54 = vadd.f32 %v1072_v0, %v1056_v53 }
 0x7ed   :  { %2693 = vtanh.f32 %v3187_v54 }
 0x7f6   :  { %v2692_v45 = vpop.eup %2691 }
 0x7f7   :  { %1081 = vrot.lane.b32.xlu0 %v2692_v45, %s2778_s13 }
 0x7fa   :  { %v2694_v18 = vpop.eup %2693 }
 0x7fb   :  { %1083 = vrot.lane.b32.xlu1 %v2694_v18, %s2778_s13 }
 0x7fc   :  { %v935_v63 = vpop.permute.xlu1 %934 }
 0x7fd   :  { %v3193_v52 = vadd.f32 %v935_v63, %v927_v24 }
 0x7ff   :  { %2695 = vtanh.f32 %v3193_v52 }
 0x80c   :  { %v2696_v15 = vpop.eup %2695 }
 0x80d   :  { %940 = vrot.lane.b32.xlu0 %v2696_v15, %s2778_s13 }
 0x869   :  { %v1082_v29 = vpop.permute.xlu0 %1081 }
 0x86a   :  { %v1087_v56 = vmul.f32 %v1082_v29, %v1047_v43 }
 0x86c   :  { %1091 = vperm.xlu1 %2572, %v1087_v56  }
 0x86d   :  { %v1084_v26 = vpop.permute.xlu1 %1083 }
 0x86e   :  { %v1088_v1 = vmul.f32 %v1084_v26, %v1048_v41 }
 0x870   :  { %1096 = vperm.xlu0 %2573, %v1088_v1   ;;  %2574 = vset.pattern.permute.xlu1 %v3742_v3 }
 0x871   :  { %1109 = vperm.xlu1 %2574, %v1087_v56  }
 0x874   :  { %2575 = vset.pattern.permute.xlu0 %v3738_v10 }
 0x875   :  { %1126 = vperm.xlu0 %2575, %v1087_v56   ;;  %1113 = vperm.xlu1 %2574, %v1088_v1  }
 0x879   :  { %2578 = vset.pattern.permute.xlu0 %v3740_v6  ;;  %2576 = vset.pattern.permute.xlu1 %v3738_v10 }
 0x87a   :  { %1147 = vperm.xlu0 %2578, %v1088_v1   ;;  %1130 = vperm.xlu1 %2576, %v1088_v1  }
 0x87e   :  { %2580 = vset.pattern.permute.xlu0 %v3753_v57  ;;  %2577 = vset.pattern.permute.xlu1 %v3740_v6 }
 0x87f   :  { %1177 = vperm.xlu0 %2580, %v1087_v56   ;;  %1143 = vperm.xlu1 %2577, %v1087_v56   ;;  %v941_v58 = vpop.permute.xlu0 %940 }
 0x880   :  { %v3203_v32 = vmul.f32 %v941_v58, %v926_v13 }
 0x882   :  { %3754 = vst [vmem:[#allocation8_spill] sm:$0xff] %v3203_v32 }
 0x883   :  { %2583 = vset.pattern.permute.xlu0 %v3742_v3  ;;  %2579 = vset.pattern.permute.xlu1 %v3755_v51 }
 0x884   :  { %1160 = vperm.xlu1 %2579, %v1087_v56   ;;  %1200 = vperm.xlu0 %2583, %v3203_v32  }
 0x888   :  { %1164 = vperm.xlu1 %2579, %v1088_v1   ;;  %2586 = vset.pattern.permute.xlu0 %v3755_v51 }
 0x889   :  { %1218 = vperm.xlu0 %2586, %v3203_v32  }
 0x88c   :  { %2581 = vset.pattern.permute.xlu1 %v3753_v57 }
 0x88d   :  { %1181 = vperm.xlu1 %2581, %v1088_v1   ;;  %2588 = vset.pattern.permute.xlu0 %v3756_v23 }
 0x891   :  { %2582 = vset.pattern.permute.xlu1 %v3756_v23 }
 0x892   :  { %1194 = vperm.xlu1 %2582, %v3203_v32  }
 0x896   :  { %2584 = vset.pattern.permute.xlu1 %v3738_v10 }
 0x897   :  { %1206 = vperm.xlu1 %2584, %v3203_v32  }
 0x89b   :  { %2585 = vset.pattern.permute.xlu1 %v3740_v6 }
 0x89c   :  { %1212 = vperm.xlu1 %2585, %v3203_v32  }
 0x8a0   :  { %2587 = vset.pattern.permute.xlu1 %v3753_v57 }
 0x8a1   :  { %1224 = vperm.xlu1 %2587, %v3203_v32  }
 0x8a5   :  { %2589 = vset.pattern.permute.xlu1 %v3756_v23 }
 0x8e7   :  { %v1092_v33 = vpop.permute.xlu1 %1091 }
 0x8e8   :  { %v1288_v22 = vmul.f32 %v1092_v33, %v2847_v8  ;;  %v1099_v59 = vmul.f32 %v1092_v33, %v2922_v25 }
 0x8ea   :  { %v1292_v13 = vrot.slane %v1288_v22, 7  ;;  %v1103_v18 = vrot.slane %v1099_v59, 3 }
 0x8eb   :  { %v1097_v50 = vpop.permute.xlu0 %1096 }
 0x8ec   :  { %v1110_v36 = vpop.permute.xlu1 %1109  ;;  %v1100_v41 = vmul.f32 %v1097_v50, %v2922_v25  ;;  %v1289_v49 = vmul.f32 %v1097_v50, %v2847_v8  ;;  %v1296_v24 = vadd.f32 %v1292_v13, %v2868_v19 }
 0x8ed   :  { %v1298_v44 = vmul.f32 %v1110_v36, %v2856_v11  ;;  %v1116_v12 = vmul.f32 %v1110_v36, %v2929_v34 }
 0x8ee   :  { %v1104_v14 = vrot.slane %v1100_v41, 2  ;;  %v1293_v63 = vrot.slane %v1289_v49, 7 }
 0x8ef   :  { %v1302_v40 = vrot.slane %v1298_v44, 7  ;;  %v1120_v36 = vrot.slane %v1116_v12, 3 }
 0x8f0   :  { %v1114_v43 = vpop.permute.xlu1 %1113  ;;  %v1127_v60 = vpop.permute.xlu0 %1126  ;;  %v1105_v1 = vsel %vm179_vm0, %v1104_v14, %v1103_v18  ;;  %v1297_v59 = vadd.f32 %v1293_v63, %v2882_v28 }
 0x8f1   :  { %v1308_v16 = vmul.f32 %v1127_v60, %v2863_v17  ;;  %v1117_v53 = vmul.f32 %v1114_v43, %v2929_v34  ;;  %v1299_v0 = vmul.f32 %v1114_v43, %v2856_v11  ;;  %v1306_v58 = vadd.f32 %v1302_v40, %v1296_v24 }
 0x8f2   :  { %v1133_v33 = vmul.f32 %v1127_v60, %v2934_v38 }
 0x8f3   :  { %v1312_v15 = vrot.slane %v1308_v16, 7  ;;  %v1121_v43 = vrot.slane %v1117_v53, 2  ;;  %v1303_v22 = vrot.slane %v1299_v0, 7  ;;  %v3243_v16 = vld [vmem:[%s3730_s6] ss:$0 sm:$0xff] }
 0x8f4   :  { %v1107_v60 = vadd.f32 %v3243_v16, %v1105_v1 }
 0x8f5   :  { %v1131_v35 = vpop.permute.xlu1 %1130  ;;  %v1148_v46 = vpop.permute.xlu0 %1147  ;;  %v1316_v13 = vadd.f32 %v1312_v15, %v1306_v58  ;;  %v1122_v18 = vsel %vm179_vm0, %v1121_v43, %v1120_v36  ;;  %v1307_v24 = vadd.f32 %v1303_v22, %v1297_v59 }
 0x8f6   :  { %v1134_v29 = vmul.f32 %v1131_v35, %v2934_v38  ;;  %v1309_v56 = vmul.f32 %v1131_v35, %v2863_v17  ;;  %v1151_v12 = vmul.f32 %v1148_v46, %v2940_v42  ;;  %v1319_v53 = vmul.f32 %v1148_v46, %v2872_v21 }
 0x8f7   :  { %v1124_v46 = vadd.f32 %v1122_v18, %v1107_v60 }
 0x8f8   :  { %v1138_v14 = vrot.slane %v1134_v29, 2  ;;  %v1313_v40 = vrot.slane %v1309_v56, 7  ;;  %v1155_v3 = vrot.slane %v1151_v12, 2 }
 0x8fa   :  { %v1144_v48 = vpop.permute.xlu1 %1143  ;;  %v1178_v26 = vpop.permute.xlu0 %1177 }
 0x8fb   :  { %v1318_v45 = vmul.f32 %v1144_v48, %v2872_v21  ;;  %v1150_v41 = vmul.f32 %v1144_v48, %v2940_v42  ;;  %v1338_v49 = vmul.f32 %v1178_v26, %v2886_v31  ;;  %v1137_v48 = vrot.slane %v1133_v33, 3 }
 0x8fc   :  { %v1317_v33 = vadd.f32 %v1313_v40, %v1307_v24  ;;  %v1184_v43 = vmul.f32 %v1178_v26, %v2978_v62 }
 0x8fd   :  { %v1322_v50 = vrot.slane %v1318_v45, 7  ;;  %v1154_v63 = vrot.slane %v1150_v41, 3  ;;  %v1342_v10 = vrot.slane %v1338_v49, 7  ;;  %v1139_v56 = vsel %vm179_vm0, %v1138_v14, %v1137_v48 }
 0x8fe   :  { %v1188_v12 = vrot.slane %v1184_v43, 3 }
 0x8ff   :  { %v1161_v44 = vpop.permute.xlu1 %1160  ;;  %v1326_v0 = vadd.f32 %v1322_v50, %v1316_v13  ;;  %v1323_v50 = vrot.slane %v1319_v53, 7  ;;  %v1156_v36 = vsel %vm179_vm0, %v1155_v3, %v1154_v63  ;;  %v1201_v63 = vpop.permute.xlu0 %1200 }
 0x900   :  { %v1328_v35 = vmul.f32 %v1161_v44, %v2880_v27  ;;  %v1167_v15 = vmul.f32 %v1161_v44, %v2958_v61  ;;  %v1141_v44 = vadd.f32 %v1139_v56, %v1124_v46 }
 0x901   :  { %v1327_v49 = vadd.f32 %v1323_v50, %v1317_v33 }
 0x902   :  { %v1332_v45 = vrot.slane %v1328_v35, 7  ;;  %v1171_v22 = vrot.slane %v1167_v15, 3  ;;  %v1158_v60 = vadd.f32 %v1156_v36, %v1141_v44 }
 0x903   :  { %v1165_v58 = vpop.permute.xlu1 %1164 }
 0x904   :  { %v1336_v6 = vadd.f32 %v1332_v45, %v1326_v0  ;;  %v1168_v1 = vmul.f32 %v1165_v58, %v2958_v61  ;;  %v1329_v29 = vmul.f32 %v1165_v58, %v2880_v27  ;;  %v1203_v58 = vmul.f32 %v1201_v63, %v2987_v30  ;;  %v1219_v46 = vpop.permute.xlu0 %1218 }
 0x905   :  { %v1221_v36 = vmul.f32 %v1219_v46, %v3001_v47 }
 0x906   :  { %v1346_v13 = vadd.f32 %v1342_v10, %v1336_v6  ;;  %v1172_v35 = vrot.slane %v1168_v1, 2  ;;  %v1333_v41 = vrot.slane %v1329_v29, 7 }
 0x908   :  { %2697 = vtanh.f32 %v1346_v13  ;;  %v1182_v59 = vpop.permute.xlu1 %1181  ;;  %v1173_v0 = vsel %vm179_vm0, %v1172_v35, %v1171_v22  ;;  %v1337_v6 = vadd.f32 %v1333_v41, %v1327_v49 }
 0x909   :  { %v1185_v14 = vmul.f32 %v1182_v59, %v2978_v62  ;;  %v1339_v40 = vmul.f32 %v1182_v59, %v2886_v31  ;;  %v1175_v3 = vadd.f32 %v1173_v0, %v1158_v60 }
 0x90b   :  { %v1189_v10 = vrot.slane %v1185_v14, 2  ;;  %v1343_v48 = vrot.slane %v1339_v40, 7 }
 0x90d   :  { %v1347_v53 = vadd.f32 %v1343_v48, %v1337_v6  ;;  %v1195_v26 = vpop.permute.xlu1 %1194  ;;  %v1190_v45 = vsel %vm179_vm0, %v1189_v10, %v1188_v12 }
 0x90e   :  { %v1192_v18 = vadd.f32 %v1190_v45, %v1175_v3  ;;  %v1197_v24 = vmul.f32 %v1195_v26, %v2981_v2 }
 0x90f   :  { %2699 = vtanh.f32 %v1347_v53 }
 0x910   :  { %v1198_v15 = vadd.f32 %v1197_v24, %v1192_v18  ;;  %v1356_v24 = vrot.slane %v3184_v37, 7 }
 0x912   :  { %v1207_v1 = vpop.permute.xlu1 %1206  ;;  %v1204_v29 = vadd.f32 %v1203_v58, %v1198_v15 }
 0x913   :  { %v1209_v56 = vmul.f32 %v1207_v1, %v2992_v39  ;;  %v1357_v1 = vrot.slane %v3187_v54, 7 }
 0x915   :  { %v2698_v33 = vpop.eup %2697  ;;  %v1210_v13 = vadd.f32 %v1209_v56, %v1204_v29 }
 0x916   :  { %1364 = vrot.lane.b32.xlu1 %v2698_v33, %s2775_s1  ;;  %v1350_v14 = vadd.f32 1.0, %v2698_v33 }
 0x917   :  { %v1213_v50 = vpop.permute.xlu1 %1212 }
 0x918   :  { %v1215_v35 = vmul.f32 %v1213_v50, %v2997_v7  ;;  %v1352_v40 = vmul.f32 0.5, %v1350_v14 }
 0x91a   :  { %v1216_v43 = vadd.f32 %v1215_v35, %v1210_v13  ;;  %v1360_v63 = vmul.f32 %v1356_v24, %v1352_v40 }
 0x91c   :  { %v2700_v22 = vpop.eup %2699  ;;  %v1225_v41 = vpop.permute.xlu1 %1224  ;;  %v1222_v44 = vadd.f32 %v1221_v36, %v1216_v43 }
 0x91d   :  { %v1227_v59 = vmul.f32 %v1225_v41, %v3005_v9  ;;  %1366 = vrot.lane.b32.xlu0 %v2700_v22, %s2775_s1  ;;  %v1351_v6 = vadd.f32 1.0, %v2700_v22  ;;  %v3757_v41 = vmov 19  }
 0x91f   :  { %v1228_v49 = vadd.f32 %v1227_v59, %v1222_v44  ;;  %v1353_v10 = vmul.f32 0.5, %v1351_v6  ;;  %v3758_v59 = vmov 21  }
 0x921   :  { %2701 = vtanh.f32 %v1228_v49  ;;  %v1361_v29 = vmul.f32 %v1357_v1, %v1353_v10 }
 0x92e   :  { %v2702_v0 = vpop.eup %2701 }
 0x92f   :  { %1234 = vrot.lane.b32.xlu1 %v2702_v0, %s2775_s1  ;;  %v1230_v53 = vadd.f32 1.0, %v2702_v0 }
 0x931   :  { %v1231_v26 = vmul.f32 0.5, %v1230_v53 }
 0x933   :  { %v1232_v37 = vmul.f32 %v1231_v26, %v3193_v52  ;;  %v3759_v52 = vmov 20  }
 0x988   :  { %v1365_v60 = vpop.permute.xlu1 %1364 }
 0x989   :  { %v1370_v12 = vmul.f32 %v1365_v60, %v1352_v40 }
 0x98b   :  { %1374 = vrot.lane.b32.xlu0 %v1370_v12, %s2776_s2 }
 0x98f   :  { %v1367_v48 = vpop.permute.xlu0 %1366 }
 0x990   :  { %v1371_v3 = vmul.f32 %v1367_v48, %v1353_v10 }
 0x992   :  { %1376 = vrot.lane.b32.xlu1 %v1371_v3, %s2776_s2 }
 0x9a1   :  { %v1235_v45 = vpop.permute.xlu1 %1234 }
 0x9a2   :  { %v1237_v18 = vmul.f32 %v1235_v45, %v1231_v26 }
 0x9a4   :  { %1239 = vrot.lane.b32.xlu0 %v1237_v18, %s2776_s2 }
 0x9fd   :  { %v1375_v15 = vpop.permute.xlu0 %1374 }
 0x9fe   :  { %v3272_v58 = vadd.f32 %v1375_v15, %v1360_v63 }
 0xa00   :  { %2703 = vtanh.f32 %v3272_v58 }
 0xa04   :  { %v1377_v56 = vpop.permute.xlu1 %1376 }
 0xa05   :  { %v3276_v33 = vadd.f32 %v1377_v56, %v1361_v29 }
 0xa07   :  { %2705 = vtanh.f32 %v3276_v33 }
 0xa0d   :  { %v2704_v46 = vpop.eup %2703 }
 0xa0e   :  { %1386 = vrot.lane.b32.xlu1 %v2704_v46, %s2778_s13 }
 0xa14   :  { %v2706_v50 = vpop.eup %2705 }
 0xa15   :  { %1388 = vrot.lane.b32.xlu0 %v2706_v50, %s2778_s13 }
 0xa16   :  { %v1240_v13 = vpop.permute.xlu0 %1239 }
 0xa17   :  { %v3282_v35 = vadd.f32 %v1240_v13, %v1232_v37 }
 0xa19   :  { %2707 = vtanh.f32 %v3282_v35 }
 0xa26   :  { %v2708_v54 = vpop.eup %2707 }
 0xa27   :  { %1245 = vrot.lane.b32.xlu1 %v2708_v54, %s2778_s13 }
 0xa80   :  { %v1387_v36 = vpop.permute.xlu1 %1386 }
 0xa81   :  { %v1392_v43 = vmul.f32 %v1387_v36, %v1352_v40 }
 0xa83   :  { %1396 = vperm.xlu0 %2588, %v1392_v43  }
 0xa87   :  { %v1389_v22 = vpop.permute.xlu0 %1388  ;;  %2591 = vset.pattern.permute.xlu0 %v3757_v41 }
 0xa88   :  { %v1393_v44 = vmul.f32 %v1389_v22, %v1353_v10 }
 0xa8a   :  { %1418 = vperm.xlu0 %2591, %v1393_v44   ;;  %1401 = vperm.xlu1 %2589, %v1393_v44  }
 0xa8e   :  { %2593 = vset.pattern.permute.xlu0 %v3758_v59  ;;  %2590 = vset.pattern.permute.xlu1 %v3757_v41 }
 0xa8f   :  { %1448 = vperm.xlu0 %2593, %v1392_v43   ;;  %1414 = vperm.xlu1 %2590, %v1392_v43  }
 0xa93   :  { %2596 = vset.pattern.permute.xlu0 %v3755_v51  ;;  %2592 = vset.pattern.permute.xlu1 %v3759_v52 }
 0xa94   :  { %1469 = vperm.xlu0 %2596, %v1393_v44   ;;  %1431 = vperm.xlu1 %2592, %v1392_v43  }
 0xa98   :  { %1435 = vperm.xlu1 %2592, %v1393_v44   ;;  %2598 = vset.pattern.permute.xlu0 %v3756_v23 }
 0xa99   :  { %v1246_v49 = vpop.permute.xlu1 %1245 }
 0xa9a   :  { %v3292_v0 = vmul.f32 %v1246_v49, %v1231_v26 }
 0xa9c   :  { %3760 = vst [vmem:[#allocation9_spill] sm:$0xff] %v3292_v0  ;;  %1499 = vperm.xlu0 %2598, %v3292_v0   ;;  %2594 = vset.pattern.permute.xlu1 %v3758_v59 }
 0xa9d   :  { %1452 = vperm.xlu1 %2594, %v1393_v44  }
 0xaa0   :  { %2601 = vset.pattern.permute.xlu0 %v3758_v59 }
 0xaa1   :  { %1517 = vperm.xlu0 %2601, %v3292_v0   ;;  %2595 = vset.pattern.permute.xlu1 %v3755_v51 }
 0xaa2   :  { %1465 = vperm.xlu1 %2595, %v1392_v43  }
 0xaa5   :  { %2605 = vset.pattern.permute.xlu0 %v3756_v23 }
 0xaa6   :  { %2597 = vset.pattern.permute.xlu1 %v3753_v57 }
 0xaa7   :  { %1482 = vperm.xlu1 %2597, %v1392_v43  }
 0xaab   :  { %1486 = vperm.xlu1 %2597, %v1393_v44  }
 0xaaf   :  { %2599 = vset.pattern.permute.xlu1 %v3757_v41 }
 0xab0   :  { %1505 = vperm.xlu1 %2599, %v3292_v0  }
 0xab4   :  { %2600 = vset.pattern.permute.xlu1 %v3759_v52 }
 0xab5   :  { %1511 = vperm.xlu1 %2600, %v3292_v0  }
 0xab9   :  { %2602 = vset.pattern.permute.xlu1 %v3755_v51 }
 0xaba   :  { %1523 = vperm.xlu1 %2602, %v3292_v0  }
 0xabe   :  { %2603 = vset.pattern.permute.xlu1 %v3753_v57 }
 0xabf   :  { %1529 = vperm.xlu1 %2603, %v3292_v0  }
 0xac3   :  { %2604 = vset.pattern.permute.xlu1 %v3756_v23 }
 0xafe   :  { %v1397_v60 = vpop.permute.xlu0 %1396 }
 0xaff   :  { %v1593_v10 = vmul.f32 %v1397_v60, %v2847_v8  ;;  %v1404_v26 = vmul.f32 %v1397_v60, %v2922_v25 }
 0xb01   :  { %v1597_v45 = vrot.slane %v1593_v10, 7  ;;  %v1408_v50 = vrot.slane %v1404_v26, 4 }
 0xb03   :  { %v1601_v54 = vadd.f32 %v1597_v45, %v2868_v19 }
 0xb05   :  { %v1402_v14 = vpop.permute.xlu1 %1401  ;;  %v1419_v6 = vpop.permute.xlu0 %1418 }
 0xb06   :  { %v1594_v3 = vmul.f32 %v1402_v14, %v2847_v8  ;;  %v1405_v18 = vmul.f32 %v1402_v14, %v2922_v25  ;;  %v1422_v1 = vmul.f32 %v1419_v6, %v2929_v34  ;;  %v1604_v37 = vmul.f32 %v1419_v6, %v2856_v11 }
 0xb08   :  { %v1598_v15 = vrot.slane %v1594_v3, 7  ;;  %v1409_v36 = vrot.slane %v1405_v18, 3  ;;  %v1426_v49 = vrot.slane %v1422_v1, 3  ;;  %v1608_v45 = vrot.slane %v1604_v37, 7 }
 0xb0a   :  { %v1415_v40 = vpop.permute.xlu1 %1414  ;;  %v1449_v24 = vpop.permute.xlu0 %1448  ;;  %v1602_v44 = vadd.f32 %v1598_v15, %v2882_v28  ;;  %v1410_v15 = vsel %vm179_vm0, %v1409_v36, %v1408_v50 }
 0xb0b   :  { %v1603_v53 = vmul.f32 %v1415_v40, %v2856_v11  ;;  %v1421_v56 = vmul.f32 %v1415_v40, %v2929_v34  ;;  %v1623_v14 = vmul.f32 %v1449_v24, %v2872_v21  ;;  %v1455_v18 = vmul.f32 %v1449_v24, %v2940_v42 }
 0xb0c   :  { %v1412_v24 = vadd.f32 %v3243_v16, %v1410_v15 }
 0xb0d   :  { %v1607_v46 = vrot.slane %v1603_v53, 7  ;;  %v1425_v40 = vrot.slane %v1421_v56, 4  ;;  %v1612_v56 = vadd.f32 %v1608_v45, %v1602_v44 }
 0xb0f   :  { %v1432_v12 = vpop.permute.xlu1 %1431  ;;  %v1611_v10 = vadd.f32 %v1607_v46, %v1601_v54  ;;  %v1470_v6 = vpop.permute.xlu0 %1469  ;;  %v1627_v46 = vrot.slane %v1623_v14, 7 }
 0xb10   :  { %v1613_v63 = vmul.f32 %v1432_v12, %v2863_v17  ;;  %v1438_v3 = vmul.f32 %v1432_v12, %v2934_v38  ;;  %v1473_v12 = vmul.f32 %v1470_v6, %v2958_v61  ;;  %v1634_v55 = vmul.f32 %v1470_v6, %v2880_v27 }
 0xb12   :  { %v1617_v43 = vrot.slane %v1613_v63, 7  ;;  %v1442_v5 = vrot.slane %v1438_v3, 4  ;;  %v1638_v45 = vrot.slane %v1634_v55, 7 }
 0xb13   :  { %v1436_v48 = vpop.permute.xlu1 %1435 }
 0xb14   :  { %v1614_v13 = vmul.f32 %v1436_v48, %v2863_v17  ;;  %v1439_v22 = vmul.f32 %v1436_v48, %v2934_v38  ;;  %v1621_v1 = vadd.f32 %v1617_v43, %v1611_v10 }
 0xb16   :  { %v1618_v63 = vrot.slane %v1614_v13, 7  ;;  %v1443_v0 = vrot.slane %v1439_v22, 3  ;;  %v1459_v13 = vrot.slane %v1455_v18, 4  ;;  %v1631_v44 = vadd.f32 %v1627_v46, %v1621_v1 }
 0xb17   :  { %v1500_v1 = vpop.permute.xlu0 %1499 }
 0xb18   :  { %v1453_v29 = vpop.permute.xlu1 %1452  ;;  %v1622_v50 = vadd.f32 %v1618_v63, %v1612_v56  ;;  %v1444_v43 = vsel %vm179_vm0, %v1443_v0, %v1442_v5 }
 0xb19   :  { %v1624_v60 = vmul.f32 %v1453_v29, %v2872_v21  ;;  %v1456_v53 = vmul.f32 %v1453_v29, %v2940_v42  ;;  %v1427_v29 = vsel %vm179_vm0, %v1426_v49, %v1425_v40 }
 0xb1a   :  { %v1429_v10 = vadd.f32 %v1427_v29, %v1412_v24 }
 0xb1b   :  { %v1628_v54 = vrot.slane %v1624_v60, 7  ;;  %v1460_v37 = vrot.slane %v1456_v53, 3  ;;  %v1477_v60 = vrot.slane %v1473_v12, 3 }
 0xb1c   :  { %v1446_v18 = vadd.f32 %v1444_v43, %v1429_v10 }
 0xb1d   :  { %v1466_v26 = vpop.permute.xlu1 %1465  ;;  %v1461_v49 = vsel %vm179_vm0, %v1460_v37, %v1459_v13  ;;  %v1502_v37 = vmul.f32 %v1500_v1, %v2981_v2 }
 0xb1e   :  { %v1633_v48 = vmul.f32 %v1466_v26, %v2880_v27  ;;  %v1472_v32 = vmul.f32 %v1466_v26, %v2958_v61  ;;  %v1632_v26 = vadd.f32 %v1628_v54, %v1622_v50  ;;  %v1463_v0 = vadd.f32 %v1461_v49, %v1446_v18 }
 0xb20   :  { %v1637_v20 = vrot.slane %v1633_v48, 7  ;;  %v1476_v22 = vrot.slane %v1472_v32, 4  ;;  %v1642_v15 = vadd.f32 %v1638_v45, %v1632_v26 }
 0xb22   :  { %v1483_v36 = vpop.permute.xlu1 %1482  ;;  %v1641_v40 = vadd.f32 %v1637_v20, %v1631_v44  ;;  %v1478_v63 = vsel %vm179_vm0, %v1477_v60, %v1476_v22  ;;  %v1518_v44 = vpop.permute.xlu0 %1517 }
 0xb23   :  { %v1643_v14 = vmul.f32 %v1483_v36, %v2886_v31  ;;  %v1489_v3 = vmul.f32 %v1483_v36, %v2978_v62  ;;  %v1480_v12 = vadd.f32 %v1478_v63, %v1463_v0  ;;  %v1520_v10 = vmul.f32 %v1518_v44, %v2997_v7 }
 0xb25   :  { %v1647_v53 = vrot.slane %v1643_v14, 7  ;;  %v1493_v56 = vrot.slane %v1489_v3, 4 }
 0xb26   :  { %v1487_v6 = vpop.permute.xlu1 %1486 }
 0xb27   :  { %v1651_v48 = vadd.f32 %v1647_v53, %v1641_v40  ;;  %v1490_v5 = vmul.f32 %v1487_v6, %v2978_v62  ;;  %v1644_v32 = vmul.f32 %v1487_v6, %v2886_v31 }
 0xb29   :  { %2709 = vtanh.f32 %v1651_v48  ;;  %v1494_v46 = vrot.slane %v1490_v5, 3  ;;  %v1648_v20 = vrot.slane %v1644_v32, 7 }
 0xb2b   :  { %v1495_v54 = vsel %vm179_vm0, %v1494_v46, %v1493_v56  ;;  %v1652_v55 = vadd.f32 %v1648_v20, %v1642_v15  ;;  %v1506_v29 = vpop.permute.xlu1 %1505 }
 0xb2c   :  { %v1497_v24 = vadd.f32 %v1495_v54, %v1480_v12  ;;  %v1508_v50 = vmul.f32 %v1506_v29, %v2987_v30  ;;  %v1661_v29 = vrot.slane %v3272_v58, 7 }
 0xb2d   :  { %2711 = vtanh.f32 %v1652_v55 }
 0xb2e   :  { %v1503_v13 = vadd.f32 %v1502_v37, %v1497_v24 }
 0xb30   :  { %v1509_v36 = vadd.f32 %v1508_v50, %v1503_v13  ;;  %v1512_v43 = vpop.permute.xlu1 %1511  ;;  %v1662_v13 = vrot.slane %v3276_v33, 7 }
 0xb31   :  { %v1514_v22 = vmul.f32 %v1512_v43, %v2992_v39 }
 0xb33   :  { %v1515_v14 = vadd.f32 %v1514_v22, %v1509_v36 }
 0xb35   :  { %v1524_v60 = vpop.permute.xlu1 %1523  ;;  %v1521_v49 = vadd.f32 %v1520_v10, %v1515_v14 }
 0xb36   :  { %v2710_v26 = vpop.eup %2709  ;;  %v1526_v40 = vmul.f32 %v1524_v60, %v3001_v47 }
 0xb37   :  { %1669 = vrot.lane.b32.xlu0 %v2710_v26, %s2775_s1  ;;  %v1655_v48 = vadd.f32 1.0, %v2710_v26 }
 0xb38   :  { %v1527_v45 = vadd.f32 %v1526_v40, %v1521_v49 }
 0xb39   :  { %v1657_v5 = vmul.f32 0.5, %v1655_v48 }
 0xb3a   :  { %v2712_v3 = vpop.eup %2711  ;;  %v1530_v53 = vpop.permute.xlu1 %1529 }
 0xb3b   :  { %v1532_v18 = vmul.f32 %v1530_v53, %v3005_v9  ;;  %1671 = vrot.lane.b32.xlu1 %v2712_v3, %s2775_s1  ;;  %v1656_v32 = vadd.f32 1.0, %v2712_v3  ;;  %v1665_v37 = vmul.f32 %v1661_v29, %v1657_v5 }
 0xb3d   :  { %v1533_v6 = vadd.f32 %v1532_v18, %v1527_v45  ;;  %v1658_v1 = vmul.f32 0.5, %v1656_v32 }
 0xb3f   :  { %2713 = vtanh.f32 %v1533_v6  ;;  %v1666_v36 = vmul.f32 %v1662_v13, %v1658_v1 }
 0xb4c   :  { %v2714_v63 = vpop.eup %2713 }
 0xb4d   :  { %1539 = vrot.lane.b32.xlu0 %v2714_v63, %s2775_s1  ;;  %v1535_v20 = vadd.f32 1.0, %v2714_v63 }
 0xb4f   :  { %v1536_v12 = vmul.f32 0.5, %v1535_v20 }
 0xb51   :  { %v1537_v58 = vmul.f32 %v1536_v12, %v3282_v35 }
 0xba9   :  { %v1670_v0 = vpop.permute.xlu0 %1669 }
 0xbaa   :  { %v1675_v15 = vmul.f32 %v1670_v0, %v1657_v5 }
 0xbac   :  { %1679 = vrot.lane.b32.xlu1 %v1675_v15, %s2776_s2 }
 0xbad   :  { %v1672_v56 = vpop.permute.xlu1 %1671 }
 0xbae   :  { %v1676_v46 = vmul.f32 %v1672_v56, %v1658_v1 }
 0xbb0   :  { %1681 = vrot.lane.b32.xlu0 %v1676_v46, %s2776_s2 }
 0xbbf   :  { %v1540_v54 = vpop.permute.xlu0 %1539 }
 0xbc0   :  { %v1542_v55 = vmul.f32 %v1540_v54, %v1536_v12 }
 0xbc2   :  { %1544 = vrot.lane.b32.xlu1 %v1542_v55, %s2776_s2 }
 0xc1e   :  { %v1680_v24 = vpop.permute.xlu1 %1679 }
 0xc1f   :  { %v3357_v50 = vadd.f32 %v1680_v24, %v1665_v37 }
 0xc21   :  { %2715 = vtanh.f32 %v3357_v50 }
 0xc22   :  { %v1682_v43 = vpop.permute.xlu0 %1681 }
 0xc23   :  { %v3360_v22 = vadd.f32 %v1682_v43, %v1666_v36 }
 0xc25   :  { %2717 = vtanh.f32 %v3360_v22 }
 0xc2e   :  { %v2716_v44 = vpop.eup %2715 }
 0xc2f   :  { %1691 = vrot.lane.b32.xlu0 %v2716_v44, %s2778_s13 }
 0xc32   :  { %v2718_v14 = vpop.eup %2717 }
 0xc33   :  { %1693 = vrot.lane.b32.xlu1 %v2718_v14, %s2778_s13 }
 0xc34   :  { %v1545_v10 = vpop.permute.xlu1 %1544 }
 0xc35   :  { %v3366_v33 = vadd.f32 %v1545_v10, %v1537_v58 }
 0xc37   :  { %2719 = vtanh.f32 %v3366_v33 }
 0xc44   :  { %v2720_v60 = vpop.eup %2719 }
 0xc45   :  { %1550 = vrot.lane.b32.xlu0 %v2720_v60, %s2778_s13 }
 0xca1   :  { %v1692_v26 = vpop.permute.xlu0 %1691 }
 0xca2   :  { %v1697_v49 = vmul.f32 %v1692_v26, %v1657_v5 }
 0xca4   :  { %1701 = vperm.xlu1 %2604, %v1697_v49  }
 0xca5   :  { %v1694_v40 = vpop.permute.xlu1 %1693 }
 0xca6   :  { %v1698_v3 = vmul.f32 %v1694_v40, %v1658_v1 }
 0xca8   :  { %1706 = vperm.xlu0 %2605, %v1698_v3   ;;  %2606 = vset.pattern.permute.xlu1 %v3757_v41 }
 0xca9   :  { %1719 = vperm.xlu1 %2606, %v1697_v49  }
 0xcac   :  { %2607 = vset.pattern.permute.xlu0 %v3759_v52 }
 0xcad   :  { %1736 = vperm.xlu0 %2607, %v1697_v49   ;;  %1723 = vperm.xlu1 %2606, %v1698_v3  }
 0xcb1   :  { %2610 = vset.pattern.permute.xlu0 %v3758_v59  ;;  %2608 = vset.pattern.permute.xlu1 %v3759_v52 }
 0xcb2   :  { %1757 = vperm.xlu0 %2610, %v1698_v3   ;;  %1740 = vperm.xlu1 %2608, %v1698_v3  }
 0xcb6   :  { %2612 = vset.pattern.permute.xlu0 %v3753_v57  ;;  %2609 = vset.pattern.permute.xlu1 %v3758_v59 }
 0xcb7   :  { %1787 = vperm.xlu0 %2612, %v1697_v49   ;;  %1753 = vperm.xlu1 %2609, %v1697_v49   ;;  %v1551_v35 = vpop.permute.xlu0 %1550 }
 0xcb8   :  { %v3376_v53 = vmul.f32 %v1551_v35, %v1536_v12 }
 0xcbb   :  { %2615 = vset.pattern.permute.xlu0 %v3757_v41  ;;  %2611 = vset.pattern.permute.xlu1 %v3755_v51 }
 0xcbc   :  { %1770 = vperm.xlu1 %2611, %v1697_v49   ;;  %1810 = vperm.xlu0 %2615, %v3376_v53  }
 0xcc0   :  { %1774 = vperm.xlu1 %2611, %v1698_v3   ;;  %2618 = vset.pattern.permute.xlu0 %v3755_v51 }
 0xcc1   :  { %1828 = vperm.xlu0 %2618, %v3376_v53  }
 0xcc4   :  { %2613 = vset.pattern.permute.xlu1 %v3753_v57 }
 0xcc5   :  { %1791 = vperm.xlu1 %2613, %v1698_v3   ;;  %2620 = vset.pattern.permute.xlu0 %v3756_v23 }
 0xcc9   :  { %2614 = vset.pattern.permute.xlu1 %v3756_v23 }
 0xcca   :  { %1804 = vperm.xlu1 %2614, %v3376_v53  }
 0xcce   :  { %2616 = vset.pattern.permute.xlu1 %v3759_v52 }
 0xccf   :  { %1816 = vperm.xlu1 %2616, %v3376_v53  }
 0xcd3   :  { %2617 = vset.pattern.permute.xlu1 %v3758_v59 }
 0xcd4   :  { %1822 = vperm.xlu1 %2617, %v3376_v53  }
 0xcd8   :  { %2619 = vset.pattern.permute.xlu1 %v3753_v57 }
 0xcd9   :  { %1834 = vperm.xlu1 %2619, %v3376_v53  }
 0xcdd   :  { %2621 = vset.pattern.permute.xlu1 %v3756_v23 }
 0xd1f   :  { %v1702_v45 = vpop.permute.xlu1 %1701 }
 0xd20   :  { %v1898_v5 = vmul.f32 %v1702_v45, %v2847_v8  ;;  %v1709_v56 = vmul.f32 %v1702_v45, %v2922_v25 }
 0xd22   :  { %v1902_v46 = vrot.slane %v1898_v5, 7  ;;  %v1713_v43 = vrot.slane %v1709_v56, 5 }
 0xd23   :  { %v1707_v18 = vpop.permute.xlu0 %1706 }
 0xd24   :  { %v1720_v6 = vpop.permute.xlu1 %1719  ;;  %v1710_v0 = vmul.f32 %v1707_v18, %v2922_v25  ;;  %v1899_v20 = vmul.f32 %v1707_v18, %v2847_v8  ;;  %v1906_v44 = vadd.f32 %v1902_v46, %v2868_v19 }
 0xd25   :  { %v1908_v15 = vmul.f32 %v1720_v6, %v2856_v11  ;;  %v1726_v37 = vmul.f32 %v1720_v6, %v2929_v34 }
 0xd26   :  { %v1714_v54 = vrot.slane %v1710_v0, 4  ;;  %v1903_v14 = vrot.slane %v1899_v20, 7 }
 0xd27   :  { %v1912_v55 = vrot.slane %v1908_v15, 7  ;;  %v1730_v45 = vrot.slane %v1726_v37, 5 }
 0xd28   :  { %v1724_v63 = vpop.permute.xlu1 %1723  ;;  %v1737_v48 = vpop.permute.xlu0 %1736  ;;  %v1715_v49 = vsel %vm179_vm0, %v1714_v54, %v1713_v43  ;;  %v1907_v0 = vadd.f32 %v1903_v14, %v2882_v28 }
 0xd29   :  { %v1918_v12 = vmul.f32 %v1737_v48, %v2863_v17  ;;  %v1727_v24 = vmul.f32 %v1724_v63, %v2929_v34  ;;  %v1909_v13 = vmul.f32 %v1724_v63, %v2856_v11  ;;  %v1916_v40 = vadd.f32 %v1912_v55, %v1906_v44 }
 0xd2a   :  { %v1743_v3 = vmul.f32 %v1737_v48, %v2934_v38  ;;  %v1717_v46 = vadd.f32 %v3243_v16, %v1715_v49 }
 0xd2b   :  { %v1922_v58 = vrot.slane %v1918_v12, 7  ;;  %v1731_v18 = vrot.slane %v1727_v24, 4  ;;  %v1913_v6 = vrot.slane %v1909_v13, 7 }
 0xd2c   :  { %v1747_v54 = vrot.slane %v1743_v3, 5 }
 0xd2d   :  { %v1741_v32 = vpop.permute.xlu1 %1740  ;;  %v1758_v1 = vpop.permute.xlu0 %1757  ;;  %v1926_v15 = vadd.f32 %v1922_v58, %v1916_v40  ;;  %v1917_v13 = vadd.f32 %v1913_v6, %v1907_v0 }
 0xd2e   :  { %v1744_v10 = vmul.f32 %v1741_v32, %v2934_v38  ;;  %v1919_v60 = vmul.f32 %v1741_v32, %v2863_v17  ;;  %v1761_v48 = vmul.f32 %v1758_v1, %v2940_v42  ;;  %v1929_v55 = vmul.f32 %v1758_v1, %v2872_v21 }
 0xd30   :  { %v1748_v20 = vrot.slane %v1744_v10, 4  ;;  %v1923_v12 = vrot.slane %v1919_v60, 7  ;;  %v1765_v40 = vrot.slane %v1761_v48, 4  ;;  %v1933_v3 = vrot.slane %v1929_v55, 7 }
 0xd32   :  { %v1754_v29 = vpop.permute.xlu1 %1753  ;;  %v1788_v26 = vpop.permute.xlu0 %1787  ;;  %v1749_v60 = vsel %vm179_vm0, %v1748_v20, %v1747_v54  ;;  %v1927_v49 = vadd.f32 %v1923_v12, %v1917_v13 }
 0xd33   :  { %v1928_v36 = vmul.f32 %v1754_v29, %v2872_v21  ;;  %v1760_v63 = vmul.f32 %v1754_v29, %v2940_v42  ;;  %v1948_v56 = vmul.f32 %v1788_v26, %v2886_v31  ;;  %v1732_v29 = vsel %vm179_vm0, %v1731_v18, %v1730_v45 }
 0xd34   :  { %v1734_v1 = vadd.f32 %v1732_v29, %v1717_v46  ;;  %v1794_v18 = vmul.f32 %v1788_v26, %v2978_v62 }
 0xd35   :  { %v1932_v35 = vrot.slane %v1928_v36, 7  ;;  %v1764_v36 = vrot.slane %v1760_v63, 5  ;;  %v1952_v14 = vrot.slane %v1948_v56, 7  ;;  %v1937_v56 = vadd.f32 %v1933_v3, %v1927_v49 }
 0xd36   :  { %v1798_v48 = vrot.slane %v1794_v18, 5 }
 0xd37   :  { %v1771_v5 = vpop.permute.xlu1 %1770  ;;  %v1936_v37 = vadd.f32 %v1932_v35, %v1926_v15  ;;  %v1766_v45 = vsel %vm179_vm0, %v1765_v40, %v1764_v36 }
 0xd38   :  { %v1938_v32 = vmul.f32 %v1771_v5, %v2880_v27  ;;  %v1777_v43 = vmul.f32 %v1771_v5, %v2958_v61  ;;  %v1751_v5 = vadd.f32 %v1749_v60, %v1734_v1 }
 0xd3a   :  { %v1942_v24 = vrot.slane %v1938_v32, 7  ;;  %v1781_v6 = vrot.slane %v1777_v43, 5  ;;  %v1768_v46 = vadd.f32 %v1766_v45, %v1751_v5 }
 0xd3b   :  { %v1775_v44 = vpop.permute.xlu1 %1774 }
 0xd3c   :  { %v1946_v58 = vadd.f32 %v1942_v24, %v1936_v37  ;;  %v1778_v16 = vmul.f32 %v1775_v44, %v2958_v61  ;;  %v1939_v10 = vmul.f32 %v1775_v44, %v2880_v27  ;;  %v1811_v44 = vpop.permute.xlu0 %1810 }
 0xd3e   :  { %v1956_v35 = vadd.f32 %v1952_v14, %v1946_v58  ;;  %v1782_v15 = vrot.slane %v1778_v16, 4  ;;  %v1943_v63 = vrot.slane %v1939_v10, 7  ;;  %v1813_v58 = vmul.f32 %v1811_v44, %v2987_v30 }
 0xd40   :  { %2721 = vtanh.f32 %v1956_v35  ;;  %v1792_v0 = vpop.permute.xlu1 %1791  ;;  %v1783_v32 = vsel %vm179_vm0, %v1782_v15, %v1781_v6  ;;  %v1947_v54 = vadd.f32 %v1943_v63, %v1937_v56  ;;  %v1829_v40 = vpop.permute.xlu0 %1828 }
 0xd41   :  { %v1795_v20 = vmul.f32 %v1792_v0, %v2978_v62  ;;  %v1949_v12 = vmul.f32 %v1792_v0, %v2886_v31  ;;  %v1785_v24 = vadd.f32 %v1783_v32, %v1768_v46  ;;  %v1831_v15 = vmul.f32 %v1829_v40, %v3001_v47 }
 0xd43   :  { %v1799_v55 = vrot.slane %v1795_v20, 4  ;;  %v1953_v37 = vrot.slane %v1949_v12, 7 }
 0xd45   :  { %v1957_v29 = vadd.f32 %v1953_v37, %v1947_v54  ;;  %v1805_v26 = vpop.permute.xlu1 %1804  ;;  %v1800_v13 = vsel %vm179_vm0, %v1799_v55, %v1798_v48 }
 0xd46   :  { %v1802_v36 = vadd.f32 %v1800_v13, %v1785_v24  ;;  %v1807_v43 = vmul.f32 %v1805_v26, %v2981_v2 }
 0xd47   :  { %2723 = vtanh.f32 %v1957_v29 }
 0xd48   :  { %v1808_v14 = vadd.f32 %v1807_v43, %v1802_v36  ;;  %v1966_v36 = vrot.slane %v3357_v50, 7 }
 0xd4a   :  { %v1817_v16 = vpop.permute.xlu1 %1816  ;;  %v1814_v10 = vadd.f32 %v1813_v58, %v1808_v14  ;;  %v1967_v58 = vrot.slane %v3360_v22, 7 }
 0xd4b   :  { %v1819_v60 = vmul.f32 %v1817_v16, %v2992_v39 }
 0xd4d   :  { %v2722_v49 = vpop.eup %2721  ;;  %v1820_v3 = vadd.f32 %v1819_v60, %v1814_v10 }
 0xd4e   :  { %1974 = vrot.lane.b32.xlu1 %v2722_v49, %s2775_s1  ;;  %v1960_v32 = vadd.f32 1.0, %v2722_v49 }
 0xd4f   :  { %v1823_v1 = vpop.permute.xlu1 %1822 }
 0xd50   :  { %v1825_v35 = vmul.f32 %v1823_v1, %v2997_v7  ;;  %v1962_v20 = vmul.f32 0.5, %v1960_v32 }
 0xd52   :  { %v1826_v45 = vadd.f32 %v1825_v35, %v1820_v3  ;;  %v1970_v43 = vmul.f32 %v1966_v36, %v1962_v20 }
 0xd54   :  { %v2724_v18 = vpop.eup %2723  ;;  %v1835_v6 = vpop.permute.xlu1 %1834  ;;  %v1832_v63 = vadd.f32 %v1831_v15, %v1826_v45 }
 0xd55   :  { %v1837_v5 = vmul.f32 %v1835_v6, %v3005_v9  ;;  %1976 = vrot.lane.b32.xlu0 %v2724_v18, %s2775_s1  ;;  %v1961_v48 = vadd.f32 1.0, %v2724_v18 }
 0xd57   :  { %v1838_v0 = vadd.f32 %v1837_v5, %v1832_v63  ;;  %v1963_v54 = vmul.f32 0.5, %v1961_v48 }
 0xd59   :  { %2725 = vtanh.f32 %v1838_v0  ;;  %v1971_v16 = vmul.f32 %v1967_v58, %v1963_v54 }
 0xd66   :  { %v2726_v56 = vpop.eup %2725 }
 0xd67   :  { %1844 = vrot.lane.b32.xlu1 %v2726_v56, %s2775_s1  ;;  %v1840_v24 = vadd.f32 1.0, %v2726_v56 }
 0xd69   :  { %v1841_v29 = vmul.f32 0.5, %v1840_v24 }
 0xd6b   :  { %v1842_v50 = vmul.f32 %v1841_v29, %v3366_v33 }
 0xdc0   :  { %v1975_v12 = vpop.permute.xlu1 %1974 }
 0xdc1   :  { %v1980_v46 = vmul.f32 %v1975_v12, %v1962_v20 }
 0xdc3   :  { %1984 = vrot.lane.b32.xlu0 %v1980_v46, %s2776_s2 }
 0xdc7   :  { %v1977_v55 = vpop.permute.xlu0 %1976 }
 0xdc8   :  { %v1981_v37 = vmul.f32 %v1977_v55, %v1963_v54 }
 0xdca   :  { %1986 = vrot.lane.b32.xlu1 %v1981_v37, %s2776_s2 }
 0xdd9   :  { %v1845_v26 = vpop.permute.xlu1 %1844 }
 0xdda   :  { %v1847_v13 = vmul.f32 %v1845_v26, %v1841_v29 }
 0xddc   :  { %1849 = vrot.lane.b32.xlu0 %v1847_v13, %s2776_s2 }
 0xe35   :  { %v1985_v44 = vpop.permute.xlu0 %1984 }
 0xe36   :  { %v3440_v14 = vadd.f32 %v1985_v44, %v1970_v43 }
 0xe38   :  { %2727 = vtanh.f32 %v3440_v14 }
 0xe3c   :  { %v1987_v10 = vpop.permute.xlu1 %1986 }
 0xe3d   :  { %v3444_v60 = vadd.f32 %v1987_v10, %v1971_v16 }
 0xe3f   :  { %2729 = vtanh.f32 %v3444_v60 }
 0xe45   :  { %v2728_v49 = vpop.eup %2727 }
 0xe46   :  { %1996 = vrot.lane.b32.xlu1 %v2728_v49, %s2778_s13 }
 0xe4c   :  { %v2730_v40 = vpop.eup %2729 }
 0xe4d   :  { %1998 = vrot.lane.b32.xlu0 %v2730_v40, %s2778_s13 }
 0xe4e   :  { %v1850_v1 = vpop.permute.xlu0 %1849 }
 0xe4f   :  { %v3450_v3 = vadd.f32 %v1850_v1, %v1842_v50 }
 0xe51   :  { %2731 = vtanh.f32 %v3450_v3 }
 0xe5e   :  { %v2732_v22 = vpop.eup %2731 }
 0xe5f   :  { %1855 = vrot.lane.b32.xlu1 %v2732_v22, %s2778_s13 }
 0xeb8   :  { %v1997_v35 = vpop.permute.xlu1 %1996 }
 0xeb9   :  { %v2002_v15 = vmul.f32 %v1997_v35, %v1962_v20 }
 0xebb   :  { %2006 = vperm.xlu0 %2620, %v2002_v15  }
 0xebf   :  { %v1999_v45 = vpop.permute.xlu0 %1998  ;;  %2623 = vset.pattern.permute.xlu0 %v3757_v41 }
 0xec0   :  { %v2003_v18 = vmul.f32 %v1999_v45, %v1963_v54 }
 0xec2   :  { %2028 = vperm.xlu0 %2623, %v2003_v18   ;;  %2011 = vperm.xlu1 %2621, %v2003_v18  }
 0xec6   :  { %2625 = vset.pattern.permute.xlu0 %v3758_v59  ;;  %2622 = vset.pattern.permute.xlu1 %v3757_v41 }
 0xec7   :  { %2058 = vperm.xlu0 %2625, %v2002_v15   ;;  %2024 = vperm.xlu1 %2622, %v2002_v15  }
 0xecb   :  { %2628 = vset.pattern.permute.xlu0 %v3755_v51  ;;  %2624 = vset.pattern.permute.xlu1 %v3759_v52 }
 0xecc   :  { %2079 = vperm.xlu0 %2628, %v2003_v18   ;;  %2041 = vperm.xlu1 %2624, %v2002_v15  }
 0xed0   :  { %2045 = vperm.xlu1 %2624, %v2003_v18   ;;  %2630 = vset.pattern.permute.xlu0 %v3756_v23 }
 0xed1   :  { %v1856_v33 = vpop.permute.xlu1 %1855 }
 0xed2   :  { %v3460_v6 = vmul.f32 %v1856_v33, %v1841_v29 }
 0xed4   :  { %2109 = vperm.xlu0 %2630, %v3460_v6   ;;  %2626 = vset.pattern.permute.xlu1 %v3758_v59 }
 0xed5   :  { %2062 = vperm.xlu1 %2626, %v2003_v18  }
 0xed8   :  { %2633 = vset.pattern.permute.xlu0 %v3758_v59 }
 0xed9   :  { %2127 = vperm.xlu0 %2633, %v3460_v6   ;;  %2627 = vset.pattern.permute.xlu1 %v3755_v51 }
 0xeda   :  { %2075 = vperm.xlu1 %2627, %v2002_v15  }
 0xedd   :  { %2637 = vset.pattern.permute.xlu0 %v3756_v23 }
 0xede   :  { %2629 = vset.pattern.permute.xlu1 %v3753_v57 }
 0xedf   :  { %2092 = vperm.xlu1 %2629, %v2002_v15  }
 0xee3   :  { %2096 = vperm.xlu1 %2629, %v2003_v18  }
 0xee7   :  { %2631 = vset.pattern.permute.xlu1 %v3757_v41 }
 0xee8   :  { %2115 = vperm.xlu1 %2631, %v3460_v6  }
 0xeec   :  { %2632 = vset.pattern.permute.xlu1 %v3759_v52 }
 0xeed   :  { %2121 = vperm.xlu1 %2632, %v3460_v6  }
 0xef1   :  { %2634 = vset.pattern.permute.xlu1 %v3755_v51 }
 0xef2   :  { %2133 = vperm.xlu1 %2634, %v3460_v6  }
 0xef6   :  { %2635 = vset.pattern.permute.xlu1 %v3753_v57 }
 0xef7   :  { %2139 = vperm.xlu1 %2635, %v3460_v6  }
 0xefb   :  { %2636 = vset.pattern.permute.xlu1 %v3756_v23 }
 0xf36   :  { %v2007_v0 = vpop.permute.xlu0 %2006 }
 0xf37   :  { %v2203_v20 = vmul.f32 %v2007_v0, %v2847_v8  ;;  %v2014_v54 = vmul.f32 %v2007_v0, %v2922_v25 }
 0xf39   :  { %v2207_v55 = vrot.slane %v2203_v20, 7  ;;  %v2018_v58 = vrot.slane %v2014_v54, 6 }
 0xf3b   :  { %v2211_v10 = vadd.f32 %v2207_v55, %v2868_v19 }
 0xf3d   :  { %v2012_v63 = vpop.permute.xlu1 %2011  ;;  %v2029_v32 = vpop.permute.xlu0 %2028 }
 0xf3e   :  { %v2204_v46 = vmul.f32 %v2012_v63, %v2847_v8  ;;  %v2015_v37 = vmul.f32 %v2012_v63, %v2922_v25  ;;  %v2032_v13 = vmul.f32 %v2029_v32, %v2929_v34  ;;  %v2214_v8 = vmul.f32 %v2029_v32, %v2856_v11 }
 0xf40   :  { %v2208_v26 = vrot.slane %v2204_v46, 7  ;;  %v2019_v49 = vrot.slane %v2015_v37, 5  ;;  %v2036_v22 = vrot.slane %v2032_v13, 5  ;;  %v2218_v19 = vrot.slane %v2214_v8, 7 }
 0xf42   :  { %v2025_v5 = vpop.permute.xlu1 %2024  ;;  %v2059_v24 = vpop.permute.xlu0 %2058  ;;  %v2212_v1 = vadd.f32 %v2208_v26, %v2882_v28  ;;  %v2020_v28 = vsel %vm179_vm0, %v2019_v49, %v2018_v58 }
 0xf43   :  { %v2213_v48 = vmul.f32 %v2025_v5, %v2856_v11  ;;  %v2031_v43 = vmul.f32 %v2025_v5, %v2929_v34  ;;  %v2233_v35 = vmul.f32 %v2059_v24, %v2872_v21  ;;  %v2065_v5 = vmul.f32 %v2059_v24, %v2940_v42  ;;  %v3504_v24 = vld [vmem:[%s3730_s6] ss:$0 sm:$0xff]  ;;  %s2785_s6 = smov 110  }
 0xf44   :  { %v2222_v46 = vadd.f32 %v2218_v19, %v2212_v1  ;;  %v2022_v13 = vadd.f32 %v3504_v24, %v2020_v28 }
 0xf45   :  { %v2217_v44 = vrot.slane %v2213_v48, 7  ;;  %v2035_v45 = vrot.slane %v2031_v43, 6  ;;  %v2237_v48 = vrot.slane %v2233_v35, 7 }
 0xf47   :  { %v2042_v56 = vpop.permute.xlu1 %2041  ;;  %v2221_v18 = vadd.f32 %v2217_v44, %v2211_v10  ;;  %v2080_v11 = vpop.permute.xlu0 %2079  ;;  %v2037_v55 = vsel %vm179_vm0, %v2036_v22, %v2035_v45 }
 0xf48   :  { %v2223_v29 = vmul.f32 %v2042_v56, %v2863_v17  ;;  %v2048_v33 = vmul.f32 %v2042_v56, %v2934_v38  ;;  %v2083_v56 = vmul.f32 %v2080_v11, %v2958_v61  ;;  %v2244_v43 = vmul.f32 %v2080_v11, %v2880_v27 }
 0xf4a   :  { %v2227_v40 = vrot.slane %v2223_v29, 7  ;;  %v2052_v37 = vrot.slane %v2048_v33, 6 }
 0xf4b   :  { %v2046_v12 = vpop.permute.xlu1 %2045 }
 0xf4c   :  { %v2224_v16 = vmul.f32 %v2046_v12, %v2863_v17  ;;  %v2049_v50 = vmul.f32 %v2046_v12, %v2934_v38  ;;  %v2231_v20 = vadd.f32 %v2227_v40, %v2221_v18  ;;  %v2039_v40 = vadd.f32 %v2037_v55, %v2022_v13 }
 0xf4d   :  { %v2248_v18 = vrot.slane %v2244_v43, 7 }
 0xf4e   :  { %v2228_v0 = vrot.slane %v2224_v16, 7  ;;  %v2053_v12 = vrot.slane %v2049_v50, 5  ;;  %v2241_v10 = vadd.f32 %v2237_v48, %v2231_v20  ;;  %v2087_v50 = vrot.slane %v2083_v56, 5 }
 0xf50   :  { %v2063_v36 = vpop.permute.xlu1 %2062  ;;  %v2232_v44 = vadd.f32 %v2228_v0, %v2222_v46  ;;  %v2054_v8 = vsel %vm179_vm0, %v2053_v12, %v2052_v37 }
 0xf51   :  { %v2234_v15 = vmul.f32 %v2063_v36, %v2872_v21  ;;  %v2066_v17 = vmul.f32 %v2063_v36, %v2940_v42  ;;  %v2069_v36 = vrot.slane %v2065_v5, 6  ;;  %v2056_v33 = vadd.f32 %v2054_v8, %v2039_v40 }
 0xf53   :  { %v2238_v54 = vrot.slane %v2234_v15, 7  ;;  %v2070_v29 = vrot.slane %v2066_v17, 5 }
 0xf55   :  { %v2076_v63 = vpop.permute.xlu1 %2075  ;;  %v2242_v1 = vadd.f32 %v2238_v54, %v2232_v44  ;;  %v2071_v22 = vsel %vm179_vm0, %v2070_v29, %v2069_v36 }
 0xf56   :  { %v2243_v32 = vmul.f32 %v2076_v63, %v2880_v27  ;;  %v2082_v21 = vmul.f32 %v2076_v63, %v2958_v61  ;;  %v2073_v5 = vadd.f32 %v2071_v22, %v2056_v33 }
 0xf57   :  { %v2252_v0 = vadd.f32 %v2248_v18, %v2242_v1 }
 0xf58   :  { %v2247_v26 = vrot.slane %v2243_v32, 7  ;;  %v2086_v16 = vrot.slane %v2082_v21, 6  ;;  %v2110_v32 = vpop.permute.xlu0 %2109 }
 0xf59   :  { %v2112_v54 = vmul.f32 %v2110_v32, %v2981_v2 }
 0xf5a   :  { %v2093_v58 = vpop.permute.xlu1 %2092  ;;  %v2251_v35 = vadd.f32 %v2247_v26, %v2241_v10  ;;  %v2088_v11 = vsel %vm179_vm0, %v2087_v50, %v2086_v16 }
 0xf5b   :  { %v2253_v49 = vmul.f32 %v2093_v58, %v2886_v31  ;;  %v2099_v15 = vmul.f32 %v2093_v58, %v2978_v62  ;;  %v2090_v21 = vadd.f32 %v2088_v11, %v2073_v5 }
 0xf5c   :  { %v2128_v36 = vpop.permute.xlu0 %2127 }
 0xf5d   :  { %v2257_v45 = vrot.slane %v2253_v49, 7  ;;  %v2103_v28 = vrot.slane %v2099_v15, 6  ;;  %v2130_v44 = vmul.f32 %v2128_v36, %v2997_v7 }
 0xf5e   :  { %v2097_v27 = vpop.permute.xlu1 %2096 }
 0xf5f   :  { %v2261_v17 = vadd.f32 %v2257_v45, %v2251_v35  ;;  %v2100_v63 = vmul.f32 %v2097_v27, %v2978_v62  ;;  %v2254_v19 = vmul.f32 %v2097_v27, %v2886_v31 }
 0xf61   :  { %2733 = vtanh.f32 %v2261_v17  ;;  %v2104_v20 = vrot.slane %v2100_v63, 5  ;;  %v2258_v12 = vrot.slane %v2254_v19, 7 }
 0xf63   :  { %v2105_v46 = vsel %vm179_vm0, %v2104_v20, %v2103_v28  ;;  %v2262_v48 = vadd.f32 %v2258_v12, %v2252_v0  ;;  %v2116_v56 = vpop.permute.xlu1 %2115  ;;  %v2271_v28 = vrot.slane %v3440_v14, 7 }
 0xf64   :  { %v2107_v55 = vadd.f32 %v2105_v46, %v2090_v21  ;;  %v2118_v29 = vmul.f32 %v2116_v56, %v2987_v30  ;;  %v2272_v21 = vrot.slane %v3444_v60, 7 }
 0xf65   :  { %2735 = vtanh.f32 %v2262_v48 }
 0xf66   :  { %v2113_v37 = vadd.f32 %v2112_v54, %v2107_v55 }
 0xf68   :  { %v2119_v31 = vadd.f32 %v2118_v29, %v2113_v37  ;;  %v2122_v26 = vpop.permute.xlu1 %2121 }
 0xf69   :  { %v2124_v13 = vmul.f32 %v2122_v26, %v2992_v39 }
 0xf6b   :  { %v2125_v43 = vadd.f32 %v2124_v13, %v2119_v31 }
 0xf6d   :  { %v2134_v58 = vpop.permute.xlu1 %2133  ;;  %v2131_v16 = vadd.f32 %v2130_v44, %v2125_v43 }
 0xf6e   :  { %v2734_v8 = vpop.eup %2733  ;;  %v2136_v10 = vmul.f32 %v2134_v58, %v3001_v47 }
 0xf6f   :  { %2279 = vrot.lane.b32.xlu0 %v2734_v8, %s2775_s1  ;;  %v2265_v15 = vadd.f32 1.0, %v2734_v8 }
 0xf70   :  { %v2137_v50 = vadd.f32 %v2136_v10, %v2131_v16 }
 0xf71   :  { %v2267_v45 = vmul.f32 0.5, %v2265_v15 }
 0xf72   :  { %v2736_v49 = vpop.eup %2735  ;;  %v2140_v40 = vpop.permute.xlu1 %2139 }
 0xf73   :  { %v2142_v1 = vmul.f32 %v2140_v40, %v3005_v9  ;;  %2281 = vrot.lane.b32.xlu1 %v2736_v49, %s2775_s1  ;;  %v2266_v18 = vadd.f32 1.0, %v2736_v49  ;;  %v2275_v20 = vmul.f32 %v2271_v28, %v2267_v45 }
 0xf75   :  { %v2143_v22 = vadd.f32 %v2142_v1, %v2137_v50  ;;  %v2268_v11 = vmul.f32 0.5, %v2266_v18 }
 0xf77   :  { %2737 = vtanh.f32 %v2143_v22  ;;  %v2276_v48 = vmul.f32 %v2272_v21, %v2268_v11 }
 0xf84   :  { %v2738_v35 = vpop.eup %2737 }
 0xf85   :  { %2149 = vrot.lane.b32.xlu0 %v2738_v35, %s2775_s1  ;;  %v2145_v19 = vadd.f32 1.0, %v2738_v35 }
 0xf87   :  { %v2146_v5 = vmul.f32 0.5, %v2145_v19 }
 0xf89   :  { %v2147_v29 = vmul.f32 %v2146_v5, %v3450_v3 }
 0xfe1   :  { %v2280_v33 = vpop.permute.xlu0 %2279 }
 0xfe2   :  { %v2285_v27 = vmul.f32 %v2280_v33, %v2267_v45 }
 0xfe4   :  { %2289 = vrot.lane.b32.xlu1 %v2285_v27, %s2776_s2 }
 0xfe5   :  { %v2282_v17 = vpop.permute.xlu1 %2281 }
 0xfe6   :  { %v2286_v63 = vmul.f32 %v2282_v17, %v2268_v11 }
 0xfe8   :  { %2291 = vrot.lane.b32.xlu0 %v2286_v63, %s2776_s2 }
 0xff7   :  { %v2150_v0 = vpop.permute.xlu0 %2149 }
 0xff8   :  { %v2152_v32 = vmul.f32 %v2150_v0, %v2146_v5 }
 0xffa   :  { %2154 = vrot.lane.b32.xlu1 %v2152_v32, %s2776_s2 }
0x1056   :  { %v2290_v12 = vpop.permute.xlu1 %2289 }
0x1057   :  { %v2295_v46 = vadd.f32 %v2290_v12, %v2275_v20 }
0x1059   :  { %2739 = vtanh.f32 %v2295_v46 }
0x105a   :  { %v2292_v56 = vpop.permute.xlu0 %2291 }
0x105b   :  { %v2296_v54 = vadd.f32 %v2292_v56, %v2276_v48 }
0x105d   :  { %2741 = vtanh.f32 %v2296_v54 }
0x1066   :  { %v2740_v55 = vpop.eup %2739 }
0x1067   :  { %2301 = vrot.lane.b32.xlu0 %v2740_v55, %s2778_s13 }
0x106a   :  { %v2742_v37 = vpop.eup %2741 }
0x106b   :  { %2303 = vrot.lane.b32.xlu1 %v2742_v37, %s2778_s13 }
0x106c   :  { %v2155_v31 = vpop.permute.xlu1 %2154 }
0x106d   :  { %v3533_v14 = vadd.f32 %v2155_v31, %v2147_v29 }
0x106f   :  { %2743 = vtanh.f32 %v3533_v14 }
0x107c   :  { %v2744_v60 = vpop.eup %2743 }
0x107d   :  { %2160 = vrot.lane.b32.xlu0 %v2744_v60, %s2778_s13 }
0x10d9   :  { %v2302_v26 = vpop.permute.xlu0 %2301 }
0x10da   :  { %v2307_v13 = vmul.f32 %v2302_v26, %v2267_v45 }
0x10dc   :  { %2311 = vperm.xlu1 %2636, %v2307_v13  }
0x10dd   :  { %v2304_v36 = vpop.permute.xlu1 %2303 }
0x10de   :  { %v2308_v43 = vmul.f32 %v2304_v36, %v2268_v11 }
0x10e0   :  { %2316 = vperm.xlu0 %2637, %v2308_v43   ;;  %2638 = vset.pattern.permute.xlu1 %v3757_v41 }
0x10e1   :  { %2329 = vperm.xlu1 %2638, %v2307_v13  }
0x10e4   :  { %2639 = vset.pattern.permute.xlu0 %v3759_v52 }
0x10e5   :  { %2346 = vperm.xlu0 %2639, %v2307_v13   ;;  %2333 = vperm.xlu1 %2638, %v2308_v43  }
0x10e9   :  { %2642 = vset.pattern.permute.xlu0 %v3758_v59  ;;  %2640 = vset.pattern.permute.xlu1 %v3759_v52 }
0x10ea   :  { %2367 = vperm.xlu0 %2642, %v2308_v43   ;;  %2350 = vperm.xlu1 %2640, %v2308_v43  }
0x10ee   :  { %2644 = vset.pattern.permute.xlu0 %v3753_v57  ;;  %2641 = vset.pattern.permute.xlu1 %v3758_v59 }
0x10ef   :  { %2397 = vperm.xlu0 %2644, %v2307_v13   ;;  %2363 = vperm.xlu1 %2641, %v2307_v13   ;;  %v2161_v3 = vpop.permute.xlu0 %2160 }
0x10f0   :  { %v3543_v44 = vmul.f32 %v2161_v3, %v2146_v5 }
0x10f3   :  { %2647 = vset.pattern.permute.xlu0 %v3757_v41  ;;  %2643 = vset.pattern.permute.xlu1 %v3755_v51 }
0x10f4   :  { %2380 = vperm.xlu1 %2643, %v2307_v13   ;;  %2420 = vperm.xlu0 %2647, %v3543_v44  }
0x10f8   :  { %2384 = vperm.xlu1 %2643, %v2308_v43   ;;  %2650 = vset.pattern.permute.xlu0 %v3755_v51 }
0x10f9   :  { %2438 = vperm.xlu0 %2650, %v3543_v44  }
0x10fc   :  { %2645 = vset.pattern.permute.xlu1 %v3753_v57 }
0x10fd   :  { %2401 = vperm.xlu1 %2645, %v2308_v43   ;;  %2652 = vset.pattern.permute.xlu0 %v3753_v57 }
0x1101   :  { %2646 = vset.pattern.permute.xlu1 %v3756_v23 }
0x1102   :  { %2414 = vperm.xlu1 %2646, %v3543_v44  }
0x1106   :  { %2648 = vset.pattern.permute.xlu1 %v3759_v52 }
0x1107   :  { %2426 = vperm.xlu1 %2648, %v3543_v44  }
0x110b   :  { %2649 = vset.pattern.permute.xlu1 %v3758_v59 }
0x110c   :  { %2432 = vperm.xlu1 %2649, %v3543_v44  }
0x1110   :  { %2651 = vset.pattern.permute.xlu1 %v3753_v57 }
0x1111   :  { %2444 = vperm.xlu1 %2651, %v3543_v44  }
0x1157   :  { %v2312_v51 = vpop.permute.xlu1 %2311 }
0x1158   :  { %v2319_v52 = vmul.f32 %v2312_v51, %v2922_v25 }
0x115a   :  { %v2323_v22 = vrot.slane %v2319_v52, 7 }
0x115b   :  { %v2317_v8 = vpop.permute.xlu0 %2316 }
0x115c   :  { %v2330_v41 = vpop.permute.xlu1 %2329  ;;  %v2320_v10 = vmul.f32 %v2317_v8, %v2922_v25 }
0x115d   :  { %v2336_v50 = vmul.f32 %v2330_v41, %v2929_v34 }
0x115e   :  { %v2324_v59 = vrot.slane %v2320_v10, 6 }
0x115f   :  { %v2340_v27 = vrot.slane %v2336_v50, 7 }
0x1160   :  { %v2334_v58 = vpop.permute.xlu1 %2333  ;;  %v2347_v23 = vpop.permute.xlu0 %2346  ;;  %v2325_v33 = vsel %vm179_vm0, %v2324_v59, %v2323_v22 }
0x1161   :  { %v2337_v40 = vmul.f32 %v2334_v58, %v2929_v34  ;;  %v2353_v15 = vmul.f32 %v2347_v23, %v2934_v38  ;;  %v2327_v0 = vadd.f32 %v3504_v24, %v2325_v33  ;;  %v3762_v33 = vld [vmem:[#allocation7_spill] sm:$0xff] }
0x1163   :  { %v2341_v35 = vrot.slane %v2337_v40, 6  ;;  %v2357_v63 = vrot.slane %v2353_v15, 7 }
0x1165   :  { %v2351_v16 = vpop.permute.xlu1 %2350  ;;  %v2368_v1 = vpop.permute.xlu0 %2367  ;;  %v2342_v17 = vsel %vm179_vm0, %v2341_v35, %v2340_v27 }
0x1166   :  { %v2354_v57 = vmul.f32 %v2351_v16, %v2934_v38  ;;  %v2371_v25 = vmul.f32 %v2368_v1, %v2940_v42  ;;  %v2344_v12 = vadd.f32 %v2342_v17, %v2327_v0  ;;  %v3764_v17 = vld [vmem:[#allocation8_spill] sm:$0xff] }
0x1168   :  { %v2358_v11 = vrot.slane %v2354_v57, 6  ;;  %v2375_v20 = vrot.slane %v2371_v25, 6 }
0x116a   :  { %v2364_v49 = vpop.permute.xlu1 %2363  ;;  %v2398_v32 = vpop.permute.xlu0 %2397  ;;  %v2359_v28 = vsel %vm179_vm0, %v2358_v11, %v2357_v63  ;;  %v3763_v11 = vld [vmem:[#allocation5_spill] sm:$0xff] }
0x116b   :  { %v2370_v45 = vmul.f32 %v2364_v49, %v2940_v42  ;;  %v2404_v42 = vmul.f32 %v2398_v32, %v2978_v62  ;;  %v2361_v56 = vadd.f32 %v2359_v28, %v2344_v12 }
0x116d   :  { %v2374_v34 = vrot.slane %v2370_v45, 7  ;;  %v2408_v29 = vrot.slane %v2404_v42, 7 }
0x116f   :  { %v2381_v18 = vpop.permute.xlu1 %2380  ;;  %v2376_v46 = vsel %vm179_vm0, %v2375_v20, %v2374_v34  ;;  %v2421_v43 = vpop.permute.xlu0 %2420 }
0x1170   :  { %v2387_v19 = vmul.f32 %v2381_v18, %v2958_v61  ;;  %v2378_v24 = vadd.f32 %v2376_v46, %v2361_v56  ;;  %v2423_v51 = vmul.f32 %v2421_v43, %v2987_v30  ;;  %v2784_v30 = vmov 1966171168  }
0x1171   :  { %v341_v1 = vunpack.c.l.s4 %v2784_v30 }
0x1172   :  { %v2391_v48 = vrot.slane %v2387_v19, 7 }
0x1173   :  { %v2385_v5 = vpop.permute.xlu1 %2384 }
0x1174   :  { %v2388_v38 = vmul.f32 %v2385_v5, %v2958_v61  ;;  %v2439_v16 = vpop.permute.xlu0 %2438  ;;  %v3765_v5 = vld [vmem:[#allocation9_spill] sm:$0xff] }
0x1175   :  { %v2441_v49 = vmul.f32 %v2439_v16, %v3001_v47 }
0x1176   :  { %v2392_v21 = vrot.slane %v2388_v38, 6 }
0x1178   :  { %v2402_v54 = vpop.permute.xlu1 %2401  ;;  %v2393_v55 = vsel %vm179_vm0, %v2392_v21, %v2391_v48 }
0x1179   :  { %v2405_v37 = vmul.f32 %v2402_v54, %v2978_v62  ;;  %v2395_v61 = vadd.f32 %v2393_v55, %v2378_v24 }
0x117b   :  { %v2409_v31 = vrot.slane %v2405_v37, 6 }
0x117d   :  { %v2415_v60 = vpop.permute.xlu1 %2414  ;;  %v2410_v26 = vsel %vm179_vm0, %v2409_v31, %v2408_v29 }
0x117e   :  { %v2412_v13 = vadd.f32 %v2410_v26, %v2395_v61  ;;  %v2417_v36 = vmul.f32 %v2415_v60, %v2981_v2 }
0x1180   :  { %v2418_v3 = vadd.f32 %v2417_v36, %v2412_v13 }
0x1182   :  { %v2427_v41 = vpop.permute.xlu1 %2426  ;;  %v2424_v58 = vadd.f32 %v2423_v51, %v2418_v3 }
0x1183   :  { %v2429_v8 = vmul.f32 %v2427_v41, %v2992_v39  ;;  %v342_v39 = vunpack.c.0.s8 %v341_v1 }
0x1185   :  { %v2430_v23 = vadd.f32 %v2429_v8, %v2424_v58  ;;  %v3587_v22 = vsub.s32 %v342_v39, %v2835_v4 }
0x1187   :  { %v2433_v62 = vpop.permute.xlu1 %2432  ;;  %v646_v27 = vrot.slane %v3762_v33, %v3587_v22  ;;  %v951_v63 = vrot.slane %v3764_v17, %v3587_v22  ;;  %v1256_v0 = vrot.slane %v3765_v5, %v3587_v22  ;;  %v1561_v28 = vrot.slane %v3376_v53, %v3587_v22 }
0x1188   :  { %v2435_v10 = vmul.f32 %v2433_v62, %v2997_v7  ;;  %v3761_v7 = vld [vmem:[#allocation6_spill] sm:$0xff]  ;;  %v1866_v21 = vrot.slane %v3460_v6, %v3587_v22  ;;  %v2171_v48 = vrot.slane %v3543_v44, %v3587_v22 }
0x1189   :  { %v346_v47 = vrot.slane %v3761_v7, %v3587_v22  ;;  %v654_v4 = vrot.slane %v646_v27, %v3587_v22  ;;  %v959_v19 = vrot.slane %v951_v63, %v3587_v22  ;;  %v1264_v38 = vrot.slane %v1256_v0, %v3587_v22 }
0x118a   :  { %v2436_v52 = vadd.f32 %v2435_v10, %v2430_v23  ;;  %v1569_v12 = vrot.slane %v1561_v28, %v3587_v22  ;;  %v1874_v42 = vrot.slane %v1866_v21, %v3587_v22  ;;  %v2179_v56 = vrot.slane %v2171_v48, %v3587_v22 }
0x118b   :  { %v354_v18 = vrot.slane %v346_v47, %v3587_v22  ;;  %v665_v34 = vrot.slane %v654_v4, %v3763_v11  ;;  %v970_v32 = vrot.slane %v959_v19, %v3763_v11  ;;  %v1275_v20 = vrot.slane %v1264_v38, %v3763_v11 }
0x118c   :  { %v2445_v40 = vpop.permute.xlu1 %2444  ;;  %v2442_v59 = vadd.f32 %v2441_v49, %v2436_v52  ;;  %v1580_v46 = vrot.slane %v1569_v12, %v3763_v11  ;;  %v1885_v53 = vrot.slane %v1874_v42, %v3763_v11  ;;  %v2190_v54 = vrot.slane %v2179_v56, %v3763_v11 }
0x118d   :  { %v2447_v2 = vmul.f32 %v2445_v40, %v3005_v9  ;;  %v365_v25 = vrot.slane %v354_v18, %v3763_v11  ;;  %v347_v29 = vcombine.high %v346_v47, %v346_v47  ;;  %v647_v61 = vcombine.high %v646_v27, %v646_v27 }
0x118e   :  { %v952_v43 = vcombine.high %v951_v63, %v951_v63  ;;  %v1257_v58 = vcombine.high %v1256_v0, %v1256_v0  ;;  %v1562_v23 = vcombine.high %v1561_v28, %v1561_v28  ;;  %v1867_v40 = vcombine.high %v1866_v21, %v1866_v21 }
0x118f   :  { %v2448_v50 = vadd.f32 %v2447_v2, %v2442_v59  ;;  %v661_v36 = vrot.slane %v647_v61, %v3587_v22 }
0x1190   :  { %v966_v41 = vrot.slane %v952_v43, %v3587_v22  ;;  %v1271_v62 = vrot.slane %v1257_v58, %v3587_v22  ;;  %v1576_v52 = vrot.slane %v1562_v23, %v3587_v22  ;;  %v1881_v2 = vrot.slane %v1867_v40, %v3587_v22 }
0x1191   :  { %2745 = vtanh.f32 %v2448_v50  ;;  %v669_v51 = vrot.slane %v661_v36, %v3763_v11  ;;  %v2172_v50 = vcombine.high %v2171_v48, %v2171_v48 }
0x1192   :  { %v974_v16 = vrot.slane %v966_v41, %v3763_v11  ;;  %v1279_v49 = vrot.slane %v1271_v62, %v3763_v11  ;;  %v1584_v59 = vrot.slane %v1576_v52, %v3763_v11 }
0x1193   :  { %v2186_v30 = vrot.slane %v2172_v50, %v3587_v22 }
0x1195   :  { %v2194_v1 = vrot.slane %v2186_v30, %v3763_v11 }
0x119e   :  { %v2746_v57 = vpop.eup %2745 }
0x119f   :  { %2454 = vrot.lane.b32.xlu1 %v2746_v57, %s2775_s1  ;;  %v2450_v35 = vadd.f32 1.0, %v2746_v57  ;;  %v1889_v57 = vrot.slane %v1881_v2, %v3763_v11 }
0x11a1   :  { %v3591_v15 = vmul.f32 0.5, %v2450_v35 }
0x11a3   :  { %v2452_v6 = vmul.f32 %v3591_v15, %v3533_v14  ;;  %v361_v14 = vrot.slane %v347_v29, %v3587_v22 }
0x11a5   :  { %v369_v13 = vrot.slane %v361_v14, %v3763_v11 }
0x1211   :  { %v2455_v45 = vpop.permute.xlu1 %2454 }
0x1212   :  { %v2457_v9 = vmul.f32 %v2455_v45, %v3591_v15 }
0x1214   :  { %2459 = vrot.lane.b32.xlu0 %v2457_v9, %s2776_s2 }
0x1218   :  { %370 = vrot.lane.b32.xlu0 %v365_v25, %s2785_s6 }
0x121c   :  { %670 = vrot.lane.b32.xlu0 %v665_v34, %s2785_s6 }
0x1220   :  { %975 = vrot.lane.b32.xlu0 %v970_v32, %s2785_s6 }
0x1224   :  { %1280 = vrot.lane.b32.xlu0 %v1275_v20, %s2785_s6 }
0x1228   :  { %1585 = vrot.lane.b32.xlu0 %v1580_v46, %s2785_s6 }
0x122c   :  { %1890 = vrot.lane.b32.xlu0 %v1885_v53, %s2785_s6 }
0x1230   :  { %2195 = vrot.lane.b32.xlu0 %v2190_v54, %s2785_s6 }
0x1286   :  { %v2460_v55 = vpop.permute.xlu0 %2459 }
0x1287   :  { %v2462_v37 = vadd.f32 %v2460_v55, %v2452_v6 }
0x1289   :  { %2747 = vtanh.f32 %v2462_v37 }
0x128a   :  { %v371_v44 = vpop.permute.xlu0 %370 }
0x128b   :  { %377 = vst.msk [vmem:[%s3731_s7] sm:$0x1] %vm376_vm1, %v371_v44 }
0x128e   :  { %v671_v24 = vpop.permute.xlu0 %670 }
0x128f   :  { %676 = vst.msk [vmem:[%s3731_s7 + $0x1] sm:$0x1] %vm376_vm1, %v671_v24 }
0x1292   :  { %v976_v31 = vpop.permute.xlu0 %975 }
0x1293   :  { %981 = vst.msk [vmem:[%s3731_s7 + $0x2] sm:$0x1] %vm376_vm1, %v976_v31 }
0x1296   :  { %v2748_v60 = vpop.eup %2747  ;;  %v1281_v26 = vpop.permute.xlu0 %1280 }
0x1297   :  { %1286 = vst.msk [vmem:[%s3731_s7 + $0x3] sm:$0x1] %vm376_vm1, %v1281_v26  ;;  %2465 = vrot.lane.b32.xlu1 %v2748_v60, %s2778_s13 }
0x129a   :  { %v1586_v3 = vpop.permute.xlu0 %1585 }
0x129b   :  { %1591 = vst.msk [vmem:[%s3731_s7 + $0x4] sm:$0x1] %vm376_vm1, %v1586_v3  ;;  %372 = vrot.lane.b32.xlu1 %v369_v13, %s2785_s6 }
0x129e   :  { %v1891_v8 = vpop.permute.xlu0 %1890 }
0x129f   :  { %1896 = vst.msk [vmem:[%s3731_s7 + $0x5] sm:$0x1] %vm376_vm1, %v1891_v8  ;;  %672 = vrot.lane.b32.xlu1 %v669_v51, %s2785_s6 }
0x12a2   :  { %v2196_v10 = vpop.permute.xlu0 %2195 }
0x12a3   :  { %2201 = vst.msk [vmem:[%s3731_s7 + $0x6] sm:$0x1] %vm376_vm1, %v2196_v10  ;;  %977 = vrot.lane.b32.xlu1 %v974_v16, %s2785_s6 }
0x12a7   :  { %1282 = vrot.lane.b32.xlu1 %v1279_v49, %s2785_s6 }
0x12ab   :  { %1587 = vrot.lane.b32.xlu1 %v1584_v59, %s2785_s6 }
0x12af   :  { %1892 = vrot.lane.b32.xlu1 %v1889_v57, %s2785_s6 }
0x12b3   :  { %2197 = vrot.lane.b32.xlu1 %v2194_v1, %s2785_s6 }
0x1309   :  { %v2466_v39 = vpop.permute.xlu1 %2465 }
0x130a   :  { %v2468_v35 = vmul.f32 %v2466_v39, %v3591_v15 }
0x130c   :  { %v2476_v7 = vrot.slane %v2468_v35, %v3587_v22 }
0x130d   :  { %v373_v47 = vpop.permute.xlu1 %372 }
0x130e   :  { %v2477_v45 = vcombine.high %v2476_v7, %v2476_v7  ;;  %v2484_v9 = vrot.slane %v2476_v7, %v3587_v22  ;;  %378 = vst.msk [vmem:[%s3731_s7 + $0x8] sm:$0x1] %vm376_vm1, %v373_v47 }
0x1310   :  { %v2491_v18 = vrot.slane %v2477_v45, %v3587_v22  ;;  %v2495_v33 = vrot.slane %v2484_v9, %v3763_v11 }
0x1311   :  { %v673_v27 = vpop.permute.xlu1 %672 }
0x1312   :  { %677 = vst.msk [vmem:[%s3731_s7 + $0x9] sm:$0x1] %vm376_vm1, %v673_v27  ;;  %2500 = vrot.lane.b32.xlu0 %v2495_v33, %s2785_s6  ;;  %v2499_v15 = vrot.slane %v2491_v18, %v3763_v11 }
0x1314   :  { %2502 = vrot.lane.b32.xlu1 %v2499_v15, %s2785_s6 }
0x1315   :  { %v978_v25 = vpop.permute.xlu1 %977 }
0x1316   :  { %982 = vst.msk [vmem:[%s3731_s7 + $0xa] sm:$0x1] %vm376_vm1, %v978_v25 }
0x1319   :  { %v1283_v22 = vpop.permute.xlu1 %1282 }
0x131a   :  { %1287 = vst.msk [vmem:[%s3731_s7 + $0xb] sm:$0x1] %vm376_vm1, %v1283_v22 }
0x131d   :  { %v1588_v4 = vpop.permute.xlu1 %1587 }
0x131e   :  { %1592 = vst.msk [vmem:[%s3731_s7 + $0xc] sm:$0x1] %vm376_vm1, %v1588_v4 }
0x1321   :  { %v1893_v11 = vpop.permute.xlu1 %1892 }
0x1322   :  { %1897 = vst.msk [vmem:[%s3731_s7 + $0xd] sm:$0x1] %vm376_vm1, %v1893_v11 }
0x1325   :  { %v2198_v17 = vpop.permute.xlu1 %2197 }
0x1326   :  { %2202 = vst.msk [vmem:[%s3731_s7 + $0xe] sm:$0x1] %vm376_vm1, %v2198_v17 }
0x1384   :  { %v2501_v63 = vpop.permute.xlu0 %2500 }
0x1385   :  { %2506 = vst.msk [vmem:[%s3731_s7 + $0x7] sm:$0x1] %vm376_vm1, %v2501_v63 }
0x1386   :  { %v2503_v34 = vpop.permute.xlu1 %2502 }
0x1387   :  { %2507 = vst.msk [vmem:[%s3731_s7 + $0xf] sm:$0x1] %vm376_vm1, %v2503_v34 }
0x1388   :  { %2512 = vsyncpa [#allocation3], 1 }

</bundles_post_ra>
